<compile_context>
chip_gen: v7x
topology: tpu7x:2x2x1
jax: 0.10.0
libtpu: 0.0.40
codegen_flags: <defaults>
</compile_context>

<pallas_src>
import numpy as np
import jax
import jax.numpy as jnp
from jax import lax
from jax.experimental import pallas as pl
from jax.experimental.pallas import tpu as pltpu


# ----------------------------------------------------------------------------
# Parameter init (deterministic, mirrors the PyTorch __init__)
# ----------------------------------------------------------------------------
def xavier_uniform(key, shape_hwio, gain):
    kh, kw, cin, cout = shape_hwio
    fan_in = cin * kh * kw
    fan_out = cout * kh * kw
    bound = gain * np.sqrt(6.0 / (fan_in + fan_out))
    return jax.random.uniform(key, shape_hwio, jnp.float32, -bound, bound)


def conv_bias(key, cin, kh, kw, cout):
    fan_in = cin * kh * kw
    bound = 1.0 / np.sqrt(fan_in)
    return jax.random.uniform(key, (cout,), jnp.float32, -bound, bound)


def spectral_normalize(key, w_hwio, n_iter=1, eps=1e-12):
    # PyTorch spectral_norm: reshape OIHW weight to (Cout, -1), 1 power iter.
    # TODO(synk): PyTorch's `u` vector evolves statefully across forward calls;
    # here we model a freshly-initialized module (one deterministic iteration).
    kh, kw, cin, cout = w_hwio.shape
    mat = jnp.transpose(w_hwio, (3, 2, 0, 1)).reshape(cout, -1)
    u = jax.random.normal(key, (cout,), jnp.float32)
    u = u / (jnp.linalg.norm(u) + eps)
    v = jnp.zeros((mat.shape[1],), jnp.float32)
    for _ in range(n_iter):
        v = mat.T @ u
        v = v / (jnp.linalg.norm(v) + eps)
        u = mat @ v
        u = u / (jnp.linalg.norm(u) + eps)
    sigma = u @ (mat @ v)
    return w_hwio / sigma


def init_params(key, cin, cout):
    k1, k2, k3, kb1, kb2, kb3, ku1, ku2, ku3 = jax.random.split(key, 9)
    w1 = spectral_normalize(ku1, xavier_uniform(k1, (3, 3, cin, cout), 1.0))
    w2 = spectral_normalize(ku2, xavier_uniform(k2, (3, 3, cout, cout), 1.0))
    b1 = conv_bias(kb1, cin, 3, 3, cout)
    b2 = conv_bias(kb2, cout, 3, 3, cout)
    if cin != cout:
        wb4 = spectral_normalize(
            ku3, xavier_uniform(k3, (1, 1, cin, cout), float(np.sqrt(2.0))))
        wb = wb4.reshape(cin, cout)
        bb = conv_bias(kb3, cin, 1, 1, cout)
    else:
        # identity bypass (empty nn.Sequential) — handled exactly in-kernel
        wb = jnp.eye(cin, dtype=jnp.float32)
        bb = jnp.zeros((cout,), jnp.float32)
    return dict(w1=w1, b1=b1, w2=w2, b2=b2, wb=wb, bb=bb)


# ----------------------------------------------------------------------------
# Helpers
# ----------------------------------------------------------------------------
def _round_up(a, b):
    return ((a + b - 1) // b) * b


def _cdiv(a, b):
    return (a + b - 1) // b


# ----------------------------------------------------------------------------
# Pallas kernel
# ----------------------------------------------------------------------------
def _make_kernel(Wp, Cp, LB, stride, conv_bypass):
    # tap t = ky*3 + kx reads padded position p + o_t (image-local; interior
    # positions never cross an image's L-chunk since |o_t| <= Wp + 1).
    taps = [(ky - 1) * Wp + (kx - 1) for ky in range(3) for kx in range(3)]

    def conv3x3(src, w_ref, b_ref):
        # src: (Cp, LB) f32, zeros at each image's ring/tail.
        # Per-tap accumulation: 9 lane rolls (XLU) feeding bf16 MXU dots,
        # accumulated in one f32 chain (MRB in-place accumulate on v7x).
        acc = None
        for t, o in enumerate(taps):
            rolled = src if o == 0 else pltpu.roll(src, (-o) % LB, axis=1)
            part = jnp.dot(w_ref[t], rolled.astype(jnp.bfloat16),
                           preferred_element_type=jnp.float32)
            acc = part if acc is None else acc + part
        return acc + b_ref[...]

    def kernel(x_ref, w1_ref, b1_ref, w2_ref, b2_ref, wb_ref, bb_ref,
               mask_ref, out_ref):
        x = x_ref[0]                                   # (Cp, LB), padded input
        h = jnp.maximum(x, 0.0)                        # ReLU (zeros stay zero)
        c1 = conv3x3(h, w1_ref, b1_ref)                # conv1 + bias
        # re-zero ring/tail so conv2 sees proper zero padding (VPU select)
        h2 = jnp.maximum(c1, 0.0) * mask_ref[...]
        c2 = conv3x3(h2, w2_ref, b2_ref)               # conv2 + bias
        if conv_bypass:
            byp = jnp.dot(wb_ref[...], x.astype(jnp.bfloat16),
                          preferred_element_type=jnp.float32) + bb_ref[...]
        else:
            byp = x                                    # identity bypass, exact f32
        total = c2 + byp                               # (Cp, LB)
        if stride == 2:
            # AvgPool2d(2,2): 3 lane rolls + adds; anchors (even y, even x)
            # hold the pooled value; subsampled in the wrapper (pure slicing).
            # TODO(synk): in-kernel anchor compaction would cut the stride-2
            # output writeback ~4x (biggest remaining HBM saving on v5e/v6e).
            t01 = pltpu.roll(total, LB - 1, axis=1)        # [p] = total[p+1]
            t10 = pltpu.roll(total, LB - Wp, axis=1)       # [p] = total[p+Wp]
            t11 = pltpu.roll(total, LB - Wp - 1, axis=1)   # [p] = total[p+Wp+1]
            total = 0.25 * (total + t01 + t10 + t11)
        out_ref[0] = total.astype(out_ref.dtype)

    return kernel


def _build_call(kernel, G, Cp, LB, vmem_limit, single_buffer_consts):
    def cspec(shape):
        idx = lambda g, _n=len(shape): (0,) * _n
        if single_buffer_consts:
            # Constants never change across grid steps: no double buffering.
            return pl.BlockSpec(shape, idx, pipeline_mode=pl.Buffered(1))
        return pl.BlockSpec(shape, idx)

    return pl.pallas_call(
        kernel,
        out_shape=jax.ShapeDtypeStruct((G, Cp, LB), jnp.float32),
        grid_spec=pltpu.PrefetchScalarGridSpec(
            num_scalar_prefetch=0,
            grid=(G,),
            in_specs=[
                pl.BlockSpec((1, Cp, LB), lambda g: (g, 0, 0)),   # x (stacked)
                cspec((9, Cp, Cp)),                               # w1 taps (bf16)
                cspec((Cp, 1)),                                   # b1
                cspec((9, Cp, Cp)),                               # w2 taps (bf16)
                cspec((Cp, 1)),                                   # b2
                cspec((Cp, Cp)),                                  # bypass W^T (bf16)
                cspec((Cp, 1)),                                   # bypass bias
                cspec((1, LB)),                                   # interior mask
            ],
            out_specs=pl.BlockSpec((1, Cp, LB), lambda g: (g, 0, 0)),
        ),
        compiler_params=pltpu.CompilerParams(
            dimension_semantics=("parallel",),
            vmem_limit_bytes=vmem_limit),
    )


def resblock_forward(x_nhwc, params, stride):
    assert stride in (1, 2)
    N, H, W, Cin = x_nhwc.shape
    Cout = params["w1"].shape[-1]
    conv_bypass = (Cin != Cout)
    Cp = _round_up(max(Cin, Cout), 16)       # channels on sublanes (bf16 tile)
    Hp, Wp = H + 2, W + 2
    Np = Hp * Wp
    L = _round_up(Np, 128)                   # per-image lane-dense flat grid

    # ---- batch stacking: NB images per grid step along the lane axis --------
    # Target a grid extent of 2 (v7x has two TensorCores) while keeping the
    # per-step working set within a conservative VMEM budget.
    per_img_bytes = 12 * Cp * L * 4          # in/out (2-buf) + live f32 temps
    nb_max = max(1, (40 * 2 ** 20) // per_img_bytes)
    g_target = 2 if N >= 2 else 1
    NB = max(1, min(_cdiv(N, g_target), nb_max))
    G = _cdiv(N, NB)
    Ntot = G * NB
    LB = NB * L

    # ---- wrapper layout plumbing (one pad for batch/ring/channels) ----------
    xp = jnp.pad(x_nhwc, ((0, Ntot - N), (1, 1), (1, 1), (0, Cp - Cin)))
    xp = jnp.transpose(xp, (0, 3, 1, 2)).reshape(Ntot, Cp, Np)
    xp = jnp.pad(xp, ((0, 0), (0, 0), (0, L - Np)))            # tail pad to L
    xp = xp.reshape(G, NB, Cp, L).transpose(0, 2, 1, 3).reshape(G, Cp, LB)

    def pack3x3_taps(w):                     # HWIO (3,3,ci,co) -> (9,Cp,Cp) bf16
        ci, co = w.shape[2], w.shape[3]
        wpad = jnp.pad(w, ((0, 0), (0, 0), (0, Cp - ci), (0, Cp - co)))
        return (jnp.transpose(wpad, (0, 1, 3, 2))
                .reshape(9, Cp, Cp).astype(jnp.bfloat16))

    w1t = pack3x3_taps(params["w1"])
    w2t = pack3x3_taps(params["w2"])
    b1 = jnp.pad(params["b1"], (0, Cp - Cout)).reshape(Cp, 1)
    b2 = jnp.pad(params["b2"], (0, Cp - Cout)).reshape(Cp, 1)
    wbT = jnp.pad(params["wb"].T,
                  ((0, Cp - Cout), (0, Cp - Cin))).astype(jnp.bfloat16)
    bb = jnp.pad(params["bb"], (0, Cp - Cout)).reshape(Cp, 1)

    # interior mask over one image's padded flat grid, tiled across NB images
    pos = np.arange(L)
    row, col = pos // Wp, pos % Wp
    interior = (pos < Np) & (row >= 1) & (row <= H) & (col >= 1) & (col <= W)
    mask = jnp.asarray(np.tile(interior.astype(np.float32), NB)).reshape(1, LB)

    kernel = _make_kernel(Wp, Cp, LB, stride, conv_bypass)

    # explicit scoped-VMEM budget (v5e default is only 16 MiB; v7x has 64 MiB
    # physical) — sized from the actual blocks with headroom, capped at 64 MiB.
    est = (12 * Cp * LB * 4 + 2 * 9 * Cp * Cp * 2 + Cp * Cp * 2
           + LB * 4 + 3 * Cp * 4)
    vmem_limit = int(min(64 * 2 ** 20, max(32 * 2 ** 20, 2 * est)))

    operands = (xp, w1t, b1, w2t, b2, wbT, bb, mask)
    try:
        out = _build_call(kernel, G, Cp, LB, vmem_limit, True)(*operands)
        out = jax.block_until_ready(out)
    except Exception:
        # Fallback: if this jax build does not accept pl.Buffered(1) on a
        # top-level pallas_call BlockSpec, default double-buffering is
        # functionally identical (just slightly more VMEM for the constants).
        out = _build_call(kernel, G, Cp, LB, vmem_limit, False)(*operands)

    # ---- un-stack, crop interior / pooled anchors, restore NHWC -------------
    out = out.reshape(G, Cp, NB, L).transpose(0, 2, 1, 3).reshape(Ntot, Cp, L)
    out = out[:N, :Cout, :Np].reshape(N, Cout, Hp, Wp)
    if stride == 1:
        out = out[:, :, 1:1 + H, 1:1 + W]
    else:
        out = out[:, :, 1:1 + H:2, 1:1 + W:2]
    return jnp.transpose(out, (0, 2, 3, 1))


# ----------------------------------------------------------------------------
# Pure-JAX reference (correctness check only)
# ----------------------------------------------------------------------------
def ref_forward(x, params, stride):
    dn = ("NHWC", "HWIO", "NHWC")
    h = jnp.maximum(x, 0.0)
    h = lax.conv_general_dilated(h, params["w1"], (1, 1), [(1, 1), (1, 1)],
                                 dimension_numbers=dn) + params["b1"]
    h = jnp.maximum(h, 0.0)
    h = lax.conv_general_dilated(h, params["w2"], (1, 1), [(1, 1), (1, 1)],
                                 dimension_numbers=dn) + params["b2"]
    cin, cout = params["wb"].shape
    byp = lax.conv_general_dilated(x, params["wb"].reshape(1, 1, cin, cout),
                                   (1, 1), "VALID",
                                   dimension_numbers=dn) + params["bb"]
    if stride != 1:
        def pool(v):
            n, hh, ww, c = v.shape
            return v.reshape(n, hh // 2, 2, ww // 2, 2, c).mean(axis=(2, 4))
        h, byp = pool(h), pool(byp)
    return h + byp


# ----------------------------------------------------------------------------
if __name__ == "__main__":
    root = jax.random.PRNGKey(0)
    kx1, kp1, kx2, kp2, kx3, kp3 = jax.random.split(root, 6)

    # bf16 MXU operands (f32 accumulation) -> relaxed tolerance vs f32 reference
    RTOL = ATOL = 2e-2

    # Config 1: in_channels != out_channels, stride=2 (conv bypass + AvgPool)
    N, H, W, Cin, Cout, stride = 2, 16, 16, 4, 8, 2
    x1 = jax.random.normal(kx1, (N, H, W, Cin), jnp.float32)
    p1 = init_params(kp1, Cin, Cout)
    out1 = jax.block_until_ready(resblock_forward(x1, p1, stride))
    ref1 = ref_forward(x1, p1, stride)
    assert out1.shape == (N, H // 2, W // 2, Cout)
    np.testing.assert_allclose(np.asarray(out1), np.asarray(ref1),
                               rtol=RTOL, atol=ATOL)

    # Config 2: in_channels == out_channels, stride=1 (identity bypass)
    Cin2 = Cout2 = 4
    x2 = jax.random.normal(kx2, (N, H, W, Cin2), jnp.float32)
    p2 = init_params(kp2, Cin2, Cout2)
    out2 = jax.block_until_ready(resblock_forward(x2, p2, 1))
    ref2 = ref_forward(x2, p2, 1)
    assert out2.shape == (N, H, W, Cout2)
    np.testing.assert_allclose(np.asarray(out2), np.asarray(ref2),
                               rtol=RTOL, atol=ATOL)

    # Config 3: odd batch, exercises lane-axis batch stacking (NB>1) + batch pad
    N3, H3, W3, C3 = 5, 8, 8, 8
    x3 = jax.random.normal(kx3, (N3, H3, W3, C3), jnp.float32)
    p3 = init_params(kp3, C3, C3)
    out3 = jax.block_until_ready(resblock_forward(x3, p3, 2))
    ref3 = ref_forward(x3, p3, 2)
    assert out3.shape == (N3, H3 // 2, W3 // 2, C3)
    np.testing.assert_allclose(np.asarray(out3), np.asarray(ref3),
                               rtol=RTOL, atol=ATOL)

    print("KERNEL_OK")
</pallas_src>

<mosaic_0001>
module attributes {stable_mosaic.version = 11 : i64} {
  func.func @kernel(%arg0: i32, %arg1: memref<1x16x384xf32, #tpu.memory_space<vmem>>, %arg2: memref<9x16x16xbf16, #tpu.memory_space<vmem>>, %arg3: memref<16x1xf32, #tpu.memory_space<vmem>>, %arg4: memref<9x16x16xbf16, #tpu.memory_space<vmem>>, %arg5: memref<16x1xf32, #tpu.memory_space<vmem>>, %arg6: memref<16x16xbf16, #tpu.memory_space<vmem>>, %arg7: memref<16x1xf32, #tpu.memory_space<vmem>>, %arg8: memref<1x384xf32, #tpu.memory_space<vmem>>, %arg9: memref<1x16x384xf32, #tpu.memory_space<vmem>>) attributes {dimension_semantics = [#tpu.dimension_semantics<parallel>], iteration_bounds = array<i64: 2>, scalar_prefetch = 0 : i64, scratch_operands = 0 : i64, tpu.core_type = #tpu.core_type<tc>, window_params = [{transform_indices = @transform_0, window_bounds = array<i64: 1, 16, 384>}, {pipeline_mode = #tpu.pipeline_mode<synchronous>, transform_indices = @transform_1, window_bounds = array<i64: 9, 16, 16>}, {pipeline_mode = #tpu.pipeline_mode<synchronous>, transform_indices = @transform_2, window_bounds = array<i64: 16, 1>}, {pipeline_mode = #tpu.pipeline_mode<synchronous>, transform_indices = @transform_3, window_bounds = array<i64: 9, 16, 16>}, {pipeline_mode = #tpu.pipeline_mode<synchronous>, transform_indices = @transform_4, window_bounds = array<i64: 16, 1>}, {pipeline_mode = #tpu.pipeline_mode<synchronous>, transform_indices = @transform_5, window_bounds = array<i64: 16, 16>}, {pipeline_mode = #tpu.pipeline_mode<synchronous>, transform_indices = @transform_6, window_bounds = array<i64: 16, 1>}, {pipeline_mode = #tpu.pipeline_mode<synchronous>, transform_indices = @transform_7, window_bounds = array<i64: 1, 384>}, {transform_indices = @transform_8, window_bounds = array<i64: 1, 16, 384>}]} {
    %c0 = arith.constant 0 : index
    %c0_0 = arith.constant 0 : index
    %c0_1 = arith.constant 0 : index
    %0 = vector.load %arg1[%c0, %c0_0, %c0_1] : memref<1x16x384xf32, #tpu.memory_space<vmem>>, vector<1x16x384xf32>
    %1 = vector.shape_cast %0 : vector<1x16x384xf32> to vector<16x384xf32>
    %cst = arith.constant 0.000000e+00 : f32
    %2 = vector.broadcast %cst : f32 to vector<16x384xf32>
    %3 = arith.maximumf %1, %2 : vector<16x384xf32>
    %c19_i32 = arith.constant 19 : i32
    %4 = tpu.dynamic_rotate %3 by %c19_i32 dim 1 : vector<16x384xf32>, i32 -> vector<16x384xf32>
    %c0_2 = arith.constant 0 : index
    %c0_3 = arith.constant 0 : index
    %c0_4 = arith.constant 0 : index
    %5 = vector.load %arg2[%c0_2, %c0_3, %c0_4] : memref<9x16x16xbf16, #tpu.memory_space<vmem>>, vector<1x16x16xbf16>
    %6 = vector.shape_cast %5 : vector<1x16x16xbf16> to vector<16x16xbf16>
    %7 = arith.truncf %4 : vector<16x384xf32> to vector<16x384xbf16>
    %cst_5 = arith.constant dense<0.000000e+00> : vector<16x384xf32>
    %8 = tpu.matmul %6, %7, %cst_5 {dimension_numbers = #tpu.dot_dimension_numbers<[1], [0], [0], [1], [0, 0, 1, 1], [], []>} : vector<16x16xbf16>, vector<16x384xbf16>, vector<16x384xf32> -> vector<16x384xf32>
    %c18_i32 = arith.constant 18 : i32
    %9 = tpu.dynamic_rotate %3 by %c18_i32 dim 1 : vector<16x384xf32>, i32 -> vector<16x384xf32>
    %c1 = arith.constant 1 : index
    %c0_6 = arith.constant 0 : index
    %c0_7 = arith.constant 0 : index
    %10 = vector.load %arg2[%c1, %c0_6, %c0_7] : memref<9x16x16xbf16, #tpu.memory_space<vmem>>, vector<1x16x16xbf16>
    %11 = vector.shape_cast %10 : vector<1x16x16xbf16> to vector<16x16xbf16>
    %12 = arith.truncf %9 : vector<16x384xf32> to vector<16x384xbf16>
    %cst_8 = arith.constant dense<0.000000e+00> : vector<16x384xf32>
    %13 = tpu.matmul %11, %12, %cst_8 {dimension_numbers = #tpu.dot_dimension_numbers<[1], [0], [0], [1], [0, 0, 1, 1], [], []>} : vector<16x16xbf16>, vector<16x384xbf16>, vector<16x384xf32> -> vector<16x384xf32>
    %14 = arith.addf %8, %13 : vector<16x384xf32>
    %c17_i32 = arith.constant 17 : i32
    %15 = tpu.dynamic_rotate %3 by %c17_i32 dim 1 : vector<16x384xf32>, i32 -> vector<16x384xf32>
    %c2 = arith.constant 2 : index
    %c0_9 = arith.constant 0 : index
    %c0_10 = arith.constant 0 : index
    %16 = vector.load %arg2[%c2, %c0_9, %c0_10] : memref<9x16x16xbf16, #tpu.memory_space<vmem>>, vector<1x16x16xbf16>
    %17 = vector.shape_cast %16 : vector<1x16x16xbf16> to vector<16x16xbf16>
    %18 = arith.truncf %15 : vector<16x384xf32> to vector<16x384xbf16>
    %cst_11 = arith.constant dense<0.000000e+00> : vector<16x384xf32>
    %19 = tpu.matmul %17, %18, %cst_11 {dimension_numbers = #tpu.dot_dimension_numbers<[1], [0], [0], [1], [0, 0, 1, 1], [], []>} : vector<16x16xbf16>, vector<16x384xbf16>, vector<16x384xf32> -> vector<16x384xf32>
    %20 = arith.addf %14, %19 : vector<16x384xf32>
    %c1_i32 = arith.constant 1 : i32
    %21 = tpu.dynamic_rotate %3 by %c1_i32 dim 1 : vector<16x384xf32>, i32 -> vector<16x384xf32>
    %c3 = arith.constant 3 : index
    %c0_12 = arith.constant 0 : index
    %c0_13 = arith.constant 0 : index
    %22 = vector.load %arg2[%c3, %c0_12, %c0_13] : memref<9x16x16xbf16, #tpu.memory_space<vmem>>, vector<1x16x16xbf16>
    %23 = vector.shape_cast %22 : vector<1x16x16xbf16> to vector<16x16xbf16>
    %24 = arith.truncf %21 : vector<16x384xf32> to vector<16x384xbf16>
    %cst_14 = arith.constant dense<0.000000e+00> : vector<16x384xf32>
    %25 = tpu.matmul %23, %24, %cst_14 {dimension_numbers = #tpu.dot_dimension_numbers<[1], [0], [0], [1], [0, 0, 1, 1], [], []>} : vector<16x16xbf16>, vector<16x384xbf16>, vector<16x384xf32> -> vector<16x384xf32>
    %26 = arith.addf %20, %25 : vector<16x384xf32>
    %c4 = arith.constant 4 : index
    %c0_15 = arith.constant 0 : index
    %c0_16 = arith.constant 0 : index
    %27 = vector.load %arg2[%c4, %c0_15, %c0_16] : memref<9x16x16xbf16, #tpu.memory_space<vmem>>, vector<1x16x16xbf16>
    %28 = vector.shape_cast %27 : vector<1x16x16xbf16> to vector<16x16xbf16>
    %29 = arith.truncf %3 : vector<16x384xf32> to vector<16x384xbf16>
    %cst_17 = arith.constant dense<0.000000e+00> : vector<16x384xf32>
    %30 = tpu.matmul %28, %29, %cst_17 {dimension_numbers = #tpu.dot_dimension_numbers<[1], [0], [0], [1], [0, 0, 1, 1], [], []>} : vector<16x16xbf16>, vector<16x384xbf16>, vector<16x384xf32> -> vector<16x384xf32>
    %31 = arith.addf %26, %30 : vector<16x384xf32>
    %c383_i32 = arith.constant 383 : i32
    %32 = tpu.dynamic_rotate %3 by %c383_i32 dim 1 : vector<16x384xf32>, i32 -> vector<16x384xf32>
    %c5 = arith.constant 5 : index
    %c0_18 = arith.constant 0 : index
    %c0_19 = arith.constant 0 : index
    %33 = vector.load %arg2[%c5, %c0_18, %c0_19] : memref<9x16x16xbf16, #tpu.memory_space<vmem>>, vector<1x16x16xbf16>
    %34 = vector.shape_cast %33 : vector<1x16x16xbf16> to vector<16x16xbf16>
    %35 = arith.truncf %32 : vector<16x384xf32> to vector<16x384xbf16>
    %cst_20 = arith.constant dense<0.000000e+00> : vector<16x384xf32>
    %36 = tpu.matmul %34, %35, %cst_20 {dimension_numbers = #tpu.dot_dimension_numbers<[1], [0], [0], [1], [0, 0, 1, 1], [], []>} : vector<16x16xbf16>, vector<16x384xbf16>, vector<16x384xf32> -> vector<16x384xf32>
    %37 = arith.addf %31, %36 : vector<16x384xf32>
    %c367_i32 = arith.constant 367 : i32
    %38 = tpu.dynamic_rotate %3 by %c367_i32 dim 1 : vector<16x384xf32>, i32 -> vector<16x384xf32>
    %c6 = arith.constant 6 : index
    %c0_21 = arith.constant 0 : index
    %c0_22 = arith.constant 0 : index
    %39 = vector.load %arg2[%c6, %c0_21, %c0_22] : memref<9x16x16xbf16, #tpu.memory_space<vmem>>, vector<1x16x16xbf16>
    %40 = vector.shape_cast %39 : vector<1x16x16xbf16> to vector<16x16xbf16>
    %41 = arith.truncf %38 : vector<16x384xf32> to vector<16x384xbf16>
    %cst_23 = arith.constant dense<0.000000e+00> : vector<16x384xf32>
    %42 = tpu.matmul %40, %41, %cst_23 {dimension_numbers = #tpu.dot_dimension_numbers<[1], [0], [0], [1], [0, 0, 1, 1], [], []>} : vector<16x16xbf16>, vector<16x384xbf16>, vector<16x384xf32> -> vector<16x384xf32>
    %43 = arith.addf %37, %42 : vector<16x384xf32>
    %c366_i32 = arith.constant 366 : i32
    %44 = tpu.dynamic_rotate %3 by %c366_i32 dim 1 : vector<16x384xf32>, i32 -> vector<16x384xf32>
    %c7 = arith.constant 7 : index
    %c0_24 = arith.constant 0 : index
    %c0_25 = arith.constant 0 : index
    %45 = vector.load %arg2[%c7, %c0_24, %c0_25] : memref<9x16x16xbf16, #tpu.memory_space<vmem>>, vector<1x16x16xbf16>
    %46 = vector.shape_cast %45 : vector<1x16x16xbf16> to vector<16x16xbf16>
    %47 = arith.truncf %44 : vector<16x384xf32> to vector<16x384xbf16>
    %cst_26 = arith.constant dense<0.000000e+00> : vector<16x384xf32>
    %48 = tpu.matmul %46, %47, %cst_26 {dimension_numbers = #tpu.dot_dimension_numbers<[1], [0], [0], [1], [0, 0, 1, 1], [], []>} : vector<16x16xbf16>, vector<16x384xbf16>, vector<16x384xf32> -> vector<16x384xf32>
    %49 = arith.addf %43, %48 : vector<16x384xf32>
    %c365_i32 = arith.constant 365 : i32
    %50 = tpu.dynamic_rotate %3 by %c365_i32 dim 1 : vector<16x384xf32>, i32 -> vector<16x384xf32>
    %c8 = arith.constant 8 : index
    %c0_27 = arith.constant 0 : index
    %c0_28 = arith.constant 0 : index
    %51 = vector.load %arg2[%c8, %c0_27, %c0_28] : memref<9x16x16xbf16, #tpu.memory_space<vmem>>, vector<1x16x16xbf16>
    %52 = vector.shape_cast %51 : vector<1x16x16xbf16> to vector<16x16xbf16>
    %53 = arith.truncf %50 : vector<16x384xf32> to vector<16x384xbf16>
    %cst_29 = arith.constant dense<0.000000e+00> : vector<16x384xf32>
    %54 = tpu.matmul %52, %53, %cst_29 {dimension_numbers = #tpu.dot_dimension_numbers<[1], [0], [0], [1], [0, 0, 1, 1], [], []>} : vector<16x16xbf16>, vector<16x384xbf16>, vector<16x384xf32> -> vector<16x384xf32>
    %55 = arith.addf %49, %54 : vector<16x384xf32>
    %c0_30 = arith.constant 0 : index
    %c0_31 = arith.constant 0 : index
    %56 = vector.load %arg3[%c0_30, %c0_31] : memref<16x1xf32, #tpu.memory_space<vmem>>, vector<16x1xf32>
    %57 = vector.broadcast %56 : vector<16x1xf32> to vector<16x384xf32>
    %58 = arith.addf %55, %57 : vector<16x384xf32>
    %cst_32 = arith.constant 0.000000e+00 : f32
    %59 = vector.broadcast %cst_32 : f32 to vector<16x384xf32>
    %60 = arith.maximumf %58, %59 : vector<16x384xf32>
    %c0_33 = arith.constant 0 : index
    %c0_34 = arith.constant 0 : index
    %61 = vector.load %arg8[%c0_33, %c0_34] : memref<1x384xf32, #tpu.memory_space<vmem>>, vector<1x384xf32>
    %62 = vector.broadcast %61 : vector<1x384xf32> to vector<16x384xf32>
    %63 = arith.mulf %60, %62 : vector<16x384xf32>
    %c19_i32_35 = arith.constant 19 : i32
    %64 = tpu.dynamic_rotate %63 by %c19_i32_35 dim 1 : vector<16x384xf32>, i32 -> vector<16x384xf32>
    %c0_36 = arith.constant 0 : index
    %c0_37 = arith.constant 0 : index
    %c0_38 = arith.constant 0 : index
    %65 = vector.load %arg4[%c0_36, %c0_37, %c0_38] : memref<9x16x16xbf16, #tpu.memory_space<vmem>>, vector<1x16x16xbf16>
    %66 = vector.shape_cast %65 : vector<1x16x16xbf16> to vector<16x16xbf16>
    %67 = arith.truncf %64 : vector<16x384xf32> to vector<16x384xbf16>
    %cst_39 = arith.constant dense<0.000000e+00> : vector<16x384xf32>
    %68 = tpu.matmul %66, %67, %cst_39 {dimension_numbers = #tpu.dot_dimension_numbers<[1], [0], [0], [1], [0, 0, 1, 1], [], []>} : vector<16x16xbf16>, vector<16x384xbf16>, vector<16x384xf32> -> vector<16x384xf32>
    %c18_i32_40 = arith.constant 18 : i32
    %69 = tpu.dynamic_rotate %63 by %c18_i32_40 dim 1 : vector<16x384xf32>, i32 -> vector<16x384xf32>
    %c1_41 = arith.constant 1 : index
    %c0_42 = arith.constant 0 : index
    %c0_43 = arith.constant 0 : index
    %70 = vector.load %arg4[%c1_41, %c0_42, %c0_43] : memref<9x16x16xbf16, #tpu.memory_space<vmem>>, vector<1x16x16xbf16>
    %71 = vector.shape_cast %70 : vector<1x16x16xbf16> to vector<16x16xbf16>
    %72 = arith.truncf %69 : vector<16x384xf32> to vector<16x384xbf16>
    %cst_44 = arith.constant dense<0.000000e+00> : vector<16x384xf32>
    %73 = tpu.matmul %71, %72, %cst_44 {dimension_numbers = #tpu.dot_dimension_numbers<[1], [0], [0], [1], [0, 0, 1, 1], [], []>} : vector<16x16xbf16>, vector<16x384xbf16>, vector<16x384xf32> -> vector<16x384xf32>
    %74 = arith.addf %68, %73 : vector<16x384xf32>
    %c17_i32_45 = arith.constant 17 : i32
    %75 = tpu.dynamic_rotate %63 by %c17_i32_45 dim 1 : vector<16x384xf32>, i32 -> vector<16x384xf32>
    %c2_46 = arith.constant 2 : index
    %c0_47 = arith.constant 0 : index
    %c0_48 = arith.constant 0 : index
    %76 = vector.load %arg4[%c2_46, %c0_47, %c0_48] : memref<9x16x16xbf16, #tpu.memory_space<vmem>>, vector<1x16x16xbf16>
    %77 = vector.shape_cast %76 : vector<1x16x16xbf16> to vector<16x16xbf16>
    %78 = arith.truncf %75 : vector<16x384xf32> to vector<16x384xbf16>
    %cst_49 = arith.constant dense<0.000000e+00> : vector<16x384xf32>
    %79 = tpu.matmul %77, %78, %cst_49 {dimension_numbers = #tpu.dot_dimension_numbers<[1], [0], [0], [1], [0, 0, 1, 1], [], []>} : vector<16x16xbf16>, vector<16x384xbf16>, vector<16x384xf32> -> vector<16x384xf32>
    %80 = arith.addf %74, %79 : vector<16x384xf32>
    %c1_i32_50 = arith.constant 1 : i32
    %81 = tpu.dynamic_rotate %63 by %c1_i32_50 dim 1 : vector<16x384xf32>, i32 -> vector<16x384xf32>
    %c3_51 = arith.constant 3 : index
    %c0_52 = arith.constant 0 : index
    %c0_53 = arith.constant 0 : index
    %82 = vector.load %arg4[%c3_51, %c0_52, %c0_53] : memref<9x16x16xbf16, #tpu.memory_space<vmem>>, vector<1x16x16xbf16>
    %83 = vector.shape_cast %82 : vector<1x16x16xbf16> to vector<16x16xbf16>
    %84 = arith.truncf %81 : vector<16x384xf32> to vector<16x384xbf16>
    %cst_54 = arith.constant dense<0.000000e+00> : vector<16x384xf32>
    %85 = tpu.matmul %83, %84, %cst_54 {dimension_numbers = #tpu.dot_dimension_numbers<[1], [0], [0], [1], [0, 0, 1, 1], [], []>} : vector<16x16xbf16>, vector<16x384xbf16>, vector<16x384xf32> -> vector<16x384xf32>
    %86 = arith.addf %80, %85 : vector<16x384xf32>
    %c4_55 = arith.constant 4 : index
    %c0_56 = arith.constant 0 : index
    %c0_57 = arith.constant 0 : index
    %87 = vector.load %arg4[%c4_55, %c0_56, %c0_57] : memref<9x16x16xbf16, #tpu.memory_space<vmem>>, vector<1x16x16xbf16>
    %88 = vector.shape_cast %87 : vector<1x16x16xbf16> to vector<16x16xbf16>
    %89 = arith.truncf %63 : vector<16x384xf32> to vector<16x384xbf16>
    %cst_58 = arith.constant dense<0.000000e+00> : vector<16x384xf32>
    %90 = tpu.matmul %88, %89, %cst_58 {dimension_numbers = #tpu.dot_dimension_numbers<[1], [0], [0], [1], [0, 0, 1, 1], [], []>} : vector<16x16xbf16>, vector<16x384xbf16>, vector<16x384xf32> -> vector<16x384xf32>
    %91 = arith.addf %86, %90 : vector<16x384xf32>
    %c383_i32_59 = arith.constant 383 : i32
    %92 = tpu.dynamic_rotate %63 by %c383_i32_59 dim 1 : vector<16x384xf32>, i32 -> vector<16x384xf32>
    %c5_60 = arith.constant 5 : index
    %c0_61 = arith.constant 0 : index
    %c0_62 = arith.constant 0 : index
    %93 = vector.load %arg4[%c5_60, %c0_61, %c0_62] : memref<9x16x16xbf16, #tpu.memory_space<vmem>>, vector<1x16x16xbf16>
    %94 = vector.shape_cast %93 : vector<1x16x16xbf16> to vector<16x16xbf16>
    %95 = arith.truncf %92 : vector<16x384xf32> to vector<16x384xbf16>
    %cst_63 = arith.constant dense<0.000000e+00> : vector<16x384xf32>
    %96 = tpu.matmul %94, %95, %cst_63 {dimension_numbers = #tpu.dot_dimension_numbers<[1], [0], [0], [1], [0, 0, 1, 1], [], []>} : vector<16x16xbf16>, vector<16x384xbf16>, vector<16x384xf32> -> vector<16x384xf32>
    %97 = arith.addf %91, %96 : vector<16x384xf32>
    %c367_i32_64 = arith.constant 367 : i32
    %98 = tpu.dynamic_rotate %63 by %c367_i32_64 dim 1 : vector<16x384xf32>, i32 -> vector<16x384xf32>
    %c6_65 = arith.constant 6 : index
    %c0_66 = arith.constant 0 : index
    %c0_67 = arith.constant 0 : index
    %99 = vector.load %arg4[%c6_65, %c0_66, %c0_67] : memref<9x16x16xbf16, #tpu.memory_space<vmem>>, vector<1x16x16xbf16>
    %100 = vector.shape_cast %99 : vector<1x16x16xbf16> to vector<16x16xbf16>
    %101 = arith.truncf %98 : vector<16x384xf32> to vector<16x384xbf16>
    %cst_68 = arith.constant dense<0.000000e+00> : vector<16x384xf32>
    %102 = tpu.matmul %100, %101, %cst_68 {dimension_numbers = #tpu.dot_dimension_numbers<[1], [0], [0], [1], [0, 0, 1, 1], [], []>} : vector<16x16xbf16>, vector<16x384xbf16>, vector<16x384xf32> -> vector<16x384xf32>
    %103 = arith.addf %97, %102 : vector<16x384xf32>
    %c366_i32_69 = arith.constant 366 : i32
    %104 = tpu.dynamic_rotate %63 by %c366_i32_69 dim 1 : vector<16x384xf32>, i32 -> vector<16x384xf32>
    %c7_70 = arith.constant 7 : index
    %c0_71 = arith.constant 0 : index
    %c0_72 = arith.constant 0 : index
    %105 = vector.load %arg4[%c7_70, %c0_71, %c0_72] : memref<9x16x16xbf16, #tpu.memory_space<vmem>>, vector<1x16x16xbf16>
    %106 = vector.shape_cast %105 : vector<1x16x16xbf16> to vector<16x16xbf16>
    %107 = arith.truncf %104 : vector<16x384xf32> to vector<16x384xbf16>
    %cst_73 = arith.constant dense<0.000000e+00> : vector<16x384xf32>
    %108 = tpu.matmul %106, %107, %cst_73 {dimension_numbers = #tpu.dot_dimension_numbers<[1], [0], [0], [1], [0, 0, 1, 1], [], []>} : vector<16x16xbf16>, vector<16x384xbf16>, vector<16x384xf32> -> vector<16x384xf32>
    %109 = arith.addf %103, %108 : vector<16x384xf32>
    %c365_i32_74 = arith.constant 365 : i32
    %110 = tpu.dynamic_rotate %63 by %c365_i32_74 dim 1 : vector<16x384xf32>, i32 -> vector<16x384xf32>
    %c8_75 = arith.constant 8 : index
    %c0_76 = arith.constant 0 : index
    %c0_77 = arith.constant 0 : index
    %111 = vector.load %arg4[%c8_75, %c0_76, %c0_77] : memref<9x16x16xbf16, #tpu.memory_space<vmem>>, vector<1x16x16xbf16>
    %112 = vector.shape_cast %111 : vector<1x16x16xbf16> to vector<16x16xbf16>
    %113 = arith.truncf %110 : vector<16x384xf32> to vector<16x384xbf16>
    %cst_78 = arith.constant dense<0.000000e+00> : vector<16x384xf32>
    %114 = tpu.matmul %112, %113, %cst_78 {dimension_numbers = #tpu.dot_dimension_numbers<[1], [0], [0], [1], [0, 0, 1, 1], [], []>} : vector<16x16xbf16>, vector<16x384xbf16>, vector<16x384xf32> -> vector<16x384xf32>
    %115 = arith.addf %109, %114 : vector<16x384xf32>
    %c0_79 = arith.constant 0 : index
    %c0_80 = arith.constant 0 : index
    %116 = vector.load %arg5[%c0_79, %c0_80] : memref<16x1xf32, #tpu.memory_space<vmem>>, vector<16x1xf32>
    %117 = vector.broadcast %116 : vector<16x1xf32> to vector<16x384xf32>
    %118 = arith.addf %115, %117 : vector<16x384xf32>
    %c0_81 = arith.constant 0 : index
    %c0_82 = arith.constant 0 : index
    %119 = vector.load %arg6[%c0_81, %c0_82] : memref<16x16xbf16, #tpu.memory_space<vmem>>, vector<16x16xbf16>
    %120 = arith.truncf %1 : vector<16x384xf32> to vector<16x384xbf16>
    %cst_83 = arith.constant dense<0.000000e+00> : vector<16x384xf32>
    %121 = tpu.matmul %119, %120, %cst_83 {dimension_numbers = #tpu.dot_dimension_numbers<[1], [0], [0], [1], [0, 0, 1, 1], [], []>} : vector<16x16xbf16>, vector<16x384xbf16>, vector<16x384xf32> -> vector<16x384xf32>
    %c0_84 = arith.constant 0 : index
    %c0_85 = arith.constant 0 : index
    %122 = vector.load %arg7[%c0_84, %c0_85] : memref<16x1xf32, #tpu.memory_space<vmem>>, vector<16x1xf32>
    %123 = vector.broadcast %122 : vector<16x1xf32> to vector<16x384xf32>
    %124 = arith.addf %121, %123 : vector<16x384xf32>
    %125 = arith.addf %118, %124 : vector<16x384xf32>
    %c383_i32_86 = arith.constant 383 : i32
    %126 = tpu.dynamic_rotate %125 by %c383_i32_86 dim 1 : vector<16x384xf32>, i32 -> vector<16x384xf32>
    %c366_i32_87 = arith.constant 366 : i32
    %127 = tpu.dynamic_rotate %125 by %c366_i32_87 dim 1 : vector<16x384xf32>, i32 -> vector<16x384xf32>
    %c365_i32_88 = arith.constant 365 : i32
    %128 = tpu.dynamic_rotate %125 by %c365_i32_88 dim 1 : vector<16x384xf32>, i32 -> vector<16x384xf32>
    %129 = arith.addf %125, %126 : vector<16x384xf32>
    %130 = arith.addf %129, %127 : vector<16x384xf32>
    %131 = arith.addf %130, %128 : vector<16x384xf32>
    %cst_89 = arith.constant 2.500000e-01 : f32
    %132 = vector.broadcast %cst_89 : f32 to vector<16x384xf32>
    %133 = arith.mulf %132, %131 : vector<16x384xf32>
    %c0_90 = arith.constant 0 : index
    %c0_91 = arith.constant 0 : index
    %c0_92 = arith.constant 0 : index
    %134 = vector.load %arg9[%c0_90, %c0_91, %c0_92] : memref<1x16x384xf32, #tpu.memory_space<vmem>>, vector<1x16x384xf32>
    %135 = vector.shape_cast %134 : vector<1x16x384xf32> to vector<16x384xf32>
    %136 = vector.shape_cast %133 : vector<16x384xf32> to vector<1x16x384xf32>
    tpu.vector_store %arg9[%c0_90, %c0_91, %c0_92], %136 {strides = array<i32>} : memref<1x16x384xf32, #tpu.memory_space<vmem>>, vector<1x16x384xf32>,
    return
  }
  func.func @transform_0(%arg0: i32) -> (i32, i32, i32) {
    %c0_i32 = arith.constant 0 : i32
    %c0_i32_0 = arith.constant 0 : i32
    %c0_i32_1 = arith.constant 0 : i32
    return %arg0, %c0_i32, %c0_i32_0 : i32, i32, i32
  }
  func.func @transform_1(%arg0: i32) -> (i32, i32, i32) {
    %c0_i32 = arith.constant 0 : i32
    %c0_i32_0 = arith.constant 0 : i32
    %c0_i32_1 = arith.constant 0 : i32
    %c0_i32_2 = arith.constant 0 : i32
    return %c0_i32, %c0_i32_0, %c0_i32_1 : i32, i32, i32
  }
  func.func @transform_2(%arg0: i32) -> (i32, i32) {
    %c0_i32 = arith.constant 0 : i32
    %c0_i32_0 = arith.constant 0 : i32
    %c0_i32_1 = arith.constant 0 : i32
    return %c0_i32, %c0_i32_0 : i32, i32
  }
  func.func @transform_3(%arg0: i32) -> (i32, i32, i32) {
    %c0_i32 = arith.constant 0 : i32
    %c0_i32_0 = arith.constant 0 : i32
    %c0_i32_1 = arith.constant 0 : i32
    %c0_i32_2 = arith.constant 0 : i32
    return %c0_i32, %c0_i32_0, %c0_i32_1 : i32, i32, i32
  }
  func.func @transform_4(%arg0: i32) -> (i32, i32) {
    %c0_i32 = arith.constant 0 : i32
    %c0_i32_0 = arith.constant 0 : i32
    %c0_i32_1 = arith.constant 0 : i32
    return %c0_i32, %c0_i32_0 : i32, i32
  }
  func.func @transform_5(%arg0: i32) -> (i32, i32) {
    %c0_i32 = arith.constant 0 : i32
    %c0_i32_0 = arith.constant 0 : i32
    %c0_i32_1 = arith.constant 0 : i32
    return %c0_i32, %c0_i32_0 : i32, i32
  }
  func.func @transform_6(%arg0: i32) -> (i32, i32) {
    %c0_i32 = arith.constant 0 : i32
    %c0_i32_0 = arith.constant 0 : i32
    %c0_i32_1 = arith.constant 0 : i32
    return %c0_i32, %c0_i32_0 : i32, i32
  }
  func.func @transform_7(%arg0: i32) -> (i32, i32) {
    %c0_i32 = arith.constant 0 : i32
    %c0_i32_0 = arith.constant 0 : i32
    %c0_i32_1 = arith.constant 0 : i32
    return %c0_i32, %c0_i32_0 : i32, i32
  }
  func.func @transform_8(%arg0: i32) -> (i32, i32, i32) {
    %c0_i32 = arith.constant 0 : i32
    %c0_i32_0 = arith.constant 0 : i32
    %c0_i32_1 = arith.constant 0 : i32
    return %arg0, %c0_i32, %c0_i32_0 : i32, i32, i32
  }
}

module attributes {stable_mosaic.version = 11 : i64} {
  func.func @kernel(%arg0: i32, %arg1: memref<1x16x384xf32, #tpu.memory_space<vmem>>, %arg2: memref<9x16x16xbf16, #tpu.memory_space<vmem>>, %arg3: memref<16x1xf32, #tpu.memory_space<vmem>>, %arg4: memref<9x16x16xbf16, #tpu.memory_space<vmem>>, %arg5: memref<16x1xf32, #tpu.memory_space<vmem>>, %arg6: memref<16x16xbf16, #tpu.memory_space<vmem>>, %arg7: memref<16x1xf32, #tpu.memory_space<vmem>>, %arg8: memref<1x384xf32, #tpu.memory_space<vmem>>, %arg9: memref<1x16x384xf32, #tpu.memory_space<vmem>>) attributes {dimension_semantics = [#tpu.dimension_semantics<parallel>], iteration_bounds = array<i64: 2>, scalar_prefetch = 0 : i64, scratch_operands = 0 : i64, tpu.core_type = #tpu.core_type<tc>, window_params = [{transform_indices = @transform_0, window_bounds = array<i64: 1, 16, 384>}, {pipeline_mode = #tpu.pipeline_mode<synchronous>, transform_indices = @transform_1, window_bounds = array<i64: 9, 16, 16>}, {pipeline_mode = #tpu.pipeline_mode<synchronous>, transform_indices = @transform_2, window_bounds = array<i64: 16, 1>}, {pipeline_mode = #tpu.pipeline_mode<synchronous>, transform_indices = @transform_3, window_bounds = array<i64: 9, 16, 16>}, {pipeline_mode = #tpu.pipeline_mode<synchronous>, transform_indices = @transform_4, window_bounds = array<i64: 16, 1>}, {pipeline_mode = #tpu.pipeline_mode<synchronous>, transform_indices = @transform_5, window_bounds = array<i64: 16, 16>}, {pipeline_mode = #tpu.pipeline_mode<synchronous>, transform_indices = @transform_6, window_bounds = array<i64: 16, 1>}, {pipeline_mode = #tpu.pipeline_mode<synchronous>, transform_indices = @transform_7, window_bounds = array<i64: 1, 384>}, {transform_indices = @transform_8, window_bounds = array<i64: 1, 16, 384>}]} {
    %c0 = arith.constant 0 : index
    %c0_0 = arith.constant 0 : index
    %c0_1 = arith.constant 0 : index
    %0 = vector.load %arg1[%c0, %c0_0, %c0_1] : memref<1x16x384xf32, #tpu.memory_space<vmem>>, vector<1x16x384xf32>
    %1 = vector.shape_cast %0 : vector<1x16x384xf32> to vector<16x384xf32>
    %cst = arith.constant 0.000000e+00 : f32
    %2 = vector.broadcast %cst : f32 to vector<16x384xf32>
    %3 = arith.maximumf %1, %2 : vector<16x384xf32>
    %c19_i32 = arith.constant 19 : i32
    %4 = tpu.dynamic_rotate %3 by %c19_i32 dim 1 : vector<16x384xf32>, i32 -> vector<16x384xf32>
    %c0_2 = arith.constant 0 : index
    %c0_3 = arith.constant 0 : index
    %c0_4 = arith.constant 0 : index
    %5 = vector.load %arg2[%c0_2, %c0_3, %c0_4] : memref<9x16x16xbf16, #tpu.memory_space<vmem>>, vector<1x16x16xbf16>
    %6 = vector.shape_cast %5 : vector<1x16x16xbf16> to vector<16x16xbf16>
    %7 = arith.truncf %4 : vector<16x384xf32> to vector<16x384xbf16>
    %cst_5 = arith.constant dense<0.000000e+00> : vector<16x384xf32>
    %8 = tpu.matmul %6, %7, %cst_5 {dimension_numbers = #tpu.dot_dimension_numbers<[1], [0], [0], [1], [0, 0, 1, 1], [], []>} : vector<16x16xbf16>, vector<16x384xbf16>, vector<16x384xf32> -> vector<16x384xf32>
    %c18_i32 = arith.constant 18 : i32
    %9 = tpu.dynamic_rotate %3 by %c18_i32 dim 1 : vector<16x384xf32>, i32 -> vector<16x384xf32>
    %c1 = arith.constant 1 : index
    %c0_6 = arith.constant 0 : index
    %c0_7 = arith.constant 0 : index
    %10 = vector.load %arg2[%c1, %c0_6, %c0_7] : memref<9x16x16xbf16, #tpu.memory_space<vmem>>, vector<1x16x16xbf16>
    %11 = vector.shape_cast %10 : vector<1x16x16xbf16> to vector<16x16xbf16>
    %12 = arith.truncf %9 : vector<16x384xf32> to vector<16x384xbf16>
    %cst_8 = arith.constant dense<0.000000e+00> : vector<16x384xf32>
    %13 = tpu.matmul %11, %12, %cst_8 {dimension_numbers = #tpu.dot_dimension_numbers<[1], [0], [0], [1], [0, 0, 1, 1], [], []>} : vector<16x16xbf16>, vector<16x384xbf16>, vector<16x384xf32> -> vector<16x384xf32>
    %14 = arith.addf %8, %13 : vector<16x384xf32>
    %c17_i32 = arith.constant 17 : i32
    %15 = tpu.dynamic_rotate %3 by %c17_i32 dim 1 : vector<16x384xf32>, i32 -> vector<16x384xf32>
    %c2 = arith.constant 2 : index
    %c0_9 = arith.constant 0 : index
    %c0_10 = arith.constant 0 : index
    %16 = vector.load %arg2[%c2, %c0_9, %c0_10] : memref<9x16x16xbf16, #tpu.memory_space<vmem>>, vector<1x16x16xbf16>
    %17 = vector.shape_cast %16 : vector<1x16x16xbf16> to vector<16x16xbf16>
    %18 = arith.truncf %15 : vector<16x384xf32> to vector<16x384xbf16>
    %cst_11 = arith.constant dense<0.000000e+00> : vector<16x384xf32>
    %19 = tpu.matmul %17, %18, %cst_11 {dimension_numbers = #tpu.dot_dimension_numbers<[1], [0], [0], [1], [0, 0, 1, 1], [], []>} : vector<16x16xbf16>, vector<16x384xbf16>, vector<16x384xf32> -> vector<16x384xf32>
    %20 = arith.addf %14, %19 : vector<16x384xf32>
    %c1_i32 = arith.constant 1 : i32
    %21 = tpu.dynamic_rotate %3 by %c1_i32 dim 1 : vector<16x384xf32>, i32 -> vector<16x384xf32>
    %c3 = arith.constant 3 : index
    %c0_12 = arith.constant 0 : index
    %c0_13 = arith.constant 0 : index
    %22 = vector.load %arg2[%c3, %c0_12, %c0_13] : memref<9x16x16xbf16, #tpu.memory_space<vmem>>, vector<1x16x16xbf16>
    %23 = vector.shape_cast %22 : vector<1x16x16xbf16> to vector<16x16xbf16>
    %24 = arith.truncf %21 : vector<16x384xf32> to vector<16x384xbf16>
    %cst_14 = arith.constant dense<0.000000e+00> : vector<16x384xf32>
    %25 = tpu.matmul %23, %24, %cst_14 {dimension_numbers = #tpu.dot_dimension_numbers<[1], [0], [0], [1], [0, 0, 1, 1], [], []>} : vector<16x16xbf16>, vector<16x384xbf16>, vector<16x384xf32> -> vector<16x384xf32>
    %26 = arith.addf %20, %25 : vector<16x384xf32>
    %c4 = arith.constant 4 : index
    %c0_15 = arith.constant 0 : index
    %c0_16 = arith.constant 0 : index
    %27 = vector.load %arg2[%c4, %c0_15, %c0_16] : memref<9x16x16xbf16, #tpu.memory_space<vmem>>, vector<1x16x16xbf16>
    %28 = vector.shape_cast %27 : vector<1x16x16xbf16> to vector<16x16xbf16>
    %29 = arith.truncf %3 : vector<16x384xf32> to vector<16x384xbf16>
    %cst_17 = arith.constant dense<0.000000e+00> : vector<16x384xf32>
    %30 = tpu.matmul %28, %29, %cst_17 {dimension_numbers = #tpu.dot_dimension_numbers<[1], [0], [0], [1], [0, 0, 1, 1], [], []>} : vector<16x16xbf16>, vector<16x384xbf16>, vector<16x384xf32> -> vector<16x384xf32>
    %31 = arith.addf %26, %30 : vector<16x384xf32>
    %c383_i32 = arith.constant 383 : i32
    %32 = tpu.dynamic_rotate %3 by %c383_i32 dim 1 : vector<16x384xf32>, i32 -> vector<16x384xf32>
    %c5 = arith.constant 5 : index
    %c0_18 = arith.constant 0 : index
    %c0_19 = arith.constant 0 : index
    %33 = vector.load %arg2[%c5, %c0_18, %c0_19] : memref<9x16x16xbf16, #tpu.memory_space<vmem>>, vector<1x16x16xbf16>
    %34 = vector.shape_cast %33 : vector<1x16x16xbf16> to vector<16x16xbf16>
    %35 = arith.truncf %32 : vector<16x384xf32> to vector<16x384xbf16>
    %cst_20 = arith.constant dense<0.000000e+00> : vector<16x384xf32>
    %36 = tpu.matmul %34, %35, %cst_20 {dimension_numbers = #tpu.dot_dimension_numbers<[1], [0], [0], [1], [0, 0, 1, 1], [], []>} : vector<16x16xbf16>, vector<16x384xbf16>, vector<16x384xf32> -> vector<16x384xf32>
    %37 = arith.addf %31, %36 : vector<16x384xf32>
    %c367_i32 = arith.constant 367 : i32
    %38 = tpu.dynamic_rotate %3 by %c367_i32 dim 1 : vector<16x384xf32>, i32 -> vector<16x384xf32>
    %c6 = arith.constant 6 : index
    %c0_21 = arith.constant 0 : index
    %c0_22 = arith.constant 0 : index
    %39 = vector.load %arg2[%c6, %c0_21, %c0_22] : memref<9x16x16xbf16, #tpu.memory_space<vmem>>, vector<1x16x16xbf16>
    %40 = vector.shape_cast %39 : vector<1x16x16xbf16> to vector<16x16xbf16>
    %41 = arith.truncf %38 : vector<16x384xf32> to vector<16x384xbf16>
    %cst_23 = arith.constant dense<0.000000e+00> : vector<16x384xf32>
    %42 = tpu.matmul %40, %41, %cst_23 {dimension_numbers = #tpu.dot_dimension_numbers<[1], [0], [0], [1], [0, 0, 1, 1], [], []>} : vector<16x16xbf16>, vector<16x384xbf16>, vector<16x384xf32> -> vector<16x384xf32>
    %43 = arith.addf %37, %42 : vector<16x384xf32>
    %c366_i32 = arith.constant 366 : i32
    %44 = tpu.dynamic_rotate %3 by %c366_i32 dim 1 : vector<16x384xf32>, i32 -> vector<16x384xf32>
    %c7 = arith.constant 7 : index
    %c0_24 = arith.constant 0 : index
    %c0_25 = arith.constant 0 : index
    %45 = vector.load %arg2[%c7, %c0_24, %c0_25] : memref<9x16x16xbf16, #tpu.memory_space<vmem>>, vector<1x16x16xbf16>
    %46 = vector.shape_cast %45 : vector<1x16x16xbf16> to vector<16x16xbf16>
    %47 = arith.truncf %44 : vector<16x384xf32> to vector<16x384xbf16>
    %cst_26 = arith.constant dense<0.000000e+00> : vector<16x384xf32>
    %48 = tpu.matmul %46, %47, %cst_26 {dimension_numbers = #tpu.dot_dimension_numbers<[1], [0], [0], [1], [0, 0, 1, 1], [], []>} : vector<16x16xbf16>, vector<16x384xbf16>, vector<16x384xf32> -> vector<16x384xf32>
    %49 = arith.addf %43, %48 : vector<16x384xf32>
    %c365_i32 = arith.constant 365 : i32
    %50 = tpu.dynamic_rotate %3 by %c365_i32 dim 1 : vector<16x384xf32>, i32 -> vector<16x384xf32>
    %c8 = arith.constant 8 : index
    %c0_27 = arith.constant 0 : index
    %c0_28 = arith.constant 0 : index
    %51 = vector.load %arg2[%c8, %c0_27, %c0_28] : memref<9x16x16xbf16, #tpu.memory_space<vmem>>, vector<1x16x16xbf16>
    %52 = vector.shape_cast %51 : vector<1x16x16xbf16> to vector<16x16xbf16>
    %53 = arith.truncf %50 : vector<16x384xf32> to vector<16x384xbf16>
    %cst_29 = arith.constant dense<0.000000e+00> : vector<16x384xf32>
    %54 = tpu.matmul %52, %53, %cst_29 {dimension_numbers = #tpu.dot_dimension_numbers<[1], [0], [0], [1], [0, 0, 1, 1], [], []>} : vector<16x16xbf16>, vector<16x384xbf16>, vector<16x384xf32> -> vector<16x384xf32>
    %55 = arith.addf %49, %54 : vector<16x384xf32>
    %c0_30 = arith.constant 0 : index
    %c0_31 = arith.constant 0 : index
    %56 = vector.load %arg3[%c0_30, %c0_31] : memref<16x1xf32, #tpu.memory_space<vmem>>, vector<16x1xf32>
    %57 = vector.broadcast %56 : vector<16x1xf32> to vector<16x384xf32>
    %58 = arith.addf %55, %57 : vector<16x384xf32>
    %cst_32 = arith.constant 0.000000e+00 : f32
    %59 = vector.broadcast %cst_32 : f32 to vector<16x384xf32>
    %60 = arith.maximumf %58, %59 : vector<16x384xf32>
    %c0_33 = arith.constant 0 : index
    %c0_34 = arith.constant 0 : index
    %61 = vector.load %arg8[%c0_33, %c0_34] : memref<1x384xf32, #tpu.memory_space<vmem>>, vector<1x384xf32>
    %62 = vector.broadcast %61 : vector<1x384xf32> to vector<16x384xf32>
    %63 = arith.mulf %60, %62 : vector<16x384xf32>
    %c19_i32_35 = arith.constant 19 : i32
    %64 = tpu.dynamic_rotate %63 by %c19_i32_35 dim 1 : vector<16x384xf32>, i32 -> vector<16x384xf32>
    %c0_36 = arith.constant 0 : index
    %c0_37 = arith.constant 0 : index
    %c0_38 = arith.constant 0 : index
    %65 = vector.load %arg4[%c0_36, %c0_37, %c0_38] : memref<9x16x16xbf16, #tpu.memory_space<vmem>>, vector<1x16x16xbf16>
    %66 = vector.shape_cast %65 : vector<1x16x16xbf16> to vector<16x16xbf16>
    %67 = arith.truncf %64 : vector<16x384xf32> to vector<16x384xbf16>
    %cst_39 = arith.constant dense<0.000000e+00> : vector<16x384xf32>
    %68 = tpu.matmul %66, %67, %cst_39 {dimension_numbers = #tpu.dot_dimension_numbers<[1], [0], [0], [1], [0, 0, 1, 1], [], []>} : vector<16x16xbf16>, vector<16x384xbf16>, vector<16x384xf32> -> vector<16x384xf32>
    %c18_i32_40 = arith.constant 18 : i32
    %69 = tpu.dynamic_rotate %63 by %c18_i32_40 dim 1 : vector<16x384xf32>, i32 -> vector<16x384xf32>
    %c1_41 = arith.constant 1 : index
    %c0_42 = arith.constant 0 : index
    %c0_43 = arith.constant 0 : index
    %70 = vector.load %arg4[%c1_41, %c0_42, %c0_43] : memref<9x16x16xbf16, #tpu.memory_space<vmem>>, vector<1x16x16xbf16>
    %71 = vector.shape_cast %70 : vector<1x16x16xbf16> to vector<16x16xbf16>
    %72 = arith.truncf %69 : vector<16x384xf32> to vector<16x384xbf16>
    %cst_44 = arith.constant dense<0.000000e+00> : vector<16x384xf32>
    %73 = tpu.matmul %71, %72, %cst_44 {dimension_numbers = #tpu.dot_dimension_numbers<[1], [0], [0], [1], [0, 0, 1, 1], [], []>} : vector<16x16xbf16>, vector<16x384xbf16>, vector<16x384xf32> -> vector<16x384xf32>
    %74 = arith.addf %68, %73 : vector<16x384xf32>
    %c17_i32_45 = arith.constant 17 : i32
    %75 = tpu.dynamic_rotate %63 by %c17_i32_45 dim 1 : vector<16x384xf32>, i32 -> vector<16x384xf32>
    %c2_46 = arith.constant 2 : index
    %c0_47 = arith.constant 0 : index
    %c0_48 = arith.constant 0 : index
    %76 = vector.load %arg4[%c2_46, %c0_47, %c0_48] : memref<9x16x16xbf16, #tpu.memory_space<vmem>>, vector<1x16x16xbf16>
    %77 = vector.shape_cast %76 : vector<1x16x16xbf16> to vector<16x16xbf16>
    %78 = arith.truncf %75 : vector<16x384xf32> to vector<16x384xbf16>
    %cst_49 = arith.constant dense<0.000000e+00> : vector<16x384xf32>
    %79 = tpu.matmul %77, %78, %cst_49 {dimension_numbers = #tpu.dot_dimension_numbers<[1], [0], [0], [1], [0, 0, 1, 1], [], []>} : vector<16x16xbf16>, vector<16x384xbf16>, vector<16x384xf32> -> vector<16x384xf32>
    %80 = arith.addf %74, %79 : vector<16x384xf32>
    %c1_i32_50 = arith.constant 1 : i32
    %81 = tpu.dynamic_rotate %63 by %c1_i32_50 dim 1 : vector<16x384xf32>, i32 -> vector<16x384xf32>
    %c3_51 = arith.constant 3 : index
    %c0_52 = arith.constant 0 : index
    %c0_53 = arith.constant 0 : index
    %82 = vector.load %arg4[%c3_51, %c0_52, %c0_53] : memref<9x16x16xbf16, #tpu.memory_space<vmem>>, vector<1x16x16xbf16>
    %83 = vector.shape_cast %82 : vector<1x16x16xbf16> to vector<16x16xbf16>
    %84 = arith.truncf %81 : vector<16x384xf32> to vector<16x384xbf16>
    %cst_54 = arith.constant dense<0.000000e+00> : vector<16x384xf32>
    %85 = tpu.matmul %83, %84, %cst_54 {dimension_numbers = #tpu.dot_dimension_numbers<[1], [0], [0], [1], [0, 0, 1, 1], [], []>} : vector<16x16xbf16>, vector<16x384xbf16>, vector<16x384xf32> -> vector<16x384xf32>
    %86 = arith.addf %80, %85 : vector<16x384xf32>
    %c4_55 = arith.constant 4 : index
    %c0_56 = arith.constant 0 : index
    %c0_57 = arith.constant 0 : index
    %87 = vector.load %arg4[%c4_55, %c0_56, %c0_57] : memref<9x16x16xbf16, #tpu.memory_space<vmem>>, vector<1x16x16xbf16>
    %88 = vector.shape_cast %87 : vector<1x16x16xbf16> to vector<16x16xbf16>
    %89 = arith.truncf %63 : vector<16x384xf32> to vector<16x384xbf16>
    %cst_58 = arith.constant dense<0.000000e+00> : vector<16x384xf32>
    %90 = tpu.matmul %88, %89, %cst_58 {dimension_numbers = #tpu.dot_dimension_numbers<[1], [0], [0], [1], [0, 0, 1, 1], [], []>} : vector<16x16xbf16>, vector<16x384xbf16>, vector<16x384xf32> -> vector<16x384xf32>
    %91 = arith.addf %86, %90 : vector<16x384xf32>
    %c383_i32_59 = arith.constant 383 : i32
    %92 = tpu.dynamic_rotate %63 by %c383_i32_59 dim 1 : vector<16x384xf32>, i32 -> vector<16x384xf32>
    %c5_60 = arith.constant 5 : index
    %c0_61 = arith.constant 0 : index
    %c0_62 = arith.constant 0 : index
    %93 = vector.load %arg4[%c5_60, %c0_61, %c0_62] : memref<9x16x16xbf16, #tpu.memory_space<vmem>>, vector<1x16x16xbf16>
    %94 = vector.shape_cast %93 : vector<1x16x16xbf16> to vector<16x16xbf16>
    %95 = arith.truncf %92 : vector<16x384xf32> to vector<16x384xbf16>
    %cst_63 = arith.constant dense<0.000000e+00> : vector<16x384xf32>
    %96 = tpu.matmul %94, %95, %cst_63 {dimension_numbers = #tpu.dot_dimension_numbers<[1], [0], [0], [1], [0, 0, 1, 1], [], []>} : vector<16x16xbf16>, vector<16x384xbf16>, vector<16x384xf32> -> vector<16x384xf32>
    %97 = arith.addf %91, %96 : vector<16x384xf32>
    %c367_i32_64 = arith.constant 367 : i32
    %98 = tpu.dynamic_rotate %63 by %c367_i32_64 dim 1 : vector<16x384xf32>, i32 -> vector<16x384xf32>
    %c6_65 = arith.constant 6 : index
    %c0_66 = arith.constant 0 : index
    %c0_67 = arith.constant 0 : index
    %99 = vector.load %arg4[%c6_65, %c0_66, %c0_67] : memref<9x16x16xbf16, #tpu.memory_space<vmem>>, vector<1x16x16xbf16>
    %100 = vector.shape_cast %99 : vector<1x16x16xbf16> to vector<16x16xbf16>
    %101 = arith.truncf %98 : vector<16x384xf32> to vector<16x384xbf16>
    %cst_68 = arith.constant dense<0.000000e+00> : vector<16x384xf32>
    %102 = tpu.matmul %100, %101, %cst_68 {dimension_numbers = #tpu.dot_dimension_numbers<[1], [0], [0], [1], [0, 0, 1, 1], [], []>} : vector<16x16xbf16>, vector<16x384xbf16>, vector<16x384xf32> -> vector<16x384xf32>
    %103 = arith.addf %97, %102 : vector<16x384xf32>
    %c366_i32_69 = arith.constant 366 : i32
    %104 = tpu.dynamic_rotate %63 by %c366_i32_69 dim 1 : vector<16x384xf32>, i32 -> vector<16x384xf32>
    %c7_70 = arith.constant 7 : index
    %c0_71 = arith.constant 0 : index
    %c0_72 = arith.constant 0 : index
    %105 = vector.load %arg4[%c7_70, %c0_71, %c0_72] : memref<9x16x16xbf16, #tpu.memory_space<vmem>>, vector<1x16x16xbf16>
    %106 = vector.shape_cast %105 : vector<1x16x16xbf16> to vector<16x16xbf16>
    %107 = arith.truncf %104 : vector<16x384xf32> to vector<16x384xbf16>
    %cst_73 = arith.constant dense<0.000000e+00> : vector<16x384xf32>
    %108 = tpu.matmul %106, %107, %cst_73 {dimension_numbers = #tpu.dot_dimension_numbers<[1], [0], [0], [1], [0, 0, 1, 1], [], []>} : vector<16x16xbf16>, vector<16x384xbf16>, vector<16x384xf32> -> vector<16x384xf32>
    %109 = arith.addf %103, %108 : vector<16x384xf32>
    %c365_i32_74 = arith.constant 365 : i32
    %110 = tpu.dynamic_rotate %63 by %c365_i32_74 dim 1 : vector<16x384xf32>, i32 -> vector<16x384xf32>
    %c8_75 = arith.constant 8 : index
    %c0_76 = arith.constant 0 : index
    %c0_77 = arith.constant 0 : index
    %111 = vector.load %arg4[%c8_75, %c0_76, %c0_77] : memref<9x16x16xbf16, #tpu.memory_space<vmem>>, vector<1x16x16xbf16>
    %112 = vector.shape_cast %111 : vector<1x16x16xbf16> to vector<16x16xbf16>
    %113 = arith.truncf %110 : vector<16x384xf32> to vector<16x384xbf16>
    %cst_78 = arith.constant dense<0.000000e+00> : vector<16x384xf32>
    %114 = tpu.matmul %112, %113, %cst_78 {dimension_numbers = #tpu.dot_dimension_numbers<[1], [0], [0], [1], [0, 0, 1, 1], [], []>} : vector<16x16xbf16>, vector<16x384xbf16>, vector<16x384xf32> -> vector<16x384xf32>
    %115 = arith.addf %109, %114 : vector<16x384xf32>
    %c0_79 = arith.constant 0 : index
    %c0_80 = arith.constant 0 : index
    %116 = vector.load %arg5[%c0_79, %c0_80] : memref<16x1xf32, #tpu.memory_space<vmem>>, vector<16x1xf32>
    %117 = vector.broadcast %116 : vector<16x1xf32> to vector<16x384xf32>
    %118 = arith.addf %115, %117 : vector<16x384xf32>
    %c0_81 = arith.constant 0 : index
    %c0_82 = arith.constant 0 : index
    %119 = vector.load %arg6[%c0_81, %c0_82] : memref<16x16xbf16, #tpu.memory_space<vmem>>, vector<16x16xbf16>
    %120 = arith.truncf %1 : vector<16x384xf32> to vector<16x384xbf16>
    %cst_83 = arith.constant dense<0.000000e+00> : vector<16x384xf32>
    %121 = tpu.matmul %119, %120, %cst_83 {dimension_numbers = #tpu.dot_dimension_numbers<[1], [0], [0], [1], [0, 0, 1, 1], [], []>} : vector<16x16xbf16>, vector<16x384xbf16>, vector<16x384xf32> -> vector<16x384xf32>
    %c0_84 = arith.constant 0 : index
    %c0_85 = arith.constant 0 : index
    %122 = vector.load %arg7[%c0_84, %c0_85] : memref<16x1xf32, #tpu.memory_space<vmem>>, vector<16x1xf32>
    %123 = vector.broadcast %122 : vector<16x1xf32> to vector<16x384xf32>
    %124 = arith.addf %121, %123 : vector<16x384xf32>
    %125 = arith.addf %118, %124 : vector<16x384xf32>
    %c383_i32_86 = arith.constant 383 : i32
    %126 = tpu.dynamic_rotate %125 by %c383_i32_86 dim 1 : vector<16x384xf32>, i32 -> vector<16x384xf32>
    %c366_i32_87 = arith.constant 366 : i32
    %127 = tpu.dynamic_rotate %125 by %c366_i32_87 dim 1 : vector<16x384xf32>, i32 -> vector<16x384xf32>
    %c365_i32_88 = arith.constant 365 : i32
    %128 = tpu.dynamic_rotate %125 by %c365_i32_88 dim 1 : vector<16x384xf32>, i32 -> vector<16x384xf32>
    %129 = arith.addf %125, %126 : vector<16x384xf32>
    %130 = arith.addf %129, %127 : vector<16x384xf32>
    %131 = arith.addf %130, %128 : vector<16x384xf32>
    %cst_89 = arith.constant 2.500000e-01 : f32
    %132 = vector.broadcast %cst_89 : f32 to vector<16x384xf32>
    %133 = arith.mulf %132, %131 : vector<16x384xf32>
    %c0_90 = arith.constant 0 : index
    %c0_91 = arith.constant 0 : index
    %c0_92 = arith.constant 0 : index
    %134 = vector.load %arg9[%c0_90, %c0_91, %c0_92] : memref<1x16x384xf32, #tpu.memory_space<vmem>>, vector<1x16x384xf32>
    %135 = vector.shape_cast %134 : vector<1x16x384xf32> to vector<16x384xf32>
    %136 = vector.shape_cast %133 : vector<16x384xf32> to vector<1x16x384xf32>
    tpu.vector_store %arg9[%c0_90, %c0_91, %c0_92], %136 {strides = array<i32>} : memref<1x16x384xf32, #tpu.memory_space<vmem>>, vector<1x16x384xf32>,
    return
  }
  func.func @transform_0(%arg0: i32) -> (i32, i32, i32) {
    %c0_i32 = arith.constant 0 : i32
    %c0_i32_0 = arith.constant 0 : i32
    %c0_i32_1 = arith.constant 0 : i32
    return %arg0, %c0_i32, %c0_i32_0 : i32, i32, i32
  }
  func.func @transform_1(%arg0: i32) -> (i32, i32, i32) {
    %c0_i32 = arith.constant 0 : i32
    %c0_i32_0 = arith.constant 0 : i32
    %c0_i32_1 = arith.constant 0 : i32
    %c0_i32_2 = arith.constant 0 : i32
    return %c0_i32, %c0_i32_0, %c0_i32_1 : i32, i32, i32
  }
  func.func @transform_2(%arg0: i32) -> (i32, i32) {
    %c0_i32 = arith.constant 0 : i32
    %c0_i32_0 = arith.constant 0 : i32
    %c0_i32_1 = arith.constant 0 : i32
    return %c0_i32, %c0_i32_0 : i32, i32
  }
  func.func @transform_3(%arg0: i32) -> (i32, i32, i32) {
    %c0_i32 = arith.constant 0 : i32
    %c0_i32_0 = arith.constant 0 : i32
    %c0_i32_1 = arith.constant 0 : i32
    %c0_i32_2 = arith.constant 0 : i32
    return %c0_i32, %c0_i32_0, %c0_i32_1 : i32, i32, i32
  }
  func.func @transform_4(%arg0: i32) -> (i32, i32) {
    %c0_i32 = arith.constant 0 : i32
    %c0_i32_0 = arith.constant 0 : i32
    %c0_i32_1 = arith.constant 0 : i32
    return %c0_i32, %c0_i32_0 : i32, i32
  }
  func.func @transform_5(%arg0: i32) -> (i32, i32) {
    %c0_i32 = arith.constant 0 : i32
    %c0_i32_0 = arith.constant 0 : i32
    %c0_i32_1 = arith.constant 0 : i32
    return %c0_i32, %c0_i32_0 : i32, i32
  }
  func.func @transform_6(%arg0: i32) -> (i32, i32) {
    %c0_i32 = arith.constant 0 : i32
    %c0_i32_0 = arith.constant 0 : i32
    %c0_i32_1 = arith.constant 0 : i32
    return %c0_i32, %c0_i32_0 : i32, i32
  }
  func.func @transform_7(%arg0: i32) -> (i32, i32) {
    %c0_i32 = arith.constant 0 : i32
    %c0_i32_0 = arith.constant 0 : i32
    %c0_i32_1 = arith.constant 0 : i32
    return %c0_i32, %c0_i32_0 : i32, i32
  }
  func.func @transform_8(%arg0: i32) -> (i32, i32, i32) {
    %c0_i32 = arith.constant 0 : i32
    %c0_i32_0 = arith.constant 0 : i32
    %c0_i32_1 = arith.constant 0 : i32
    return %arg0, %c0_i32, %c0_i32_0 : i32, i32, i32
  }
}

</mosaic_0001>

<bundles_post_ra>
// kernel: tpu_custom_call.1
= control target key start
LH: loop header
LB: loop body
LE: loop exit
PB: predicated region body
PF: predicated region fallthrough
CT: control target
= control target key end

     0   :  { %s4581_s0 = inlined_call_operand.hbm [shape: f32[2,16,384], index: 0, kind: input, shape index: {}]   ;;  %s4582_s1 = inlined_call_operand.hbm [shape: bf16[9,16,16], index: 1, kind: input, shape index: {}]   ;;  %s4583_s2 = inlined_call_operand.vmem [shape: f32[16,1], index: 2, kind: input, shape index: {}]   ;;  %s4584_s3 = inlined_call_operand.hbm [shape: bf16[9,16,16], index: 3, kind: input, shape index: {}]   ;;  %s4585_s4 = inlined_call_operand.vmem [shape: f32[16,1], index: 4, kind: input, shape index: {}]   ;;  %s4586_s5 = inlined_call_operand.vmem [shape: bf16[16,16], index: 5, kind: input, shape index: {}]   ;;  %s4587_s6 = inlined_call_operand.vmem [shape: f32[16,1], index: 6, kind: input, shape index: {}]   ;;  %s4588_s7 = inlined_call_operand.vmem [shape: f32[1,384], index: 7, kind: input, shape index: {}]   ;;  %s4589_s8 = inlined_call_operand.hbm [shape: f32[2,16,384], index: 8, kind: output, shape index: {}]  }
   0x1   :  { %4593 = sst [smem:[#allocation12_spill]] %s4582_s1 }
   0x2   :  { %4594 = sst [smem:[#allocation13_spill]] %s4584_s3 }
   0x3   :  { %13 = vsyncpa [#allocation3], 0 }
   0x4   :  { %15 = vsyncpa [#allocation3 + $0x1], 0 }
   0x5   :  { %16 = vsyncpa [#allocation6], 0 }
   0x6   :  { %17 = vsyncpa [#allocation4], 0 }
   0x7   :  { %19 = vsyncpa [#allocation4 + $0x1], 0  ;;  %s3797_s27 = smov 0   ;;  %s3799_s28 = smov 0  }
   0x8   :  { %s3801_s29 = smov 0   ;;  %s3803_s30 = smov 0  }
   0x9 LB: > { %s3818_s9 = sadd.s32 4294967295, %s3729_s30   ;;  %s2881_s10 = sadd.s32 4294967294, %s3729_s30   ;;  %s3729_s30 = sphi %s3803_s30, %s4613_s30   ;;  %s3725_s29 = sphi %s3801_s29, %s4612_s29   ;;  %s3721_s28 = sphi %s3799_s28, %s4611_s28   ;;  %s3717_s27 = sphi %s3797_s27, %s4610_s27  }
   0xa   : > { %p45_p0 = scmp.ne.s32.totalorder %s3721_s28, %s3717_s27  ;;  %p4590_p1 = scmp.eq.s32.totalorder %s3818_s9, 0 }
   0xb   : > { %p222_p3 = scmp.eq.s32.totalorder %s2881_s10, 1  ;;  %p2882_p5 = scmp.ge.s32.totalorder %s3729_s30, 1 }
   0xc   : > { %p3827_p4 = por %p4590_p1, %p45_p0  ;;  %p229_p7 = scmp.lt.s32.totalorder %s3729_s30, 3 }
   0xd   : > { %p3832_p6 = por %p222_p3, %p45_p0  ;;  %s3731_s14 = smov [#allocation5]  }
   0xe   : > { %s4595_s11 = scalar_select %p3827_p4, 1, 0 }
   0xf   : > { %s4596_s12 = scalar_select %p3832_p6, 1, 0 }
  0x10   : > { %p3837_p8 = pnand %p2882_p5, %p229_p7  ;;  %s241_s15 = sshll.u32 %s3731_s14, 4  ;;  %s3841_s15 = int_to_ptr.vmem [resolvable:$true] %s241_s15 }
  0x11   : > { %s3732_s17 = smov [#allocation7]   ;;  %s4599_s1 = sld [smem:[#allocation12_spill]] }
  0x12   : > { %p3234_p9 = pneg %p3837_p8  ;;  %s257_s18 = sshll.u32 %s3732_s17, 4  ;;  %s3852_s18 = int_to_ptr.vmem [resolvable:$true] %s257_s18 }
  0x14   : > { %p3848_p11 = pnand %p3234_p9, %p4590_p1 }
  0x16   : > { %p3575_p13 = pneg %p3848_p11 }
  0x17   : > { %s3573_s21 = scalar_lea.hbm %s4599_s1, 1152 }
  0x18   : > { %p3574_p12 = scmp.ne.s32.totalorder %s4599_s1, %s3573_s21  ;;  %p3580_p5 = scmp.lt.u32.totalorder %s3573_s21, %s4599_s1 }
  0x1a   : > { %p3576_p0 = pnand %p3575_p13, %p3574_p12 }
  0x1c   : > { %p3577_p3 = pneg %p3576_p0 }
  0x1e   : > { %p3582_p7 = pnand %p3580_p5, %p3577_p3 }
  0x20   : > { %3585 = shalt.err (!%p3582_p7)
}
  0x21   : > { %s3586_s26 = scalar_lea.vmem %s3841_s15, 1152  ;;  %p3594_p2 = scmp.lt.s32.totalorder %s3841_s15, %s3841_s15 }
  0x22   : > { %p3587_p9 = scmp.ne.s32.totalorder %s3841_s15, %s3586_s26  ;;  %p3595_p12 = scmp.lt.s32.totalorder %s3586_s26, %s3586_s26 }
  0x24   : > { %p3589_p10 = pnand %p3587_p9, %p3575_p13  ;;  %p3596_p0 = por %p3595_p12, %p3594_p2 }
  0x26   : > { %p3590_p1 = pneg %p3589_p10 }
  0x28   : > { %p3597_p6 = pnand %p3596_p0, %p3590_p1 }
  0x2a   : > { %3600 = shalt.err (!%p3597_p6)
}
  0x2b   : > { %s3733_s10 = smov 64   ;;  %s3734_s14 = smov 4  }
  0x2c   : > { %3237 = dma.hbm_to_vmem [thread:$0]  (!%p3848_p11), %s4599_s1, 1152, %s3841_s15, [#allocation6], %s3733_s10, %s3733_s10, %s3734_s14  }
  0x2d   : > { %s4600_s3 = sld [smem:[#allocation13_spill]] }
  0x33   : > { %s3601_s22 = scalar_lea.hbm %s4600_s3, 1152 }
  0x34   : > { %p3602_p2 = scmp.ne.s32.totalorder %s4600_s3, %s3601_s22  ;;  %p3608_p10 = scmp.lt.u32.totalorder %s3601_s22, %s4600_s3 }
  0x36   : > { %p3604_p1 = pnand %p3602_p2, %p3575_p13 }
  0x38   : > { %p3605_p6 = pneg %p3604_p1 }
  0x3a   : > { %p3610_p3 = pnand %p3608_p10, %p3605_p6 }
  0x3c   : > { %3613 = shalt.err (!%p3610_p3)
}
  0x3d   : > { %s3614_s15 = scalar_lea.vmem %s3852_s18, 1152  ;;  %p3622_p12 = scmp.lt.s32.totalorder %s3852_s18, %s3852_s18 }
  0x3e   : > { %p3615_p5 = scmp.ne.s32.totalorder %s3852_s18, %s3614_s15  ;;  %p3623_p0 = scmp.lt.s32.totalorder %s3614_s15, %s3614_s15 }
  0x40   : > { %p3617_p7 = pnand %p3615_p5, %p3575_p13  ;;  %p3624_p2 = por %p3623_p0, %p3622_p12 }
  0x42   : > { %p3618_p9 = pneg %p3617_p7 }
  0x44   : > { %p3625_p1 = pnand %p3624_p2, %p3618_p9 }
  0x46   : > { %3628 = shalt.err (!%p3625_p1)
}
  0x47   : > { %3240 = dma.hbm_to_vmem [thread:$0]  (!%p3848_p11), %s4600_s3, 1152, %s3852_s18, [#allocation6], %s3733_s10, %s3733_s10, %s3734_s14  }
  0x48   : > { %s3907_s20 = sadd.s32 1, %s3729_s30   ;;  %s32_s16 = sadd.s32 1, %s3725_s29 }
  0x49   : > { %s29_s21 = ssub.s32 %s3729_s30, %s3907_s20  ;;  %p39_p13 = scmp.ne.s32.totalorder %s3725_s29, %s3721_s28 }
  0x4a   : > { %p30_p6 = scmp.eq.s32.totalorder %s29_s21, 0  ;;  %p40_p10 = scmp.eq.s32.totalorder %s3729_s30, 0 }
  0x4b   : > { %p4601_p3 = scmp.eq.s32.totalorder %s3818_s9, 1  ;;  %p3251_p7 = scmp.lt.s32.totalorder %s3729_s30, 2 }
  0x4c   : > { %s3923_s23 = scalar_select %p30_p6, %s3725_s29, %s32_s16  }
  0x4d   : > { %p3917_p5 = por %p4601_p3, %p39_p13  ;;  %p41_p9 = por %p40_p10, %p39_p13 }
  0x4e   : > { %s283_s24 = sand.u32 1, %s3725_s29   ;;  %s3219_s18 = smul.u32 768, %s3729_s30 }
  0x4f   : > { %s4602_s22 = scalar_select %p3917_p5, 1, 0 }
  0x50   : > { %s3218_s25 = smul.u32 48, %s283_s24  ;;  %p3927_p11 = pnand %p3251_p7, %p41_p9 }
  0x51   : > { %s3934_s15 = scalar_lea.hbm %s4581_s0, %s3219_s18  ;;  %s3938_s16 = scalar_lea.sflag [#allocation3], %s283_s24 }
  0x52   : > { %s287_s17 = scalar_lea.vmem [#allocation2], %s3218_s25  ;;  %s3629_s21 = scalar_lea.hbm %s3934_s15, 768 }
  0x53   : > { %s294_s19 = sshll.u32 %s287_s17, 4  ;;  %p3630_p12 = scmp.ne.s32.totalorder %s3934_s15, %s3629_s21  ;;  %s3936_s19 = int_to_ptr.vmem [resolvable:$true] %s294_s19 }
  0x54   : > { %p3631_p0 = pneg %p3927_p11  ;;  %s3634_s26 = scalar_lea.hbm %s4581_s0, 1536 }
  0x55   : > { %p3635_p13 = scmp.lt.u32.totalorder %s3934_s15, %s4581_s0  ;;  %p3636_p6 = scmp.lt.u32.totalorder %s3634_s26, %s3629_s21 }
  0x56   : > { %p3632_p2 = pnand %p3631_p0, %p3630_p12  ;;  %p3638_p3 = scmp.lt.u32.totalorder %s3629_s21, %s3934_s15 }
  0x57   : > { %p3637_p10 = por %p3636_p6, %p3635_p13 }
  0x58   : > { %p3633_p1 = pneg %p3632_p2 }
  0x59   : > { %p3639_p7 = por %p3638_p3, %p3637_p10 }
  0x5b   : > { %p3640_p9 = pnand %p3639_p7, %p3633_p1 }
  0x5d   : > { %3643 = shalt.err (!%p3640_p9)
}
  0x5e   : > { %s3644_s24 = scalar_lea.vmem %s3936_s19, 768  ;;  %s3735_s25 = smov [#allocation2]  }
  0x5f   : > { %p3645_p12 = scmp.ne.s32.totalorder %s3936_s19, %s3644_s24  ;;  %s3649_s17 = sshll.u32 %s3735_s25, 4  ;;  %s3650_s17 = int_to_ptr.vmem [resolvable:$false] %s3649_s17 }
  0x60   : > { %s3651_s1 = scalar_lea.vmem %s3650_s17, 1536  ;;  %p3652_p4 = scmp.lt.s32.totalorder %s3936_s19, %s3650_s17 }
  0x61   : > { %p3647_p2 = pnand %p3645_p12, %p3631_p0  ;;  %p3653_p13 = scmp.lt.s32.totalorder %s3651_s1, %s3644_s24 }
  0x63   : > { %p3648_p5 = pneg %p3647_p2  ;;  %p3654_p6 = por %p3653_p13, %p3652_p4 }
  0x65   : > { %p3655_p10 = pnand %p3654_p6, %p3648_p5 }
  0x67   : > { %3658 = shalt.err (!%p3655_p10)
}
  0x68   : > { %s3736_s3 = smov 384   ;;  %s3737_s21 = smov 24  }
  0x69   : > { %3244 = dma.hbm_to_vmem [thread:$0]  (!%p3927_p11), %s3934_s15, 768, %s3936_s19, %s3938_s16, %s3736_s3, %s3736_s3, %s3737_s21  }
  0x6a   : > { %306 = sbr.rel (%p3837_p8) target bundleno = 1187 (0x4a3), region = 52  ;;  %s3969_s18 = sand.u32 (!%p3837_p8), 1, %s3721_s28  }
  0x6b   : > { %s3220_s14 = smul.u32 (!%p3837_p8), 48, %s3969_s18  ;;  %s309_s26 = scalar_lea.sflag (!%p3837_p8), [#allocation3], %s3969_s18 }
  0x6c   : > { %p4604_p4 = scmp.ne.s32.totalorder (!%p3837_p8), %s4595_s11, 0 }
  0x6d   : > { %s3975_s24 = scalar_lea.vmem (!%p3837_p8), [#allocation2], %s3220_s14 }
  0x71   : > { %3704 = dma.done.wait (%p4604_p4), %s309_s26, 768  }
  0x72   : > { %3706 = vsyncadd (%p4604_p4), %s309_s26, 4294966528  ;;  %p4605_p5 = scmp.eq.s32.totalorder %s3818_s9, 0 }
  0x74   : > { %3708 = dma.done.wait (%p4605_p5), [#allocation6], 2304   ;;  %p4606_p8 = pmov %p4605_p5 }
  0x75   : > { %v356_v0 = vld [vmem:[%s3975_s24 + $0x10] sm:$0xff]  ;;  %v359_v1 = vld [vmem:[%s3975_s24 + $0x28] sm:$0xff]  ;;  %v354_v2 = vld [vmem:[%s3975_s24] sm:$0xff]  ;;  %v3738_v9 = vmov 0.0   ;;  %s3739_s11 = smov 18   ;;  %s3740_s13 = smov 19   ;;  %v378_v22 = vlaneseq }
  0x76   : > { %3710 = vsyncadd (%p4606_p8), [#allocation6], 4294964992  ;;  %v362_v3 = vmax.f32 %v356_v0, 0.0  ;;  %v365_v4 = vmax.f32 %v359_v1, 0.0  ;;  %v357_v5 = vld [vmem:[%s3975_s24 + $0x18] sm:$0xff]  ;;  %v360_v6 = vmax.f32 %v354_v2, 0.0  ;;  %2988 = vmatprep.subr.bf16.mxu1 %v3738_v9 }
  0x77   : > { %v355_v7 = vld [vmem:[%s3975_s24 + $0x8] sm:$0xff]  ;;  %v358_v8 = vld [vmem:[%s3975_s24 + $0x20] sm:$0xff]  ;;  %v363_v10 = vmax.f32 %v357_v5, 0.0  ;;  %vm3741_vm0 = vmmov 0   ;;  %v3742_v16 = vmov 0   ;;  %s3743_s10 = smov 17  }
  0x78   : > { %v361_v11 = vmax.f32 %v355_v7, 0.0  ;;  %v364_v12 = vmax.f32 %v358_v8, 0.0  ;;  %v3316_v13 = vpack.i.bf16 %v365_v4, %v362_v3  ;;  %2990 = vmatprep.mubr.msk.bf16.mxu1 %vm3741_vm0, %v3738_v9  ;;  %458 = vmatprep.mubr.bf16.mxu0 %v3742_v16  ;;  %s3744_s15 = smov 1   ;;  %s3745_s19 = smov 127   ;;  %v4011_v17 = vpack.c.bf16 %v365_v4, %v362_v3  ;;  %v1444_v20 = vld [vmem:[%s4583_s2] sm:$0xff]  ;;  %v1445_v21 = vld [vmem:[%s4583_s2 + $0x8] sm:$0xff] }
  0x79   : > { %v3306_v14 = vpack.i.bf16 %v363_v10, %v360_v6  ;;  %3426 = vset.pattern.permute.xlu0 %v3742_v16  ;;  %3427 = vset.pattern.permute.xlu1 %v3742_v16  ;;  %s3746_s16 = smov 111   ;;  %s3747_s25 = smov 110   ;;  %v4022_v19 = vpack.c.bf16 %v363_v10, %v360_v6  ;;  %v4034_v24 = vand.u32 127, %v378_v22  ;;  %v3548_v51 = vld [vmem:[#allocation5 + $0x8] sm:$0xff]   ;;  %vm422_vm3 = vcmask 130048  }
  0x7a   : > { %3317 = vrot.lane.b32.xlu1 %v3316_v13, %s3739_s11  ;;  %v3311_v15 = vpack.i.bf16 %v364_v12, %v361_v11  ;;  %s3748_s17 = smov 109   ;;  %v4020_v18 = vpack.c.bf16 %v364_v12, %v361_v11  ;;  %v3549_v11 = vld [vmem:[#allocation5] sm:$0xff]   ;;  %p4607_p0 = scmp.ne.s32.totalorder %s4602_s22, 0 }
  0x7b   : > { %3307 = vrot.lane.b32.xlu0 %v3306_v14, %s3739_s11  ;;  %vm404_vm1 = vcmp.lt.s32.totalorder %v4034_v24, 18  ;;  %vm380_vm2 = vcmp.lt.s32.totalorder %v4034_v24, 19  ;;  %vm614_vm4 = vcmp.lt.s32.totalorder %v4034_v24, 17  ;;  %vm737_vm5 = vcmp.lt.s32.totalorder %v4034_v24, 1 }
  0x7c   : > { %vm964_vm6 = vcmp.lt.s32.totalorder %v4034_v24, 127  ;;  %vm1087_vm7 = vcmp.lt.s32.totalorder %v4034_v24, 111  ;;  %vm1210_vm8 = vcmp.lt.s32.totalorder %v4034_v24, 110  ;;  %vm1333_vm9 = vcmp.lt.s32.totalorder %v4034_v24, 109 }
  0x7e   : > { %3322 = vrot.lane.b32.xlu1 %v3306_v14, %s3740_s13 }
  0x7f   : > { %3312 = vrot.lane.b32.xlu0 %v3311_v15, %s3739_s11 }
  0x82   : > { %3332 = vrot.lane.b32.xlu1 %v3316_v13, %s3740_s13 }
  0x83   : > { %3327 = vrot.lane.b32.xlu0 %v3311_v15, %s3740_s13 }
  0x86   : > { %3342 = vrot.lane.b32.xlu1 %v3311_v15, %s3743_s10 }
  0x87   : > { %3337 = vrot.lane.b32.xlu0 %v3306_v14, %s3743_s10 }
  0x8a   : > { %3352 = vrot.lane.b32.xlu1 %v3306_v14, %s3744_s15 }
  0x8b   : > { %3347 = vrot.lane.b32.xlu0 %v3316_v13, %s3743_s10 }
  0x8e   : > { %3362 = vrot.lane.b32.xlu1 %v3316_v13, %s3744_s15 }
  0x8f   : > { %3357 = vrot.lane.b32.xlu0 %v3311_v15, %s3744_s15 }
  0x92   : > { %3372 = vrot.lane.b32.xlu1 %v3316_v13, %s3745_s19 }
  0x93   : > { %3367 = vrot.lane.b32.xlu0 %v3311_v15, %s3745_s19 }
  0x96   : > { %3382 = vrot.lane.b32.xlu1 %v3311_v15, %s3746_s16 }
  0x97   : > { %3377 = vrot.lane.b32.xlu0 %v3306_v14, %s3745_s19 }
  0x9a   : > { %3392 = vrot.lane.b32.xlu1 %v3306_v14, %s3746_s16 }
  0x9b   : > { %3387 = vrot.lane.b32.xlu0 %v3316_v13, %s3746_s16 }
  0x9e   : > { %3402 = vrot.lane.b32.xlu1 %v3316_v13, %s3747_s25 }
  0x9f   : > { %3397 = vrot.lane.b32.xlu0 %v3311_v15, %s3747_s25 }
  0xa2   : > { %3412 = vrot.lane.b32.xlu1 %v3311_v15, %s3748_s17 }
  0xa3   : > { %3407 = vrot.lane.b32.xlu0 %v3306_v14, %s3747_s25 }
  0xa6   : > { %3422 = vrot.lane.b32.xlu1 %v3306_v14, %s3748_s17 }
  0xa7   : > { %3417 = vrot.lane.b32.xlu0 %v3316_v13, %s3748_s17 }
  0xaa   : > { %1453 = vperm.xlu1 %3427, %v1445_v21  }
  0xab   : > { %1448 = vperm.xlu0 %3426, %v1444_v20  }
  0xec   : > { %v3318_v23 = vpop.permute.xlu1 %3317 }
  0xed   : > { %v3308_v25 = vpop.permute.xlu0 %3307  ;;  %v3320_v26 = vunpack.i.h.bf16 %v3318_v23  ;;  %v3319_v27 = vunpack.i.l.bf16 %v3318_v23 }
  0xee   : > { %v3310_v28 = vunpack.i.h.bf16 %v3308_v25  ;;  %v3309_v29 = vunpack.i.l.bf16 %v3308_v25 }
  0xf0   : > { %v3323_v30 = vpop.permute.xlu1 %3322  ;;  %v409_v36 = vsel %vm404_vm1, %v3319_v27, %v3309_v29  ;;  %v410_v37 = vsel %vm404_vm1, %v3320_v26, %v3310_v28 }
  0xf1   : > { %v3313_v31 = vpop.permute.xlu0 %3312  ;;  %v3325_v34 = vunpack.i.h.bf16 %v3323_v30  ;;  %v3324_v35 = vunpack.i.l.bf16 %v3323_v30  ;;  %v414_v50 = vpack.c.bf16 %v410_v37, %v409_v36  ;;  %v3550_v36 = vld [vmem:[#allocation5 + $0x10] sm:$0xff]  }
  0xf2   : > { %v3315_v32 = vunpack.i.h.bf16 %v3313_v31  ;;  %v3314_v33 = vunpack.i.l.bf16 %v3313_v31 }
  0xf4   : > { %v3333_v38 = vpop.permute.xlu1 %3332  ;;  %v407_v39 = vsel %vm404_vm1, %v3309_v29, %v3314_v33  ;;  %v408_v40 = vsel %vm404_vm1, %v3310_v28, %v3315_v32  ;;  %v405_v41 = vsel %vm404_vm1, %v3314_v33, %v3319_v27  ;;  %v406_v42 = vsel %vm404_vm1, %v3315_v32, %v3320_v26 }
  0xf5   : > { %v3328_v43 = vpop.permute.xlu0 %3327  ;;  %v3335_v44 = vunpack.i.h.bf16 %v3333_v38  ;;  %v3334_v45 = vunpack.i.l.bf16 %v3333_v38  ;;  %v415_v46 = vpack.c.bf16 %v408_v40, %v407_v39  ;;  %v416_v47 = vpack.c.bf16 %v406_v42, %v405_v41 }
  0xf6   : > { %v3330_v48 = vunpack.i.h.bf16 %v3328_v43  ;;  %v3329_v49 = vunpack.i.l.bf16 %v3328_v43 }
  0xf7   : > { %v385_v52 = vsel %vm380_vm2, %v3334_v45, %v3324_v35  ;;  %v386_v53 = vsel %vm380_vm2, %v3335_v44, %v3325_v34  ;;  %426 = vmatprep.subr.bf16.mxu0 %v415_v46  ;;  %2989 = vmatpush3.bf16.msra.mxu1 %v416_v47 }
  0xf8   : > { %v381_v54 = vsel %vm380_vm2, %v3329_v49, %v3334_v45  ;;  %v382_v55 = vsel %vm380_vm2, %v3330_v48, %v3335_v44  ;;  %427 = vmatpush1.bf16.msra.mxu0 %v414_v50  ;;  %v383_v56 = vsel %vm380_vm2, %v3324_v35, %v3329_v49  ;;  %v3343_v57 = vpop.permute.xlu1 %3342  ;;  %v389_v58 = vpack.c.bf16 %v386_v53, %v385_v52  ;;  %v3551_v44 = vld [vmem:[#allocation5 + $0x18] sm:$0xff]  }
  0xf9   : > { %v391_v59 = vpack.c.bf16 %v382_v55, %v381_v54  ;;  %v384_v60 = vsel %vm380_vm2, %v3325_v34, %v3330_v48  ;;  %v3338_v61 = vpop.permute.xlu0 %3337  ;;  %2994 = vmatprep.subr.bf16.mxu1 %v3738_v9  ;;  %v3345_v62 = vunpack.i.h.bf16 %v3343_v57  ;;  %v3344_v2 = vunpack.i.l.bf16 %v3343_v57 }
  0xfa   : > { %2991 = vmatmul.mubr.msk.bf16.vlgmr.msra.gmra.mrb[0].mxu1 %vm422_vm3, %v3548_v51  ;;  %v390_v63 = vpack.c.bf16 %v384_v60, %v383_v56  ;;  %v3340_v0 = vunpack.i.h.bf16 %v3338_v61  ;;  %v3339_v1 = vunpack.i.l.bf16 %v3338_v61  ;;  %v3552_v56 = vld [vmem:[#allocation5 + $0x20] sm:$0xff]  }
  0xfb   : > { %2891 = vmatmul.mubr.msk.bf16.vlgmr.msra.gmra.mrb[0].mxu0 %vm422_vm3, %v3548_v51  ;;  %2995 = vmatpush3.bf16.msra.mxu1 %v391_v59 }
  0xfc   : > { %518 = vmatprep.subr.bf16.mxu0 %v390_v63  ;;  %2996 = vmatprep.mubr.msk.bf16.mxu1 %vm3741_vm0, %v3738_v9  ;;  %v3353_v3 = vpop.permute.xlu1 %3352  ;;  %v617_v4 = vsel %vm614_vm4, %v3339_v1, %v3344_v2  ;;  %v618_v5 = vsel %vm614_vm4, %v3340_v0, %v3345_v62 }
  0xfd   : > { %519 = vmatpush1.bf16.msra.mxu0 %v389_v58  ;;  %v3348_v6 = vpop.permute.xlu0 %3347  ;;  %550 = vmatprep.mubr.bf16.mxu0 %v3742_v16  ;;  %v625_v7 = vpack.c.bf16 %v618_v5, %v617_v4  ;;  %v3355_v12 = vunpack.i.h.bf16 %v3353_v3  ;;  %v3354_v20 = vunpack.i.l.bf16 %v3353_v3  ;;  %v3553_v5 = vld [vmem:[#allocation5 + $0x28] sm:$0xff]  }
  0xfe   : > { %v3350_v8 = vunpack.i.h.bf16 %v3348_v6  ;;  %v3349_v10 = vunpack.i.l.bf16 %v3348_v6  ;;  %3000 = vmatprep.subr.bf16.mxu1 %v3738_v9 }
  0xff   : > { %635 = vmatprep.subr.bf16.mxu0 %v625_v7 }
 0x100   : > { %v616_v13 = vsel %vm614_vm4, %v3345_v62, %v3350_v8  ;;  %v615_v14 = vsel %vm614_vm4, %v3344_v2, %v3349_v10  ;;  %v619_v15 = vsel %vm614_vm4, %v3349_v10, %v3339_v1  ;;  %v3363_v21 = vpop.permute.xlu1 %3362  ;;  %v620_v23 = vsel %vm614_vm4, %v3350_v8, %v3340_v0 }
 0x101   : > { %v626_v25 = vpack.c.bf16 %v616_v13, %v615_v14  ;;  %v3365_v26 = vunpack.i.h.bf16 %v3363_v21  ;;  %v3364_v27 = vunpack.i.l.bf16 %v3363_v21  ;;  %v3358_v28 = vpop.permute.xlu0 %3357  ;;  %v624_v31 = vpack.c.bf16 %v620_v23, %v619_v15 }
 0x102   : > { %2997 = vmatmul.mubr.msk.bf16.vlgmr.msra.gmra.mrb[4].mxu1 %vm422_vm3, %v3549_v11  ;;  %v3360_v29 = vunpack.i.h.bf16 %v3358_v28  ;;  %v3359_v30 = vunpack.i.l.bf16 %v3358_v28 }
 0x103   : > { %3001 = vmatpush3.bf16.msra.mxu1 %v626_v25  ;;  %3002 = vmatprep.mubr.msk.bf16.mxu1 %vm3741_vm0, %v3738_v9  ;;  %v742_v41 = vsel %vm737_vm5, %v3364_v27, %v3354_v20  ;;  %v743_v42 = vsel %vm737_vm5, %v3365_v26, %v3355_v12 }
 0x104   : > { %v739_v32 = vsel %vm737_vm5, %v3360_v29, %v3365_v26  ;;  %v738_v33 = vsel %vm737_vm5, %v3359_v30, %v3364_v27  ;;  %3006 = vmatprep.subr.bf16.mxu1 %v3738_v9  ;;  %v740_v34 = vsel %vm737_vm5, %v3354_v20, %v3359_v30  ;;  %v741_v35 = vsel %vm737_vm5, %v3355_v12, %v3360_v29  ;;  %v3373_v40 = vpop.permute.xlu1 %3372  ;;  %v3554_v26 = vld [vmem:[#allocation5 + $0x30] sm:$0xff]  }
 0x105   : > { %v748_v37 = vpack.c.bf16 %v741_v35, %v740_v34  ;;  %v749_v38 = vpack.c.bf16 %v739_v32, %v738_v33  ;;  %v4096_v39 = vpop.permute.xlu0 %3367  ;;  %v747_v45 = vpack.c.bf16 %v743_v42, %v742_v41  ;;  %v3375_v47 = vunpack.i.h.bf16 %v3373_v40 }
 0x106   : > { %v3374_v48 = vunpack.i.l.bf16 %v3373_v40  ;;  %v3370_v55 = vunpack.i.h.bf16 %v4096_v39  ;;  %v3555_v40 = vld [vmem:[#allocation5 + $0x38] sm:$0xff]  }
 0x107   : > { %2894 = vmatmul.mubr.msk.bf16.vlgmr.msra.gmra.mrb[0].mxu0 %vm422_vm3, %v3549_v11 }
 0x108   : > { %636 = vmatpush1.bf16.msra.mxu0 %v624_v31  ;;  %667 = vmatprep.mubr.bf16.mxu0 %v3742_v16  ;;  %v4107_v46 = vpop.permute.xlu1 %3382  ;;  %v966_v0 = vsel %vm964_vm6, %v3370_v55, %v3375_v47 }
 0x109   : > { %758 = vmatprep.subr.bf16.mxu0 %v748_v37  ;;  %v3378_v43 = vpop.permute.xlu0 %3377  ;;  %v3385_v13 = vunpack.i.h.bf16 %v4107_v46  ;;  %v3384_v14 = vunpack.i.l.bf16 %v4107_v46 }
 0x10a   : > { %3003 = vmatmul.mubr.msk.bf16.vlgmr.msra.gmra.mrb[8].mxu1 %vm422_vm3, %v3550_v36  ;;  %v3380_v49 = vunpack.i.h.bf16 %v3378_v43  ;;  %v3379_v50 = vunpack.i.l.bf16 %v3378_v43 }
 0x10b   : > { %3007 = vmatpush3.bf16.msra.mxu1 %v749_v38  ;;  %3008 = vmatprep.mubr.msk.bf16.mxu1 %vm3741_vm0, %v3738_v9 }
 0x10c   : > { %3012 = vmatprep.subr.bf16.mxu1 %v3738_v9  ;;  %v970_v52 = vsel %vm964_vm6, %v3375_v47, %v3380_v49  ;;  %v969_v53 = vsel %vm964_vm6, %v3374_v48, %v3379_v50  ;;  %v4123_v54 = vpop.permute.xlu1 %3392  ;;  %v968_v15 = vsel %vm964_vm6, %v3380_v49, %v3370_v55 }
 0x10d   : > { %v4110_v51 = vpop.permute.xlu0 %3387  ;;  %v976_v57 = vpack.c.bf16 %v970_v52, %v969_v53  ;;  %v3395_v59 = vunpack.i.h.bf16 %v4123_v54  ;;  %v3394_v60 = vunpack.i.l.bf16 %v4123_v54 }
 0x10e   : > { %v3390_v61 = vunpack.i.h.bf16 %v4110_v51  ;;  %v3389_v62 = vunpack.i.l.bf16 %v4110_v51 }
 0x10f   : > { %v1090_v42 = vsel %vm1087_vm7, %v3394_v60, %v3384_v14  ;;  %v1091_v43 = vsel %vm1087_vm7, %v3395_v59, %v3385_v13 }
 0x110   : > { %v4135_v63 = vpop.permute.xlu1 %3402  ;;  %v1093_v1 = vsel %vm1087_vm7, %v3390_v61, %v3395_v59  ;;  %v1092_v2 = vsel %vm1087_vm7, %v3389_v62, %v3394_v60  ;;  %v1088_v29 = vsel %vm1087_vm7, %v3384_v14, %v3389_v62  ;;  %v1089_v30 = vsel %vm1087_vm7, %v3385_v13, %v3390_v61 }
 0x111   : > { %v4128_v58 = vpop.permute.xlu0 %3397  ;;  %v1099_v6 = vpack.c.bf16 %v1093_v1, %v1092_v2  ;;  %v3405_v8 = vunpack.i.h.bf16 %v4135_v63  ;;  %v3404_v10 = vunpack.i.l.bf16 %v4135_v63  ;;  %v1098_v35 = vpack.c.bf16 %v1089_v30, %v1088_v29 }
 0x112   : > { %3009 = vmatmul.mubr.msk.bf16.vlgmr.msra.gmra.mrb[12].mxu1 %vm422_vm3, %v3551_v44  ;;  %v3400_v38 = vunpack.i.h.bf16 %v4128_v58  ;;  %v1097_v46 = vpack.c.bf16 %v1091_v43, %v1090_v42 }
 0x113   : > { %2897 = vmatmul.mubr.msk.bf16.vlgmr.msra.gmra.mrb[0].mxu0 %vm422_vm3, %v3550_v36  ;;  %3013 = vmatpush3.bf16.msra.mxu1 %v4011_v17  ;;  %v3369_v17 = vunpack.i.l.bf16 %v4096_v39  ;;  %v3399_v39 = vunpack.i.l.bf16 %v4128_v58 }
 0x114   : > { %759 = vmatpush1.bf16.msra.mxu0 %v747_v45  ;;  %3014 = vmatprep.mubr.msk.bf16.mxu1 %vm3741_vm0, %v3738_v9  ;;  %v4156_v7 = vpop.permute.xlu1 %3412  ;;  %v1212_v45 = vsel %vm1210_vm8, %v3400_v38, %v3405_v8 }
 0x115   : > { %790 = vmatprep.mubr.bf16.mxu0 %v3742_v16  ;;  %3018 = vmatprep.subr.bf16.mxu1 %v3738_v9  ;;  %v4153_v3 = vpop.permute.xlu0 %3407  ;;  %v3415_v49 = vunpack.i.h.bf16 %v4156_v7 }
 0x116   : > { %862 = vmatprep.subr.bf16.mxu0 %v4020_v18  ;;  %v965_v18 = vsel %vm964_vm6, %v3369_v17, %v3374_v48  ;;  %v3410_v11 = vunpack.i.h.bf16 %v4153_v3  ;;  %v3409_v12 = vunpack.i.l.bf16 %v4153_v3  ;;  %v3556_v48 = vld [vmem:[#allocation5 + $0x40] sm:$0xff]  }
 0x117   : > { %v975_v4 = vpack.c.bf16 %v966_v0, %v965_v18 }
 0x118   : > { %v1216_v20 = vsel %vm1210_vm8, %v3405_v8, %v3410_v11  ;;  %v1215_v21 = vsel %vm1210_vm8, %v3404_v10, %v3409_v12  ;;  %v3423_v23 = vpop.permute.xlu1 %3422  ;;  %v1213_v51 = vsel %vm1210_vm8, %v3409_v12, %v3399_v39  ;;  %v1214_v52 = vsel %vm1210_vm8, %v3410_v11, %v3400_v38 }
 0x119   : > { %v3418_v25 = vpop.permute.xlu0 %3417  ;;  %v1222_v28 = vpack.c.bf16 %v1216_v20, %v1215_v21  ;;  %v3425_v31 = vunpack.i.h.bf16 %v3423_v23  ;;  %v3424_v32 = vunpack.i.l.bf16 %v3423_v23  ;;  %v1220_v55 = vpack.c.bf16 %v1214_v52, %v1213_v51  ;;  %v1468_v52 = vld [vmem:[%s4588_s7] sm:$0x7] }
 0x11a   : > { %3015 = vmatmul.mubr.msk.bf16.vlgmr.msra.gmra.mrb[16].mxu1 %vm422_vm3, %v3552_v56  ;;  %v3420_v33 = vunpack.i.h.bf16 %v3418_v25  ;;  %v3419_v34 = vunpack.i.l.bf16 %v3418_v25 }
 0x11b   : > { %3019 = vmatpush3.bf16.msra.mxu1 %v976_v57  ;;  %3020 = vmatprep.mubr.msk.bf16.mxu1 %vm3741_vm0, %v3738_v9  ;;  %v1337_v57 = vsel %vm1333_vm9, %v3425_v31, %v3415_v49 }
 0x11c   : > { %3024 = vmatprep.subr.bf16.mxu1 %v3738_v9  ;;  %v1339_v36 = vsel %vm1333_vm9, %v3420_v33, %v3425_v31  ;;  %v1338_v37 = vsel %vm1333_vm9, %v3419_v34, %v3424_v32  ;;  %v1335_v54 = vsel %vm1333_vm9, %v3415_v49, %v3420_v33 }
 0x11d   : > { %v1345_v41 = vpack.c.bf16 %v1339_v36, %v1338_v37 }
 0x11f   : > { %2900 = vmatmul.mubr.msk.bf16.vlgmr.msra.gmra.mrb[0].mxu0 %vm422_vm3, %v3551_v44  ;;  %v1211_v44 = vsel %vm1210_vm8, %v3399_v39, %v3404_v10 }
 0x120   : > { %863 = vmatpush1.bf16.msra.mxu0 %v4022_v19  ;;  %894 = vmatprep.mubr.bf16.mxu0 %v3742_v16  ;;  %v967_v19 = vsel %vm964_vm6, %v3379_v50, %v3369_v17  ;;  %v1221_v47 = vpack.c.bf16 %v1212_v45, %v1211_v44  ;;  %v3414_v50 = vunpack.i.l.bf16 %v4156_v7 }
 0x121   : > { %985 = vmatprep.subr.bf16.mxu0 %v975_v4  ;;  %v974_v27 = vpack.c.bf16 %v968_v15, %v967_v19 }
 0x122   : > { %3021 = vmatmul.mubr.msk.bf16.vlgmr.msra.gmra.mrb[20].mxu1 %vm422_vm3, %v3553_v5  ;;  %v1334_v53 = vsel %vm1333_vm9, %v3414_v50, %v3419_v34 }
 0x123   : > { %3025 = vmatpush3.bf16.msra.mxu1 %v1099_v6  ;;  %3026 = vmatprep.mubr.msk.bf16.mxu1 %vm3741_vm0, %v3738_v9  ;;  %v1344_v17 = vpack.c.bf16 %v1335_v54, %v1334_v53 }
 0x124   : > { %3030 = vmatprep.subr.bf16.mxu1 %v3738_v9 }
 0x129   : > { %v1454_v54 = vpop.permute.xlu1 %1453 }
 0x12a   : > { %3027 = vmatmul.mubr.msk.bf16.vlgmr.msra.gmra.mrb[24].mxu1 %vm422_vm3, %v3554_v26 }
 0x12b   : > { %2903 = vmatmul.mubr.msk.bf16.vlgmr.msra.gmra.mrb[0].mxu0 %vm422_vm3, %v3552_v56  ;;  %3031 = vmatpush3.bf16.msra.mxu1 %v1222_v28  ;;  %v1336_v56 = vsel %vm1333_vm9, %v3424_v32, %v3414_v50 }
 0x12c   : > { %986 = vmatpush1.bf16.msra.mxu0 %v974_v27  ;;  %3032 = vmatprep.mubr.msk.bf16.mxu1 %vm3741_vm0, %v3738_v9  ;;  %v1343_v58 = vpack.c.bf16 %v1337_v57, %v1336_v56 }
 0x12d   : > { %1017 = vmatprep.mubr.bf16.mxu0 %v3742_v16  ;;  %3036 = vmatprep.subr.bf16.mxu1 %v3738_v9 }
 0x12e   : > { %1108 = vmatprep.subr.bf16.mxu0 %v1098_v35 }
 0x132   : > { %3033 = vmatmul.mubr.msk.bf16.vlgmr.msra.gmra.mrb[28].mxu1 %vm422_vm3, %v3555_v40 }
 0x133   : > { %3037 = vmatpush3.bf16.msra.mxu1 %v1345_v41  ;;  %3038 = vmatprep.mubr.msk.bf16.mxu1 %vm3741_vm0, %v3738_v9 }
 0x134   : > { %3042 = vmatprep.subr.bf16.mxu1 %v3738_v9 }
 0x137   : > { %2906 = vmatmul.mubr.msk.bf16.vlgmr.msra.gmra.mrb[0].mxu0 %vm422_vm3, %v3553_v5 }
 0x138   : > { %1109 = vmatpush1.bf16.msra.mxu0 %v1097_v46  ;;  %1140 = vmatprep.mubr.bf16.mxu0 %v3742_v16  ;;  %v1471_v46 = vshrl.u32 %v378_v22, 7 }
 0x139   : > { %1231 = vmatprep.subr.bf16.mxu0 %v1221_v47 }
 0x13a   : > { %3039 = vmatmul.mubr.msk.bf16.vlgmr.msra.gmra.mrb[32].mxu1 %vm422_vm3, %v3556_v48  ;;  %v1480_v51 = vsub.s32 2, %v1471_v46 }
 0x13b   : > { %3044 = vmatprep.mubr.msk.bf16.mxu1 %vm3741_vm0, %v3738_v9 }
 0x13c   : > { %v1481_v57 = vrot.slane %v1468_v52, %v1480_v51 }
 0x143   : > { %2909 = vmatmul.mubr.msk.bf16.vlgmr.msra.gmra.mrb[0].mxu0 %vm422_vm3, %v3554_v26 }
 0x144   : > { %1232 = vmatpush1.bf16.msra.mxu0 %v1220_v55  ;;  %1263 = vmatprep.mubr.bf16.mxu0 %v3742_v16 }
 0x145   : > { %1354 = vmatprep.subr.bf16.mxu0 %v1344_v17 }
 0x14f   : > { %2912 = vmatmul.mubr.msk.bf16.vlgmr.msra.gmra.mrb[0].mxu0 %vm422_vm3, %v3555_v40 }
 0x150   : > { %1355 = vmatpush1.bf16.msra.mxu0 %v1343_v58  ;;  %1386 = vmatprep.mubr.bf16.mxu0 %v3742_v16 }
 0x15b   : > { %2915 = vmatmul.mubr.msk.bf16.vlgmr.msra.gmra.mrb[0].mxu0 %vm422_vm3, %v3556_v48  ;;  %v1449_v48 = vpop.permute.xlu0 %1448 }
 0x15c   : > { %1578 = vmatprep.mubr.bf16.mxu0 %v3742_v16 }
 0x1cd   : > { %v503_v59 = vpop.f32.mrb[0].mxu1 }
 0x1ce   : > { %v2992_v60 = vpop.f32.mrb[1].mxu1 }
 0x1cf   : > { %v506_v61 = vpop.f32.mrb[2].mxu1 }
 0x1d0   : > { %v2993_v62 = vpop.f32.mrb[3].mxu1 }
 0x1d5   : > { %v595_v63 = vpop.f32.mrb[4].mxu1 }
 0x1d6   : > { %v596_v18 = vadd.f32 %v595_v63, %v503_v59  ;;  %v2998_v0 = vpop.f32.mrb[5].mxu1 }
 0x1d7   : > { %v598_v1 = vpop.f32.mrb[6].mxu1 }
 0x1d8   : > { %v599_v2 = vadd.f32 %v598_v1, %v506_v61  ;;  %v2999_v3 = vpop.f32.mrb[7].mxu1  ;;  %v1476_v1 = vsub.s32 1, %v1471_v46 }
 0x1dd   : > { %v712_v4 = vpop.f32.mrb[8].mxu1 }
 0x1de   : > { %v721_v5 = vadd.f32 %v712_v4, %v596_v18  ;;  %v3004_v6 = vpop.f32.mrb[9].mxu1  ;;  %v1472_v18 = vsub.s32 0, %v1471_v46 }
 0x1df   : > { %v715_v7 = vpop.f32.mrb[10].mxu1 }
 0x1e0   : > { %v724_v8 = vadd.f32 %v715_v7, %v599_v2  ;;  %v3005_v10 = vpop.f32.mrb[11].mxu1  ;;  %v1473_v7 = vrot.slane %v1468_v52, %v1472_v18 }
 0x1e5   : > { %v835_v11 = vpop.f32.mrb[12].mxu1 }
 0x1e6   : > { %v844_v12 = vadd.f32 %v835_v11, %v721_v5  ;;  %v3010_v13 = vpop.f32.mrb[13].mxu1 }
 0x1e7   : > { %v838_v14 = vpop.f32.mrb[14].mxu1 }
 0x1e8   : > { %v847_v19 = vadd.f32 %v838_v14, %v724_v8  ;;  %v3011_v15 = vpop.f32.mrb[15].mxu1 }
 0x1ed   : > { %v939_v20 = vpop.f32.mrb[16].mxu1 }
 0x1ee   : > { %v948_v21 = vadd.f32 %v939_v20, %v844_v12  ;;  %v3016_v23 = vpop.f32.mrb[17].mxu1  ;;  %v1477_v12 = vrot.slane %v1468_v52, %v1476_v1 }
 0x1ef   : > { %v942_v25 = vpop.f32.mrb[18].mxu1 }
 0x1f0   : > { %v951_v26 = vadd.f32 %v942_v25, %v847_v19  ;;  %v3017_v27 = vpop.f32.mrb[19].mxu1 }
 0x1f5   : > { %v1062_v28 = vpop.f32.mrb[20].mxu1 }
 0x1f6   : > { %v1071_v29 = vadd.f32 %v1062_v28, %v948_v21  ;;  %v3022_v30 = vpop.f32.mrb[21].mxu1 }
 0x1f7   : > { %v1065_v31 = vpop.f32.mrb[22].mxu1  ;;  %v2559_v30 = vld [vmem:[%s4585_s4 + $0x8] sm:$0xff] }
 0x1f8   : > { %v1074_v32 = vadd.f32 %v1065_v31, %v951_v26  ;;  %v3023_v33 = vpop.f32.mrb[23].mxu1  ;;  %v2581_v31 = vld [vmem:[%s4587_s6] sm:$0xff] }
 0x1fd   : > { %v1185_v34 = vpop.f32.mrb[24].mxu1 }
 0x1fe   : > { %v1194_v35 = vadd.f32 %v1185_v34, %v1071_v29  ;;  %v3028_v36 = vpop.f32.mrb[25].mxu1  ;;  %v2558_v29 = vld [vmem:[%s4585_s4] sm:$0xff] }
 0x1ff   : > { %v1188_v37 = vpop.f32.mrb[26].mxu1 }
 0x200   : > { %v1197_v38 = vadd.f32 %v1188_v37, %v1074_v32  ;;  %v3029_v39 = vpop.f32.mrb[27].mxu1  ;;  %v2582_v32 = vld [vmem:[%s4587_s6 + $0x8] sm:$0xff] }
 0x205   : > { %v1308_v40 = vpop.f32.mrb[28].mxu1 }
 0x206   : > { %v1317_v41 = vadd.f32 %v1308_v40, %v1194_v35  ;;  %v3034_v42 = vpop.f32.mrb[29].mxu1 }
 0x207   : > { %v1311_v43 = vpop.f32.mrb[30].mxu1 }
 0x208   : > { %v1320_v44 = vadd.f32 %v1311_v43, %v1197_v38  ;;  %v3035_v45 = vpop.f32.mrb[31].mxu1 }
 0x20d   : > { %v1431_v47 = vpop.f32.mrb[32].mxu1 }
 0x20e   : > { %v1440_v49 = vadd.f32 %v1431_v47, %v1317_v41  ;;  %v3040_v50 = vpop.f32.mrb[33].mxu1 }
 0x20f   : > { %v1434_v53 = vpop.f32.mrb[34].mxu1 }
 0x210   : > { %v1458_v55 = vadd.f32 %v1449_v48, %v1440_v49  ;;  %v1443_v17 = vadd.f32 %v1434_v53, %v1320_v44  ;;  %v3041_v56 = vpop.f32.mrb[35].mxu1 }
 0x212   : > { %v1464_v58 = vmax.f32 %v1458_v55, 0.0  ;;  %v1461_v59 = vadd.f32 %v1454_v54, %v1443_v17 }
 0x214   : > { %v1467_v60 = vmax.f32 %v1461_v59, 0.0  ;;  %v4245_v61 = vmul.f32 %v1481_v57, %v1464_v58 }
 0x216   : > { %v4247_v22 = vmul.f32 %v1481_v57, %v1467_v60  ;;  %v3557_v57 = vld [vmem:[#allocation7 + $0x8] sm:$0xff]  }
 0x218   : > { %v3438_v62 = vpack.i.bf16 %v4247_v22, %v4245_v61  ;;  %v1971_v63 = vpack.c.bf16 %v4247_v22, %v4245_v61 }
 0x22e   : > { %v1388_v0 = vpop.f32.mrb[0].mxu0 }
 0x22f   : > { %v1456_v2 = vadd.f32 %v1449_v48, %v1388_v0  ;;  %v1390_v3 = vpop.f32.mrb[1].mxu0 }
 0x230   : > { %v1457_v4 = vadd.f32 %v1449_v48, %v1390_v3  ;;  %v1392_v5 = vpop.f32.mrb[2].mxu0 }
 0x231   : > { %v1462_v6 = vmax.f32 %v1456_v2, 0.0  ;;  %v1459_v8 = vadd.f32 %v1454_v54, %v1392_v5  ;;  %v1394_v10 = vpop.f32.mrb[3].mxu0 }
 0x232   : > { %v1463_v11 = vmax.f32 %v1457_v4, 0.0  ;;  %v1460_v13 = vadd.f32 %v1454_v54, %v1394_v10 }
 0x233   : > { %v1465_v14 = vmax.f32 %v1459_v8, 0.0  ;;  %v4253_v15 = vmul.f32 %v1473_v7, %v1462_v6 }
 0x234   : > { %v1466_v19 = vmax.f32 %v1460_v13, 0.0  ;;  %v4257_v21 = vmul.f32 %v1477_v12, %v1463_v11 }
 0x235   : > { %v4255_v20 = vmul.f32 %v1473_v7, %v1465_v14 }
 0x236   : > { %v4259_v23 = vmul.f32 %v1477_v12, %v1466_v19 }
 0x237   : > { %v3428_v25 = vpack.i.bf16 %v4255_v20, %v4253_v15  ;;  %v1969_v28 = vpack.c.bf16 %v4255_v20, %v4253_v15 }
 0x238   : > { %v3433_v26 = vpack.i.bf16 %v4259_v23, %v4257_v21  ;;  %v1970_v27 = vpack.c.bf16 %v4259_v23, %v4257_v21 }
 0x239   : > { %3429 = vrot.lane.b32.xlu1 %v3428_v25, %s3739_s11 }
 0x23a   : > { %3434 = vrot.lane.b32.xlu0 %v3433_v26, %s3739_s11 }
 0x23d   : > { %3439 = vrot.lane.b32.xlu1 %v3438_v62, %s3739_s11 }
 0x23e   : > { %3444 = vrot.lane.b32.xlu0 %v3428_v25, %s3740_s13 }
 0x241   : > { %3449 = vrot.lane.b32.xlu1 %v3433_v26, %s3740_s13 }
 0x242   : > { %3454 = vrot.lane.b32.xlu0 %v3438_v62, %s3740_s13  ;;  %s2776_s13 = scalar_lea.sflag [#allocation4], %s3969_s18 }
 0x245   : > { %3459 = vrot.lane.b32.xlu1 %v3428_v25, %s3743_s10 }
 0x246   : > { %3464 = vrot.lane.b32.xlu0 %v3433_v26, %s3743_s10 }
 0x249   : > { %3469 = vrot.lane.b32.xlu1 %v3438_v62, %s3743_s10 }
 0x24a   : > { %3474 = vrot.lane.b32.xlu0 %v3428_v25, %s3744_s15 }
 0x24d   : > { %3479 = vrot.lane.b32.xlu1 %v3433_v26, %s3744_s15 }
 0x24e   : > { %3484 = vrot.lane.b32.xlu0 %v3438_v62, %s3744_s15  ;;  %s3749_s15 = smov [#allocation8]  }
 0x251   : > { %3494 = vrot.lane.b32.xlu1 %v3433_v26, %s3745_s19 }
 0x252   : > { %3489 = vrot.lane.b32.xlu0 %v3438_v62, %s3745_s19 }
 0x255   : > { %3499 = vrot.lane.b32.xlu1 %v3428_v25, %s3745_s19 }
 0x256   : > { %3509 = vrot.lane.b32.xlu0 %v3433_v26, %s3746_s16 }
 0x259   : > { %3504 = vrot.lane.b32.xlu1 %v3438_v62, %s3746_s16 }
 0x25a   : > { %3514 = vrot.lane.b32.xlu0 %v3428_v25, %s3746_s16  ;;  %s3663_s16 = sshll.u32 %s3749_s15, 4  ;;  %s3664_s16 = int_to_ptr.vmem [resolvable:$false] %s3663_s16 }
 0x25b   : > { %s3665_s21 = scalar_lea.vmem %s3664_s16, 1536 }
 0x25d   : > { %3524 = vrot.lane.b32.xlu1 %v3433_v26, %s3747_s25 }
 0x25e   : > { %3519 = vrot.lane.b32.xlu0 %v3438_v62, %s3747_s25 }
 0x261   : > { %3529 = vrot.lane.b32.xlu1 %v3428_v25, %s3747_s25 }
 0x262   : > { %3539 = vrot.lane.b32.xlu0 %v3433_v26, %s3748_s17 }
 0x265   : > { %3534 = vrot.lane.b32.xlu1 %v3438_v62, %s3748_s17 }
 0x266   : > { %3544 = vrot.lane.b32.xlu0 %v3428_v25, %s3748_s17 }
 0x269   : > { %2562 = vperm.xlu1 %3427, %v2558_v29  }
 0x26a   : > { %2567 = vperm.xlu0 %3426, %v2559_v30  }
 0x26d   : > { %2585 = vperm.xlu1 %3427, %v2581_v31  }
 0x26e   : > { %2590 = vperm.xlu0 %3426, %v2582_v32  }
 0x2ab   : > { %v3430_v33 = vpop.permute.xlu1 %3429 }
 0x2ac   : > { %v3432_v34 = vunpack.i.h.bf16 %v3430_v33  ;;  %v3431_v35 = vunpack.i.l.bf16 %v3430_v33  ;;  %v3435_v36 = vpop.permute.xlu0 %3434 }
 0x2ad   : > { %v3437_v37 = vunpack.i.h.bf16 %v3435_v36  ;;  %v3436_v38 = vunpack.i.l.bf16 %v3435_v36 }
 0x2af   : > { %v3440_v39 = vpop.permute.xlu1 %3439  ;;  %v1528_v40 = vsel %vm404_vm1, %v3431_v35, %v3436_v38  ;;  %v1529_v41 = vsel %vm404_vm1, %v3432_v34, %v3437_v37 }
 0x2b0   : > { %v3442_v42 = vunpack.i.h.bf16 %v3440_v39  ;;  %v3441_v43 = vunpack.i.l.bf16 %v3440_v39  ;;  %v3445_v44 = vpop.permute.xlu0 %3444  ;;  %v1536_v45 = vpack.c.bf16 %v1529_v41, %v1528_v40  ;;  %v3558_v40 = vld [vmem:[#allocation7] sm:$0xff]  }
 0x2b1   : > { %v3447_v53 = vunpack.i.h.bf16 %v3445_v44  ;;  %v3446_v54 = vunpack.i.l.bf16 %v3445_v44 }
 0x2b2   : > { %v1526_v46 = vsel %vm404_vm1, %v3436_v38, %v3441_v43  ;;  %v1527_v47 = vsel %vm404_vm1, %v3437_v37, %v3442_v42  ;;  %v1530_v48 = vsel %vm404_vm1, %v3441_v43, %v3431_v35  ;;  %v1531_v49 = vsel %vm404_vm1, %v3442_v42, %v3432_v34  ;;  %1546 = vmatprep.subr.bf16.mxu0 %v1536_v45 }
 0x2b3   : > { %v1535_v50 = vpack.c.bf16 %v1531_v49, %v1530_v48  ;;  %v1537_v51 = vpack.c.bf16 %v1527_v47, %v1526_v46  ;;  %v3450_v52 = vpop.permute.xlu1 %3449 }
 0x2b4   : > { %v3452_v55 = vunpack.i.h.bf16 %v3450_v52  ;;  %v3451_v17 = vunpack.i.l.bf16 %v3450_v52  ;;  %v3455_v56 = vpop.permute.xlu0 %3454 }
 0x2b5   : > { %v3457_v58 = vunpack.i.h.bf16 %v3455_v56  ;;  %v3456_v59 = vunpack.i.l.bf16 %v3455_v56  ;;  %1547 = vmatpush1.bf16.msra.mxu0 %v1535_v50  ;;  %3043 = vmatpush3.bf16.msra.mxu1 %v1537_v51 }
 0x2b6   : > { %v1505_v60 = vsel %vm380_vm2, %v3446_v54, %v3451_v17  ;;  %v1506_v62 = vsel %vm380_vm2, %v3447_v53, %v3452_v55  ;;  %3048 = vmatprep.subr.bf16.mxu1 %v3738_v9 }
 0x2b7   : > { %v1504_v18 = vsel %vm380_vm2, %v3452_v55, %v3457_v58  ;;  %v1503_v0 = vsel %vm380_vm2, %v3451_v17, %v3456_v59  ;;  %v1507_v1 = vsel %vm380_vm2, %v3456_v59, %v3446_v54  ;;  %v1508_v2 = vsel %vm380_vm2, %v3457_v58, %v3447_v53  ;;  %v3460_v3 = vpop.permute.xlu1 %3459  ;;  %v3559_v53 = vld [vmem:[#allocation7 + $0x10] sm:$0xff]  }
 0x2b8   : > { %v1511_v4 = vpack.c.bf16 %v1508_v2, %v1507_v1  ;;  %v1513_v5 = vpack.c.bf16 %v1504_v18, %v1503_v0  ;;  %v3462_v6 = vunpack.i.h.bf16 %v3460_v3  ;;  %v3461_v7 = vunpack.i.l.bf16 %v3460_v3  ;;  %v3465_v8 = vpop.permute.xlu0 %3464  ;;  %2918 = vmatmul.mubr.msk.bf16.vlgmr.msra.gmra.mrb[4].mxu0 %vm422_vm3, %v3557_v57  ;;  %3045 = vmatmul.mubr.msk.bf16.vlgmr.msra.gmra.mrb[36].mxu1 %vm422_vm3, %v3557_v57  ;;  %v3560_v18 = vld [vmem:[#allocation7 + $0x18] sm:$0xff]  }
 0x2b9   : > { %v3467_v10 = vunpack.i.h.bf16 %v3465_v8  ;;  %v3466_v11 = vunpack.i.l.bf16 %v3465_v8  ;;  %v1512_v12 = vpack.c.bf16 %v1506_v62, %v1505_v60  ;;  %1670 = vmatprep.mubr.bf16.mxu0 %v3742_v16  ;;  %3050 = vmatprep.mubr.msk.bf16.mxu1 %vm3741_vm0, %v3738_v9 }
 0x2ba   : > { %3049 = vmatpush3.bf16.msra.mxu1 %v1513_v5 }
 0x2bb   : > { %1638 = vmatprep.subr.bf16.mxu0 %v1512_v12  ;;  %v3470_v13 = vpop.permute.xlu1 %3469  ;;  %v1736_v14 = vsel %vm614_vm4, %v3461_v7, %v3466_v11  ;;  %v1737_v19 = vsel %vm614_vm4, %v3462_v6, %v3467_v10  ;;  %3054 = vmatprep.subr.bf16.mxu1 %v3738_v9 }
 0x2bc   : > { %1639 = vmatpush1.bf16.msra.mxu0 %v1511_v4  ;;  %v3472_v25 = vunpack.i.h.bf16 %v3470_v13  ;;  %v3471_v26 = vunpack.i.l.bf16 %v3470_v13  ;;  %v3475_v29 = vpop.permute.xlu0 %3474  ;;  %v1744_v30 = vpack.c.bf16 %v1737_v19, %v1736_v14 }
 0x2bd   : > { %v3477_v33 = vunpack.i.h.bf16 %v3475_v29  ;;  %v3476_v34 = vunpack.i.l.bf16 %v3475_v29 }
 0x2be   : > { %1754 = vmatprep.subr.bf16.mxu0 %v1744_v30  ;;  %v1734_v31 = vsel %vm614_vm4, %v3466_v11, %v3471_v26  ;;  %v1735_v32 = vsel %vm614_vm4, %v3467_v10, %v3472_v25  ;;  %v1738_v36 = vsel %vm614_vm4, %v3471_v26, %v3461_v7  ;;  %v1739_v37 = vsel %vm614_vm4, %v3472_v25, %v3462_v6  ;;  %v3561_v7 = vld [vmem:[#allocation7 + $0x20] sm:$0xff]  }
 0x2bf   : > { %v3480_v35 = vpop.permute.xlu1 %3479  ;;  %v1743_v43 = vpack.c.bf16 %v1739_v37, %v1738_v36  ;;  %v1745_v44 = vpack.c.bf16 %v1735_v32, %v1734_v31 }
 0x2c0   : > { %v3482_v38 = vunpack.i.h.bf16 %v3480_v35  ;;  %v3481_v39 = vunpack.i.l.bf16 %v3480_v35  ;;  %v3485_v45 = vpop.permute.xlu0 %3484 }
 0x2c1   : > { %v3487_v47 = vunpack.i.h.bf16 %v3485_v45  ;;  %v3486_v48 = vunpack.i.l.bf16 %v3485_v45 }
 0x2c2   : > { %v1858_v41 = vsel %vm737_vm5, %v3476_v34, %v3481_v39  ;;  %v1859_v42 = vsel %vm737_vm5, %v3477_v33, %v3482_v38 }
 0x2c3   : > { %v1866_v46 = vpack.c.bf16 %v1859_v42, %v1858_v41  ;;  %v1857_v49 = vsel %vm737_vm5, %v3482_v38, %v3487_v47  ;;  %v1856_v50 = vsel %vm737_vm5, %v3481_v39, %v3486_v48  ;;  %v1860_v51 = vsel %vm737_vm5, %v3486_v48, %v3476_v34  ;;  %v3495_v17 = vpop.permute.xlu1 %3494  ;;  %v3562_v38 = vld [vmem:[#allocation7 + $0x28] sm:$0xff]  }
 0x2c4   : > { %2921 = vmatmul.mubr.msk.bf16.vlgmr.msra.gmra.mrb[4].mxu0 %vm422_vm3, %v3558_v40  ;;  %3051 = vmatmul.mubr.msk.bf16.vlgmr.msra.gmra.mrb[36].mxu1 %vm422_vm3, %v3558_v40  ;;  %v1861_v52 = vsel %vm737_vm5, %v3487_v47, %v3477_v33  ;;  %v1867_v55 = vpack.c.bf16 %v1857_v49, %v1856_v50  ;;  %v3490_v56 = vpop.permute.xlu0 %3489  ;;  %v3497_v57 = vunpack.i.h.bf16 %v3495_v17  ;;  %v3496_v58 = vunpack.i.l.bf16 %v3495_v17  ;;  %v3563_v17 = vld [vmem:[#allocation7 + $0x30] sm:$0xff]  }
 0x2c5   : > { %1755 = vmatpush1.bf16.msra.mxu0 %v1743_v43  ;;  %3055 = vmatpush3.bf16.msra.mxu1 %v1745_v44  ;;  %v1865_v54 = vpack.c.bf16 %v1861_v52, %v1860_v51  ;;  %v3492_v59 = vunpack.i.h.bf16 %v3490_v56  ;;  %v3491_v60 = vunpack.i.l.bf16 %v3490_v56 }
 0x2c6   : > { %1786 = vmatprep.mubr.bf16.mxu0 %v3742_v16  ;;  %3056 = vmatprep.mubr.msk.bf16.mxu1 %vm3741_vm0, %v3738_v9 }
 0x2c7   : > { %1876 = vmatprep.subr.bf16.mxu0 %v1866_v46  ;;  %3060 = vmatprep.subr.bf16.mxu1 %v3738_v9  ;;  %v3500_v62 = vpop.permute.xlu1 %3499  ;;  %v2082_v0 = vsel %vm964_vm6, %v3496_v58, %v3491_v60  ;;  %v2083_v21 = vsel %vm964_vm6, %v3497_v57, %v3492_v59 }
 0x2c8   : > { %v2092_v23 = vpack.c.bf16 %v2083_v21, %v2082_v0  ;;  %v3502_v2 = vunpack.i.h.bf16 %v3500_v62  ;;  %v3501_v3 = vunpack.i.l.bf16 %v3500_v62 }
 0x2ca   : > { %v2084_v61 = vsel %vm964_vm6, %v3501_v3, %v3496_v58  ;;  %v2085_v22 = vsel %vm964_vm6, %v3502_v2, %v3497_v57 }
 0x2cb   : > { %v3505_v1 = vpop.permute.xlu1 %3504  ;;  %v2091_v11 = vpack.c.bf16 %v2085_v22, %v2084_v61  ;;  %v3565_v61 = vld [vmem:[#allocation7 + $0x40] sm:$0xff]   ;;  %v3569_v22 = vld [vmem:[%s3975_s24 + $0x10] sm:$0xff] }
 0x2cc   : > { %v3507_v4 = vunpack.i.h.bf16 %v3505_v1  ;;  %v3506_v5 = vunpack.i.l.bf16 %v3505_v1 }
 0x2cf   : > { %v3525_v14 = vpop.permute.xlu1 %3524 }
 0x2d0   : > { %2924 = vmatmul.mubr.msk.bf16.vlgmr.msra.gmra.mrb[4].mxu0 %vm422_vm3, %v3559_v53  ;;  %3057 = vmatmul.mubr.msk.bf16.vlgmr.msra.gmra.mrb[36].mxu1 %vm422_vm3, %v3559_v53  ;;  %v3527_v29 = vunpack.i.h.bf16 %v3525_v14  ;;  %v3526_v30 = vunpack.i.l.bf16 %v3525_v14 }
 0x2d1   : > { %1877 = vmatpush1.bf16.msra.mxu0 %v1865_v54  ;;  %3061 = vmatpush3.bf16.msra.mxu1 %v1867_v55 }
 0x2d2   : > { %1980 = vmatprep.subr.bf16.mxu0 %v1970_v27  ;;  %1908 = vmatprep.mubr.bf16.mxu0 %v3742_v16  ;;  %v3510_v27 = vpop.permute.xlu0 %3509 }
 0x2d3   : > { %3062 = vmatprep.mubr.msk.bf16.mxu1 %vm3741_vm0, %v3738_v9  ;;  %3066 = vmatprep.subr.bf16.mxu1 %v3738_v9  ;;  %v3512_v15 = vunpack.i.h.bf16 %v3510_v27  ;;  %v3511_v20 = vunpack.i.l.bf16 %v3510_v27  ;;  %v3530_v37 = vpop.permute.xlu1 %3529 }
 0x2d4   : > { %v3532_v45 = vunpack.i.h.bf16 %v3530_v37  ;;  %v3531_v46 = vunpack.i.l.bf16 %v3530_v37 }
 0x2d5   : > { %v2204_v8 = vsel %vm1087_vm7, %v3511_v20, %v3506_v5  ;;  %v2205_v10 = vsel %vm1087_vm7, %v3512_v15, %v3507_v4 }
 0x2d6   : > { %v3515_v6 = vpop.permute.xlu0 %3514  ;;  %v2214_v13 = vpack.c.bf16 %v2205_v10, %v2204_v8  ;;  %v2328_v52 = vsel %vm1210_vm8, %v3531_v46, %v3526_v30  ;;  %v2329_v53 = vsel %vm1210_vm8, %v3532_v45, %v3527_v29  ;;  %v3566_v10 = vld [vmem:[%s4586_s5] sm:$0xff]  }
 0x2d7   : > { %v3517_v25 = vunpack.i.h.bf16 %v3515_v6  ;;  %v3516_v26 = vunpack.i.l.bf16 %v3515_v6  ;;  %v3535_v44 = vpop.permute.xlu1 %3534  ;;  %v2335_v58 = vpack.c.bf16 %v2329_v53, %v2328_v52  ;;  %v3571_v6 = vld [vmem:[%s3975_s24] sm:$0xff] }
 0x2d8   : > { %v3537_v48 = vunpack.i.h.bf16 %v3535_v44  ;;  %v3536_v49 = vunpack.i.l.bf16 %v3535_v44 }
 0x2d9   : > { %v2209_v33 = vsel %vm1087_vm7, %v3507_v4, %v3517_v25  ;;  %v2206_v34 = vsel %vm1087_vm7, %v3516_v26, %v3511_v20  ;;  %v2207_v35 = vsel %vm1087_vm7, %v3517_v25, %v3512_v15  ;;  %v2208_v36 = vsel %vm1087_vm7, %v3506_v5, %v3516_v26  ;;  %v3567_v5 = vld [vmem:[%s3975_s24 + $0x8] sm:$0xff]  ;;  %v3568_v15 = vld [vmem:[%s3975_s24 + $0x20] sm:$0xff] }
 0x2da   : > { %v3520_v19 = vpop.permute.xlu0 %3519  ;;  %v2213_v41 = vpack.c.bf16 %v2207_v35, %v2206_v34  ;;  %v2215_v42 = vpack.c.bf16 %v2209_v33, %v2208_v36  ;;  %v2579_v20 = vpack.c.bf16 %v3568_v15, %v3567_v5 }
 0x2db   : > { %v3522_v31 = vunpack.i.h.bf16 %v3520_v19  ;;  %v3521_v32 = vunpack.i.l.bf16 %v3520_v19 }
 0x2dc   : > { %2927 = vmatmul.mubr.msk.bf16.vlgmr.msra.gmra.mrb[4].mxu0 %vm422_vm3, %v3560_v18  ;;  %3063 = vmatmul.mubr.msk.bf16.vlgmr.msra.gmra.mrb[36].mxu1 %vm422_vm3, %v3560_v18 }
 0x2dd   : > { %1981 = vmatpush1.bf16.msra.mxu0 %v1969_v28  ;;  %3067 = vmatpush3.bf16.msra.mxu1 %v1971_v63  ;;  %v2086_v63 = vsel %vm964_vm6, %v3491_v60, %v3501_v3  ;;  %v2087_v28 = vsel %vm964_vm6, %v3492_v59, %v3502_v2  ;;  %v2326_v39 = vsel %vm1210_vm8, %v3526_v30, %v3521_v32  ;;  %v3564_v2 = vld [vmem:[#allocation7 + $0x38] sm:$0xff]  }
 0x2de   : > { %2102 = vmatprep.subr.bf16.mxu0 %v2092_v23  ;;  %2012 = vmatprep.mubr.bf16.mxu0 %v3742_v16  ;;  %v2093_v12 = vpack.c.bf16 %v2087_v28, %v2086_v63  ;;  %v2327_v40 = vsel %vm1210_vm8, %v3527_v29, %v3522_v31  ;;  %v3540_v47 = vpop.permute.xlu0 %3539  ;;  %v2330_v54 = vsel %vm1210_vm8, %v3521_v32, %v3531_v46  ;;  %v3570_v63 = vld [vmem:[%s3975_s24 + $0x28] sm:$0xff] }
 0x2df   : > { %3068 = vmatprep.mubr.msk.bf16.mxu1 %vm3741_vm0, %v3738_v9  ;;  %3072 = vmatprep.subr.bf16.mxu1 %v3738_v9  ;;  %v2336_v43 = vpack.c.bf16 %v2327_v40, %v2326_v39  ;;  %v3542_v50 = vunpack.i.h.bf16 %v3540_v47  ;;  %v3541_v51 = vunpack.i.l.bf16 %v3540_v47  ;;  %v2331_v55 = vsel %vm1210_vm8, %v3522_v31, %v3532_v45 }
 0x2e0   : > { %v2337_v59 = vpack.c.bf16 %v2331_v55, %v2330_v54  ;;  %v2580_v28 = vpack.c.bf16 %v3570_v63, %v3569_v22 }
 0x2e1   : > { %v2448_v56 = vsel %vm1333_vm9, %v3541_v51, %v3536_v49  ;;  %v2449_v57 = vsel %vm1333_vm9, %v3542_v50, %v3537_v48 }
 0x2e2   : > { %v2458_v60 = vpack.c.bf16 %v2449_v57, %v2448_v56  ;;  %v3545_v62 = vpop.permute.xlu0 %3544 }
 0x2e3   : > { %v3547_v18 = vunpack.i.h.bf16 %v3545_v62  ;;  %v3546_v0 = vunpack.i.l.bf16 %v3545_v62 }
 0x2e5   : > { %v2453_v21 = vsel %vm1333_vm9, %v3537_v48, %v3547_v18  ;;  %v2450_v23 = vsel %vm1333_vm9, %v3546_v0, %v3541_v51  ;;  %v2451_v27 = vsel %vm1333_vm9, %v3547_v18, %v3542_v50  ;;  %v2452_v1 = vsel %vm1333_vm9, %v3536_v49, %v3546_v0 }
 0x2e6   : > { %v2457_v3 = vpack.c.bf16 %v2451_v27, %v2450_v23  ;;  %v2459_v4 = vpack.c.bf16 %v2453_v21, %v2452_v1 }
 0x2e8   : > { %2930 = vmatmul.mubr.msk.bf16.vlgmr.msra.gmra.mrb[4].mxu0 %vm422_vm3, %v3561_v7  ;;  %3069 = vmatmul.mubr.msk.bf16.vlgmr.msra.gmra.mrb[36].mxu1 %vm422_vm3, %v3561_v7  ;;  %v3572_v7 = vld [vmem:[%s3975_s24 + $0x18] sm:$0xff]  ;;  %s352_s24 = scalar_lea.vmem [#allocation8], %s3220_s14 }
 0x2e9   : > { %2103 = vmatpush1.bf16.msra.mxu0 %v2091_v11  ;;  %3073 = vmatpush3.bf16.msra.mxu1 %v2093_v12  ;;  %v2578_v8 = vpack.c.bf16 %v3572_v7, %v3571_v6  ;;  %v2563_v11 = vpop.permute.xlu1 %2562  ;;  %v2568_v12 = vpop.permute.xlu0 %2567 }
 0x2ea   : > { %2224 = vmatprep.subr.bf16.mxu0 %v2214_v13  ;;  %2134 = vmatprep.mubr.bf16.mxu0 %v3742_v16 }
 0x2eb   : > { %3074 = vmatprep.mubr.msk.bf16.mxu1 %vm3741_vm0, %v3738_v9  ;;  %3078 = vmatprep.subr.bf16.mxu1 %v3738_v9 }
 0x2ed   : > { %v2586_v13 = vpop.permute.xlu1 %2585  ;;  %v2591_v14 = vpop.permute.xlu0 %2590 }
 0x2ee   : > { %v3102_v19 = vadd.f32 %v2586_v13, %v2563_v11  ;;  %v3106_v29 = vadd.f32 %v2591_v14, %v2568_v12 }
 0x2f4   : > { %2933 = vmatmul.mubr.msk.bf16.vlgmr.msra.gmra.mrb[4].mxu0 %vm422_vm3, %v3562_v38  ;;  %3075 = vmatmul.mubr.msk.bf16.vlgmr.msra.gmra.mrb[36].mxu1 %vm422_vm3, %v3562_v38 }
 0x2f5   : > { %2225 = vmatpush1.bf16.msra.mxu0 %v2213_v41  ;;  %3079 = vmatpush3.bf16.msra.mxu1 %v2215_v42 }
 0x2f6   : > { %2346 = vmatprep.subr.bf16.mxu0 %v2336_v43  ;;  %2256 = vmatprep.mubr.bf16.mxu0 %v3742_v16 }
 0x2f7   : > { %3080 = vmatprep.mubr.msk.bf16.mxu1 %vm3741_vm0, %v3738_v9  ;;  %3084 = vmatprep.subr.bf16.mxu1 %v3738_v9 }
 0x300   : > { %2936 = vmatmul.mubr.msk.bf16.vlgmr.msra.gmra.mrb[4].mxu0 %vm422_vm3, %v3563_v17  ;;  %3081 = vmatmul.mubr.msk.bf16.vlgmr.msra.gmra.mrb[36].mxu1 %vm422_vm3, %v3563_v17 }
 0x301   : > { %2347 = vmatpush1.bf16.msra.mxu0 %v2335_v58  ;;  %3085 = vmatpush3.bf16.msra.mxu1 %v2337_v59 }
 0x302   : > { %2468 = vmatprep.subr.bf16.mxu0 %v2458_v60  ;;  %2378 = vmatprep.mubr.bf16.mxu0 %v3742_v16 }
 0x303   : > { %3086 = vmatprep.mubr.msk.bf16.mxu1 %vm3741_vm0, %v3738_v9  ;;  %3090 = vmatprep.subr.bf16.mxu1 %v3738_v9 }
 0x30c   : > { %2939 = vmatmul.mubr.msk.bf16.vlgmr.msra.gmra.mrb[4].mxu0 %vm422_vm3, %v3564_v2  ;;  %3087 = vmatmul.mubr.msk.bf16.vlgmr.msra.gmra.mrb[36].mxu1 %vm422_vm3, %v3564_v2 }
 0x30d   : > { %2469 = vmatpush1.bf16.msra.mxu0 %v2457_v3  ;;  %3091 = vmatpush3.bf16.msra.mxu1 %v2459_v4 }
 0x30e   : > { %2500 = vmatprep.mubr.bf16.mxu0 %v3742_v16  ;;  %3092 = vmatprep.mubr.msk.bf16.mxu1 %vm3741_vm0, %v3738_v9 }
 0x30f   : > { %3096 = vmatprep.subr.bf16.mxu1 %v3738_v9  ;;  %2601 = vmatprep.subr.bf16.mxu0 %v2579_v20 }
 0x318   : > { %2942 = vmatmul.mubr.msk.bf16.vlgmr.msra.gmra.mrb[4].mxu0 %vm422_vm3, %v3565_v61  ;;  %3093 = vmatmul.mubr.msk.bf16.vlgmr.msra.gmra.mrb[36].mxu1 %vm422_vm3, %v3565_v61 }
 0x319   : > { %3097 = vmatpush3.bf16.msra.mxu1 %v2580_v28  ;;  %2602 = vmatpush1.bf16.msra.mxu0 %v2578_v8 }
 0x31a   : > { %2633 = vmatprep.mubr.bf16.mxu0 %v3742_v16  ;;  %3098 = vmatprep.mubr.msk.bf16.mxu1 %vm3741_vm0, %v3738_v9 }
 0x324   : > { %2945 = vmatmul.mubr.msk.bf16.vlgmr.msra.gmra.mrb[4].mxu0 %vm422_vm3, %v3566_v10  ;;  %3099 = vmatmul.mubr.msk.bf16.vlgmr.msra.gmra.mrb[36].mxu1 %vm422_vm3, %v3566_v10 }
 0x3f7   : > { %v2635_v25 = vpop.f32.mrb[4].mxu0  ;;  %v2678_v26 = vpop.f32.mrb[36].mxu1 }
 0x3f8   : > { %v3111_v16 = vadd.f32 %v3102_v19, %v2678_v26  ;;  %v2637_v30 = vpop.f32.mrb[5].mxu0  ;;  %v3100_v31 = vpop.f32.mrb[37].mxu1  ;;  %v3103_v36 = vadd.f32 %v3102_v19, %v2635_v25 }
 0x3f9   : > { %v2639_v9 = vpop.f32.mrb[6].mxu0  ;;  %v2681_v32 = vpop.f32.mrb[38].mxu1  ;;  %v3105_v38 = vadd.f32 %v3102_v19, %v2637_v30 }
 0x3fa   : > { %v3113_v33 = vadd.f32 %v3106_v29, %v2681_v32  ;;  %2699 = vrot.lane.b32.xlu1 %v3111_v16, %s3745_s19  ;;  %v2641_v34 = vpop.f32.mrb[7].mxu0  ;;  %v3101_v35 = vpop.f32.mrb[39].mxu1  ;;  %v3107_v37 = vadd.f32 %v3106_v29, %v2639_v9 }
 0x3fb   : > { %v3109_v39 = vadd.f32 %v3106_v29, %v2641_v34 }
 0x3fc   : > { %2701 = vrot.lane.b32.xlu0 %v3113_v33, %s3745_s19 }
 0x3fe   : > { %2717 = vrot.lane.b32.xlu1 %v3111_v16, %s3747_s25 }
 0x400   : > { %2719 = vrot.lane.b32.xlu0 %v3113_v33, %s3747_s25 }
 0x402   : > { %2691 = vrot.lane.b32.xlu1 %v3103_v36, %s3745_s19 }
 0x404   : > { %2693 = vrot.lane.b32.xlu0 %v3107_v37, %s3745_s19 }
 0x406   : > { %2709 = vrot.lane.b32.xlu1 %v3103_v36, %s3747_s25 }
 0x408   : > { %2711 = vrot.lane.b32.xlu0 %v3107_v37, %s3747_s25 }
 0x40a   : > { %2727 = vrot.lane.b32.xlu1 %v3103_v36, %s3748_s17 }
 0x40c   : > { %2729 = vrot.lane.b32.xlu0 %v3107_v37, %s3748_s17 }
 0x40e   : > { %2695 = vrot.lane.b32.xlu1 %v3105_v38, %s3745_s19 }
 0x410   : > { %2697 = vrot.lane.b32.xlu0 %v3109_v39, %s3745_s19  ;;  %s2789_s19 = sshll.u32 %s352_s24, 4  ;;  %s4532_s19 = int_to_ptr.vmem [resolvable:$true] %s2789_s19 }
 0x411   : > { %s3659_s10 = scalar_lea.vmem %s4532_s19, 768  ;;  %p3666_p7 = scmp.lt.s32.totalorder %s4532_s19, %s3664_s16 }
 0x412   : > { %2713 = vrot.lane.b32.xlu1 %v3105_v38, %s3747_s25  ;;  %p3660_p11 = scmp.ne.s32.totalorder %s4532_s19, %s3659_s10  ;;  %p3667_p9 = scmp.lt.s32.totalorder %s3665_s21, %s3659_s10 }
 0x414   : > { %2715 = vrot.lane.b32.xlu0 %v3109_v39, %s3747_s25  ;;  %s3221_s25 = smul.u32 768, %s3818_s9  ;;  %p3661_p1 = pnand %p3660_p11, %p4607_p0 }
 0x415   : > { %p3668_p12 = por %p3667_p9, %p3666_p7 }
 0x416   : > { %2731 = vrot.lane.b32.xlu1 %v3105_v38, %s3748_s17  ;;  %p3662_p3 = pneg %p3661_p1 }
 0x418   : > { %2733 = vrot.lane.b32.xlu0 %v3109_v39, %s3748_s17  ;;  %p3669_p2 = pnand %p3668_p12, %p3662_p3 }
 0x41a   : > { %2735 = vrot.lane.b32.xlu1 %v3111_v16, %s3748_s17 }
 0x41c   : > { %2737 = vrot.lane.b32.xlu0 %v3113_v33, %s3748_s17  ;;  %s4537_s17 = scalar_lea.hbm %s4589_s8, %s3221_s25 }
 0x46c   : > { %v2700_v40 = vpop.permute.xlu1 %2699 }
 0x46e   : > { %v2702_v41 = vpop.permute.xlu0 %2701 }
 0x470   : > { %v2718_v42 = vpop.permute.xlu1 %2717 }
 0x472   : > { %v2720_v43 = vpop.permute.xlu0 %2719 }
 0x474   : > { %v2692_v44 = vpop.permute.xlu1 %2691 }
 0x475   : > { %v2707_v17 = vsel %vm964_vm6, %v2700_v40, %v2692_v44 }
 0x476   : > { %v2694_v45 = vpop.permute.xlu0 %2693  ;;  %v2747_v23 = vadd.f32 %v3111_v16, %v2707_v17 }
 0x477   : > { %v2708_v60 = vsel %vm964_vm6, %v2702_v41, %v2694_v45 }
 0x478   : > { %v2710_v46 = vpop.permute.xlu1 %2709  ;;  %v2750_v61 = vadd.f32 %v3113_v33, %v2708_v60 }
 0x479   : > { %v2725_v62 = vsel %vm1210_vm8, %v2718_v42, %v2710_v46 }
 0x47a   : > { %v2712_v47 = vpop.permute.xlu0 %2711  ;;  %v2753_v22 = vadd.f32 %v2747_v23, %v2725_v62 }
 0x47b   : > { %v2726_v3 = vsel %vm1210_vm8, %v2720_v43, %v2712_v47 }
 0x47c   : > { %v2728_v48 = vpop.permute.xlu1 %2727  ;;  %v2756_v12 = vadd.f32 %v2750_v61, %v2726_v3 }
 0x47e   : > { %v2730_v49 = vpop.permute.xlu0 %2729 }
 0x480   : > { %v2696_v50 = vpop.permute.xlu1 %2695 }
 0x481   : > { %v2705_v52 = vsel %vm964_vm6, %v2692_v44, %v2696_v50  ;;  %v2703_v58 = vsel %vm964_vm6, %v2696_v50, %v2700_v40 }
 0x482   : > { %v2698_v51 = vpop.permute.xlu0 %2697  ;;  %v2745_v56 = vadd.f32 %v3103_v36, %v2705_v52  ;;  %v2746_v4 = vadd.f32 %v3105_v38, %v2703_v58 }
 0x483   : > { %v2706_v54 = vsel %vm964_vm6, %v2694_v45, %v2698_v51  ;;  %v2704_v27 = vsel %vm964_vm6, %v2698_v51, %v2702_v41 }
 0x484   : > { %v2714_v53 = vpop.permute.xlu1 %2713  ;;  %v2748_v18 = vadd.f32 %v3107_v37, %v2706_v54  ;;  %v2749_v6 = vadd.f32 %v3109_v39, %v2704_v27 }
 0x485   : > { %v2723_v55 = vsel %vm1210_vm8, %v2710_v46, %v2714_v53  ;;  %v2721_v1 = vsel %vm1210_vm8, %v2714_v53, %v2718_v42 }
 0x486   : > { %v2716_v57 = vpop.permute.xlu0 %2715  ;;  %v2751_v0 = vadd.f32 %v2745_v56, %v2723_v55  ;;  %v2752_v7 = vadd.f32 %v2746_v4, %v2721_v1 }
 0x487   : > { %v2724_v59 = vsel %vm1210_vm8, %v2712_v47, %v2716_v57  ;;  %v2722_v63 = vsel %vm1210_vm8, %v2716_v57, %v2720_v43 }
 0x488   : > { %v2732_v21 = vpop.permute.xlu1 %2731  ;;  %v2754_v5 = vadd.f32 %v2748_v18, %v2724_v59  ;;  %v2755_v19 = vadd.f32 %v2749_v6, %v2722_v63 }
 0x489   : > { %v2741_v2 = vsel %vm1333_vm9, %v2728_v48, %v2732_v21 }
 0x48a   : > { %v2757_v15 = vadd.f32 %v2751_v0, %v2741_v2  ;;  %v2734_v20 = vpop.permute.xlu0 %2733 }
 0x48b   : > { %v2742_v28 = vsel %vm1333_vm9, %v2730_v49, %v2734_v20 }
 0x48c   : > { %v2763_v8 = vmul.f32 0.25, %v2757_v15  ;;  %v2760_v10 = vadd.f32 %v2754_v5, %v2742_v28  ;;  %v2736_v11 = vpop.permute.xlu1 %2735 }
 0x48d   : > { %v2739_v13 = vsel %vm1333_vm9, %v2732_v21, %v2736_v11  ;;  %v2743_v14 = vsel %vm1333_vm9, %v2736_v11, %v2728_v48 }
 0x48e   : > { %2769 = vst [vmem:[%s352_s24] sm:$0xff] %v2763_v8  ;;  %v2766_v25 = vmul.f32 0.25, %v2760_v10  ;;  %v2758_v26 = vadd.f32 %v2752_v7, %v2739_v13  ;;  %v2759_v29 = vadd.f32 %v2753_v22, %v2743_v14  ;;  %v2738_v16 = vpop.permute.xlu0 %2737 }
 0x48f   : > { %v2740_v30 = vsel %vm1333_vm9, %v2734_v20, %v2738_v16  ;;  %v2744_v31 = vsel %vm1333_vm9, %v2738_v16, %v2730_v49 }
 0x490   : > { %2772 = vst [vmem:[%s352_s24 + $0x18] sm:$0xff] %v2766_v25  ;;  %v2764_v9 = vmul.f32 0.25, %v2758_v26  ;;  %v2765_v32 = vmul.f32 0.25, %v2759_v29  ;;  %v2761_v33 = vadd.f32 %v2755_v19, %v2740_v30  ;;  %v2762_v34 = vadd.f32 %v2756_v12, %v2744_v31 }
 0x492   : > { %2770 = vst [vmem:[%s352_s24 + $0x8] sm:$0xff] %v2764_v9  ;;  %2771 = vst [vmem:[%s352_s24 + $0x10] sm:$0xff] %v2765_v32  ;;  %v2767_v35 = vmul.f32 0.25, %v2761_v33  ;;  %v2768_v36 = vmul.f32 0.25, %v2762_v34 }
 0x494   : > { %2773 = vst [vmem:[%s352_s24 + $0x20] sm:$0xff] %v2767_v35  ;;  %2774 = vst [vmem:[%s352_s24 + $0x28] sm:$0xff] %v2768_v36 }
 0x495   : > { %3672 = shalt.err (!%p3669_p2)
}
 0x496   : > { %s3673_s26 = scalar_lea.hbm %s4537_s17, 768  ;;  %s3677_s11 = scalar_lea.hbm %s4589_s8, 1536 }
 0x497   : > { %p3674_p13 = scmp.ne.s32.totalorder %s4537_s17, %s3673_s26  ;;  %p3678_p4 = scmp.lt.u32.totalorder %s4537_s17, %s4589_s8 }
 0x498   : > { %p3679_p5 = scmp.lt.u32.totalorder %s3677_s11, %s3673_s26  ;;  %p3681_p11 = scmp.lt.u32.totalorder %s3673_s26, %s4537_s17 }
 0x499   : > { %p3675_p6 = pnand %p3674_p13, %p4607_p0 }
 0x49a   : > { %p3680_p8 = por %p3679_p5, %p3678_p4 }
 0x49b   : > { %p3676_p10 = pneg %p3675_p6 }
 0x49c   : > { %p3682_p1 = por %p3681_p11, %p3680_p8 }
 0x49e   : > { %p3683_p3 = pnand %p3682_p1, %p3676_p10 }
 0x4a0   : > { %3686 = shalt.err (!%p3683_p3)
}
 0x4a1   : > { %s3750_s9 = smov 384   ;;  %s3751_s14 = smov 24  }
 0x4a2   : > { %3232 = dma.vmem_to_hbm [thread:$0]  (%p4607_p0), %s4532_s19, 768, %s4537_s17, %s2776_s13, %s3750_s9, %s3750_s9, %s3751_s14  }
 0x4a3 PF: > { %s2804_s10 = sand.u32 1, %s3717_s27   ;;  %p4608_p7 = scmp.ne.s32.totalorder %s4596_s12, 0 }
 0x4a4   : > { %p4609_p9 = scmp.ge.s32.totalorder %s3729_s30, 2  ;;  %s2805_s15 = scalar_lea.sflag [#allocation4], %s2804_s10 }
 0x4a6   : > { %p3246_p12 = pnand %p4609_p9, %p4608_p7 }
 0x4a8   : > { %3712 = dma.done.wait (!%p3246_p12), %s2805_s15, 768  }
 0x4a9   : > { %3714 = vsyncadd (!%p3246_p12), %s2805_s15, 4294966528  ;;  %p22_p2 = scmp.ge.s32.totalorder %s3907_s20, 4   ;;  %s4610_s27 = smov %s3721_s28 }
 0x4aa   : > { %s4611_s28 = smov %s3725_s29  ;;  %s4612_s29 = smov %s3923_s23 }
 0x4ab   : > { %s4613_s30 = smov %s3907_s20  ;;  %24 = sbr.rel (!%p22_p2) target bundleno = 9 (0x9), region = 121 }
 0x4b2   :  { %2810 = vsyncpa [#allocation3], 1 }
 0x4b3   :  { %2812 = vsyncpa [#allocation3 + $0x1], 1 }
 0x4b4   :  { %2813 = vsyncpa [#allocation6], 1 }
 0x4b5   :  { %2814 = vsyncpa [#allocation4], 1 }
 0x4b6   :  { %2816 = vsyncpa [#allocation4 + $0x1], 1 }

// kernel: tpu_custom_call.1
= control target key start
LH: loop header
LB: loop body
LE: loop exit
PB: predicated region body
PF: predicated region fallthrough
CT: control target
= control target key end

     0   :  { %s4581_s0 = inlined_call_operand.hbm [shape: f32[2,16,384], index: 0, kind: input, shape index: {}]   ;;  %s4582_s1 = inlined_call_operand.hbm [shape: bf16[9,16,16], index: 1, kind: input, shape index: {}]   ;;  %s4583_s2 = inlined_call_operand.vmem [shape: f32[16,1], index: 2, kind: input, shape index: {}]   ;;  %s4584_s3 = inlined_call_operand.hbm [shape: bf16[9,16,16], index: 3, kind: input, shape index: {}]   ;;  %s4585_s4 = inlined_call_operand.vmem [shape: f32[16,1], index: 4, kind: input, shape index: {}]   ;;  %s4586_s5 = inlined_call_operand.vmem [shape: bf16[16,16], index: 5, kind: input, shape index: {}]   ;;  %s4587_s6 = inlined_call_operand.vmem [shape: f32[16,1], index: 6, kind: input, shape index: {}]   ;;  %s4588_s7 = inlined_call_operand.vmem [shape: f32[1,384], index: 7, kind: input, shape index: {}]   ;;  %s4589_s8 = inlined_call_operand.hbm [shape: f32[2,16,384], index: 8, kind: output, shape index: {}]  }
   0x1   :  { %4593 = sst [smem:[#allocation12_spill]] %s4582_s1 }
   0x2   :  { %4594 = sst [smem:[#allocation13_spill]] %s4584_s3 }
   0x3   :  { %13 = vsyncpa [#allocation3], 0 }
   0x4   :  { %15 = vsyncpa [#allocation3 + $0x1], 0 }
   0x5   :  { %16 = vsyncpa [#allocation6], 0 }
   0x6   :  { %17 = vsyncpa [#allocation4], 0 }
   0x7   :  { %19 = vsyncpa [#allocation4 + $0x1], 0  ;;  %s3797_s27 = smov 0   ;;  %s3799_s28 = smov 0  }
   0x8   :  { %s3801_s29 = smov 0   ;;  %s3803_s30 = smov 0  }
   0x9 LB: > { %s3818_s9 = sadd.s32 4294967295, %s3729_s30   ;;  %s2881_s10 = sadd.s32 4294967294, %s3729_s30   ;;  %s3729_s30 = sphi %s3803_s30, %s4613_s30   ;;  %s3725_s29 = sphi %s3801_s29, %s4612_s29   ;;  %s3721_s28 = sphi %s3799_s28, %s4611_s28   ;;  %s3717_s27 = sphi %s3797_s27, %s4610_s27  }
   0xa   : > { %p45_p0 = scmp.ne.s32.totalorder %s3721_s28, %s3717_s27  ;;  %p4590_p1 = scmp.eq.s32.totalorder %s3818_s9, 0 }
   0xb   : > { %p222_p3 = scmp.eq.s32.totalorder %s2881_s10, 1  ;;  %p2882_p5 = scmp.ge.s32.totalorder %s3729_s30, 1 }
   0xc   : > { %p3827_p4 = por %p4590_p1, %p45_p0  ;;  %p229_p7 = scmp.lt.s32.totalorder %s3729_s30, 3 }
   0xd   : > { %p3832_p6 = por %p222_p3, %p45_p0  ;;  %s3731_s14 = smov [#allocation5]  }
   0xe   : > { %s4595_s11 = scalar_select %p3827_p4, 1, 0 }
   0xf   : > { %s4596_s12 = scalar_select %p3832_p6, 1, 0 }
  0x10   : > { %p3837_p8 = pnand %p2882_p5, %p229_p7  ;;  %s241_s15 = sshll.u32 %s3731_s14, 4  ;;  %s3841_s15 = int_to_ptr.vmem [resolvable:$true] %s241_s15 }
  0x11   : > { %s3732_s17 = smov [#allocation7]   ;;  %s4599_s1 = sld [smem:[#allocation12_spill]] }
  0x12   : > { %p3234_p9 = pneg %p3837_p8  ;;  %s257_s18 = sshll.u32 %s3732_s17, 4  ;;  %s3852_s18 = int_to_ptr.vmem [resolvable:$true] %s257_s18 }
  0x14   : > { %p3848_p11 = pnand %p3234_p9, %p4590_p1 }
  0x16   : > { %p3575_p13 = pneg %p3848_p11 }
  0x17   : > { %s3573_s21 = scalar_lea.hbm %s4599_s1, 1152 }
  0x18   : > { %p3574_p12 = scmp.ne.s32.totalorder %s4599_s1, %s3573_s21  ;;  %p3580_p5 = scmp.lt.u32.totalorder %s3573_s21, %s4599_s1 }
  0x1a   : > { %p3576_p0 = pnand %p3575_p13, %p3574_p12 }
  0x1c   : > { %p3577_p3 = pneg %p3576_p0 }
  0x1e   : > { %p3582_p7 = pnand %p3580_p5, %p3577_p3 }
  0x20   : > { %3585 = shalt.err (!%p3582_p7)
}
  0x21   : > { %s3586_s26 = scalar_lea.vmem %s3841_s15, 1152  ;;  %p3594_p2 = scmp.lt.s32.totalorder %s3841_s15, %s3841_s15 }
  0x22   : > { %p3587_p9 = scmp.ne.s32.totalorder %s3841_s15, %s3586_s26  ;;  %p3595_p12 = scmp.lt.s32.totalorder %s3586_s26, %s3586_s26 }
  0x24   : > { %p3589_p10 = pnand %p3587_p9, %p3575_p13  ;;  %p3596_p0 = por %p3595_p12, %p3594_p2 }
  0x26   : > { %p3590_p1 = pneg %p3589_p10 }
  0x28   : > { %p3597_p6 = pnand %p3596_p0, %p3590_p1 }
  0x2a   : > { %3600 = shalt.err (!%p3597_p6)
}
  0x2b   : > { %s3733_s10 = smov 64   ;;  %s3734_s14 = smov 4  }
  0x2c   : > { %3237 = dma.hbm_to_vmem [thread:$0]  (!%p3848_p11), %s4599_s1, 1152, %s3841_s15, [#allocation6], %s3733_s10, %s3733_s10, %s3734_s14  }
  0x2d   : > { %s4600_s3 = sld [smem:[#allocation13_spill]] }
  0x33   : > { %s3601_s22 = scalar_lea.hbm %s4600_s3, 1152 }
  0x34   : > { %p3602_p2 = scmp.ne.s32.totalorder %s4600_s3, %s3601_s22  ;;  %p3608_p10 = scmp.lt.u32.totalorder %s3601_s22, %s4600_s3 }
  0x36   : > { %p3604_p1 = pnand %p3602_p2, %p3575_p13 }
  0x38   : > { %p3605_p6 = pneg %p3604_p1 }
  0x3a   : > { %p3610_p3 = pnand %p3608_p10, %p3605_p6 }
  0x3c   : > { %3613 = shalt.err (!%p3610_p3)
}
  0x3d   : > { %s3614_s15 = scalar_lea.vmem %s3852_s18, 1152  ;;  %p3622_p12 = scmp.lt.s32.totalorder %s3852_s18, %s3852_s18 }
  0x3e   : > { %p3615_p5 = scmp.ne.s32.totalorder %s3852_s18, %s3614_s15  ;;  %p3623_p0 = scmp.lt.s32.totalorder %s3614_s15, %s3614_s15 }
  0x40   : > { %p3617_p7 = pnand %p3615_p5, %p3575_p13  ;;  %p3624_p2 = por %p3623_p0, %p3622_p12 }
  0x42   : > { %p3618_p9 = pneg %p3617_p7 }
  0x44   : > { %p3625_p1 = pnand %p3624_p2, %p3618_p9 }
  0x46   : > { %3628 = shalt.err (!%p3625_p1)
}
  0x47   : > { %3240 = dma.hbm_to_vmem [thread:$0]  (!%p3848_p11), %s4600_s3, 1152, %s3852_s18, [#allocation6], %s3733_s10, %s3733_s10, %s3734_s14  }
  0x48   : > { %s3907_s20 = sadd.s32 1, %s3729_s30   ;;  %s32_s16 = sadd.s32 1, %s3725_s29 }
  0x49   : > { %s29_s21 = ssub.s32 %s3729_s30, %s3907_s20  ;;  %p39_p13 = scmp.ne.s32.totalorder %s3725_s29, %s3721_s28 }
  0x4a   : > { %p30_p6 = scmp.eq.s32.totalorder %s29_s21, 0  ;;  %p40_p10 = scmp.eq.s32.totalorder %s3729_s30, 0 }
  0x4b   : > { %p4601_p3 = scmp.eq.s32.totalorder %s3818_s9, 1  ;;  %p3251_p7 = scmp.lt.s32.totalorder %s3729_s30, 2 }
  0x4c   : > { %s3923_s23 = scalar_select %p30_p6, %s3725_s29, %s32_s16  }
  0x4d   : > { %p3917_p5 = por %p4601_p3, %p39_p13  ;;  %p41_p9 = por %p40_p10, %p39_p13 }
  0x4e   : > { %s283_s24 = sand.u32 1, %s3725_s29   ;;  %s3219_s18 = smul.u32 768, %s3729_s30 }
  0x4f   : > { %s4602_s22 = scalar_select %p3917_p5, 1, 0 }
  0x50   : > { %s3218_s25 = smul.u32 48, %s283_s24  ;;  %p3927_p11 = pnand %p3251_p7, %p41_p9 }
  0x51   : > { %s3934_s15 = scalar_lea.hbm %s4581_s0, %s3219_s18  ;;  %s3938_s16 = scalar_lea.sflag [#allocation3], %s283_s24 }
  0x52   : > { %s287_s17 = scalar_lea.vmem [#allocation2], %s3218_s25  ;;  %s3629_s21 = scalar_lea.hbm %s3934_s15, 768 }
  0x53   : > { %s294_s19 = sshll.u32 %s287_s17, 4  ;;  %p3630_p12 = scmp.ne.s32.totalorder %s3934_s15, %s3629_s21  ;;  %s3936_s19 = int_to_ptr.vmem [resolvable:$true] %s294_s19 }
  0x54   : > { %p3631_p0 = pneg %p3927_p11  ;;  %s3634_s26 = scalar_lea.hbm %s4581_s0, 1536 }
  0x55   : > { %p3635_p13 = scmp.lt.u32.totalorder %s3934_s15, %s4581_s0  ;;  %p3636_p6 = scmp.lt.u32.totalorder %s3634_s26, %s3629_s21 }
  0x56   : > { %p3632_p2 = pnand %p3631_p0, %p3630_p12  ;;  %p3638_p3 = scmp.lt.u32.totalorder %s3629_s21, %s3934_s15 }
  0x57   : > { %p3637_p10 = por %p3636_p6, %p3635_p13 }
  0x58   : > { %p3633_p1 = pneg %p3632_p2 }
  0x59   : > { %p3639_p7 = por %p3638_p3, %p3637_p10 }
  0x5b   : > { %p3640_p9 = pnand %p3639_p7, %p3633_p1 }
  0x5d   : > { %3643 = shalt.err (!%p3640_p9)
}
  0x5e   : > { %s3644_s24 = scalar_lea.vmem %s3936_s19, 768  ;;  %s3735_s25 = smov [#allocation2]  }
  0x5f   : > { %p3645_p12 = scmp.ne.s32.totalorder %s3936_s19, %s3644_s24  ;;  %s3649_s17 = sshll.u32 %s3735_s25, 4  ;;  %s3650_s17 = int_to_ptr.vmem [resolvable:$false] %s3649_s17 }
  0x60   : > { %s3651_s1 = scalar_lea.vmem %s3650_s17, 1536  ;;  %p3652_p4 = scmp.lt.s32.totalorder %s3936_s19, %s3650_s17 }
  0x61   : > { %p3647_p2 = pnand %p3645_p12, %p3631_p0  ;;  %p3653_p13 = scmp.lt.s32.totalorder %s3651_s1, %s3644_s24 }
  0x63   : > { %p3648_p5 = pneg %p3647_p2  ;;  %p3654_p6 = por %p3653_p13, %p3652_p4 }
  0x65   : > { %p3655_p10 = pnand %p3654_p6, %p3648_p5 }
  0x67   : > { %3658 = shalt.err (!%p3655_p10)
}
  0x68   : > { %s3736_s3 = smov 384   ;;  %s3737_s21 = smov 24  }
  0x69   : > { %3244 = dma.hbm_to_vmem [thread:$0]  (!%p3927_p11), %s3934_s15, 768, %s3936_s19, %s3938_s16, %s3736_s3, %s3736_s3, %s3737_s21  }
  0x6a   : > { %306 = sbr.rel (%p3837_p8) target bundleno = 1187 (0x4a3), region = 52  ;;  %s3969_s18 = sand.u32 (!%p3837_p8), 1, %s3721_s28  }
  0x6b   : > { %s3220_s14 = smul.u32 (!%p3837_p8), 48, %s3969_s18  ;;  %s309_s26 = scalar_lea.sflag (!%p3837_p8), [#allocation3], %s3969_s18 }
  0x6c   : > { %p4604_p4 = scmp.ne.s32.totalorder (!%p3837_p8), %s4595_s11, 0 }
  0x6d   : > { %s3975_s24 = scalar_lea.vmem (!%p3837_p8), [#allocation2], %s3220_s14 }
  0x71   : > { %3704 = dma.done.wait (%p4604_p4), %s309_s26, 768  }
  0x72   : > { %3706 = vsyncadd (%p4604_p4), %s309_s26, 4294966528  ;;  %p4605_p5 = scmp.eq.s32.totalorder %s3818_s9, 0 }
  0x74   : > { %3708 = dma.done.wait (%p4605_p5), [#allocation6], 2304   ;;  %p4606_p8 = pmov %p4605_p5 }
  0x75   : > { %v356_v0 = vld [vmem:[%s3975_s24 + $0x10] sm:$0xff]  ;;  %v359_v1 = vld [vmem:[%s3975_s24 + $0x28] sm:$0xff]  ;;  %v354_v2 = vld [vmem:[%s3975_s24] sm:$0xff]  ;;  %v3738_v9 = vmov 0.0   ;;  %s3739_s11 = smov 18   ;;  %s3740_s13 = smov 19   ;;  %v378_v22 = vlaneseq }
  0x76   : > { %3710 = vsyncadd (%p4606_p8), [#allocation6], 4294964992  ;;  %v362_v3 = vmax.f32 %v356_v0, 0.0  ;;  %v365_v4 = vmax.f32 %v359_v1, 0.0  ;;  %v357_v5 = vld [vmem:[%s3975_s24 + $0x18] sm:$0xff]  ;;  %v360_v6 = vmax.f32 %v354_v2, 0.0  ;;  %2988 = vmatprep.subr.bf16.mxu1 %v3738_v9 }
  0x77   : > { %v355_v7 = vld [vmem:[%s3975_s24 + $0x8] sm:$0xff]  ;;  %v358_v8 = vld [vmem:[%s3975_s24 + $0x20] sm:$0xff]  ;;  %v363_v10 = vmax.f32 %v357_v5, 0.0  ;;  %vm3741_vm0 = vmmov 0   ;;  %v3742_v16 = vmov 0   ;;  %s3743_s10 = smov 17  }
  0x78   : > { %v361_v11 = vmax.f32 %v355_v7, 0.0  ;;  %v364_v12 = vmax.f32 %v358_v8, 0.0  ;;  %v3316_v13 = vpack.i.bf16 %v365_v4, %v362_v3  ;;  %2990 = vmatprep.mubr.msk.bf16.mxu1 %vm3741_vm0, %v3738_v9  ;;  %458 = vmatprep.mubr.bf16.mxu0 %v3742_v16  ;;  %s3744_s15 = smov 1   ;;  %s3745_s19 = smov 127   ;;  %v4011_v17 = vpack.c.bf16 %v365_v4, %v362_v3  ;;  %v1444_v20 = vld [vmem:[%s4583_s2] sm:$0xff]  ;;  %v1445_v21 = vld [vmem:[%s4583_s2 + $0x8] sm:$0xff] }
  0x79   : > { %v3306_v14 = vpack.i.bf16 %v363_v10, %v360_v6  ;;  %3426 = vset.pattern.permute.xlu0 %v3742_v16  ;;  %3427 = vset.pattern.permute.xlu1 %v3742_v16  ;;  %s3746_s16 = smov 111   ;;  %s3747_s25 = smov 110   ;;  %v4022_v19 = vpack.c.bf16 %v363_v10, %v360_v6  ;;  %v4034_v24 = vand.u32 127, %v378_v22  ;;  %v3548_v51 = vld [vmem:[#allocation5 + $0x8] sm:$0xff]   ;;  %vm422_vm3 = vcmask 130048  }
  0x7a   : > { %3317 = vrot.lane.b32.xlu1 %v3316_v13, %s3739_s11  ;;  %v3311_v15 = vpack.i.bf16 %v364_v12, %v361_v11  ;;  %s3748_s17 = smov 109   ;;  %v4020_v18 = vpack.c.bf16 %v364_v12, %v361_v11  ;;  %v3549_v11 = vld [vmem:[#allocation5] sm:$0xff]   ;;  %p4607_p0 = scmp.ne.s32.totalorder %s4602_s22, 0 }
  0x7b   : > { %3307 = vrot.lane.b32.xlu0 %v3306_v14, %s3739_s11  ;;  %vm404_vm1 = vcmp.lt.s32.totalorder %v4034_v24, 18  ;;  %vm380_vm2 = vcmp.lt.s32.totalorder %v4034_v24, 19  ;;  %vm614_vm4 = vcmp.lt.s32.totalorder %v4034_v24, 17  ;;  %vm737_vm5 = vcmp.lt.s32.totalorder %v4034_v24, 1 }
  0x7c   : > { %vm964_vm6 = vcmp.lt.s32.totalorder %v4034_v24, 127  ;;  %vm1087_vm7 = vcmp.lt.s32.totalorder %v4034_v24, 111  ;;  %vm1210_vm8 = vcmp.lt.s32.totalorder %v4034_v24, 110  ;;  %vm1333_vm9 = vcmp.lt.s32.totalorder %v4034_v24, 109 }
  0x7e   : > { %3322 = vrot.lane.b32.xlu1 %v3306_v14, %s3740_s13 }
  0x7f   : > { %3312 = vrot.lane.b32.xlu0 %v3311_v15, %s3739_s11 }
  0x82   : > { %3332 = vrot.lane.b32.xlu1 %v3316_v13, %s3740_s13 }
  0x83   : > { %3327 = vrot.lane.b32.xlu0 %v3311_v15, %s3740_s13 }
  0x86   : > { %3342 = vrot.lane.b32.xlu1 %v3311_v15, %s3743_s10 }
  0x87   : > { %3337 = vrot.lane.b32.xlu0 %v3306_v14, %s3743_s10 }
  0x8a   : > { %3352 = vrot.lane.b32.xlu1 %v3306_v14, %s3744_s15 }
  0x8b   : > { %3347 = vrot.lane.b32.xlu0 %v3316_v13, %s3743_s10 }
  0x8e   : > { %3362 = vrot.lane.b32.xlu1 %v3316_v13, %s3744_s15 }
  0x8f   : > { %3357 = vrot.lane.b32.xlu0 %v3311_v15, %s3744_s15 }
  0x92   : > { %3372 = vrot.lane.b32.xlu1 %v3316_v13, %s3745_s19 }
  0x93   : > { %3367 = vrot.lane.b32.xlu0 %v3311_v15, %s3745_s19 }
  0x96   : > { %3382 = vrot.lane.b32.xlu1 %v3311_v15, %s3746_s16 }
  0x97   : > { %3377 = vrot.lane.b32.xlu0 %v3306_v14, %s3745_s19 }
  0x9a   : > { %3392 = vrot.lane.b32.xlu1 %v3306_v14, %s3746_s16 }
  0x9b   : > { %3387 = vrot.lane.b32.xlu0 %v3316_v13, %s3746_s16 }
  0x9e   : > { %3402 = vrot.lane.b32.xlu1 %v3316_v13, %s3747_s25 }
  0x9f   : > { %3397 = vrot.lane.b32.xlu0 %v3311_v15, %s3747_s25 }
  0xa2   : > { %3412 = vrot.lane.b32.xlu1 %v3311_v15, %s3748_s17 }
  0xa3   : > { %3407 = vrot.lane.b32.xlu0 %v3306_v14, %s3747_s25 }
  0xa6   : > { %3422 = vrot.lane.b32.xlu1 %v3306_v14, %s3748_s17 }
  0xa7   : > { %3417 = vrot.lane.b32.xlu0 %v3316_v13, %s3748_s17 }
  0xaa   : > { %1453 = vperm.xlu1 %3427, %v1445_v21  }
  0xab   : > { %1448 = vperm.xlu0 %3426, %v1444_v20  }
  0xec   : > { %v3318_v23 = vpop.permute.xlu1 %3317 }
  0xed   : > { %v3308_v25 = vpop.permute.xlu0 %3307  ;;  %v3320_v26 = vunpack.i.h.bf16 %v3318_v23  ;;  %v3319_v27 = vunpack.i.l.bf16 %v3318_v23 }
  0xee   : > { %v3310_v28 = vunpack.i.h.bf16 %v3308_v25  ;;  %v3309_v29 = vunpack.i.l.bf16 %v3308_v25 }
  0xf0   : > { %v3323_v30 = vpop.permute.xlu1 %3322  ;;  %v409_v36 = vsel %vm404_vm1, %v3319_v27, %v3309_v29  ;;  %v410_v37 = vsel %vm404_vm1, %v3320_v26, %v3310_v28 }
  0xf1   : > { %v3313_v31 = vpop.permute.xlu0 %3312  ;;  %v3325_v34 = vunpack.i.h.bf16 %v3323_v30  ;;  %v3324_v35 = vunpack.i.l.bf16 %v3323_v30  ;;  %v414_v50 = vpack.c.bf16 %v410_v37, %v409_v36  ;;  %v3550_v36 = vld [vmem:[#allocation5 + $0x10] sm:$0xff]  }
  0xf2   : > { %v3315_v32 = vunpack.i.h.bf16 %v3313_v31  ;;  %v3314_v33 = vunpack.i.l.bf16 %v3313_v31 }
  0xf4   : > { %v3333_v38 = vpop.permute.xlu1 %3332  ;;  %v407_v39 = vsel %vm404_vm1, %v3309_v29, %v3314_v33  ;;  %v408_v40 = vsel %vm404_vm1, %v3310_v28, %v3315_v32  ;;  %v405_v41 = vsel %vm404_vm1, %v3314_v33, %v3319_v27  ;;  %v406_v42 = vsel %vm404_vm1, %v3315_v32, %v3320_v26 }
  0xf5   : > { %v3328_v43 = vpop.permute.xlu0 %3327  ;;  %v3335_v44 = vunpack.i.h.bf16 %v3333_v38  ;;  %v3334_v45 = vunpack.i.l.bf16 %v3333_v38  ;;  %v415_v46 = vpack.c.bf16 %v408_v40, %v407_v39  ;;  %v416_v47 = vpack.c.bf16 %v406_v42, %v405_v41 }
  0xf6   : > { %v3330_v48 = vunpack.i.h.bf16 %v3328_v43  ;;  %v3329_v49 = vunpack.i.l.bf16 %v3328_v43 }
  0xf7   : > { %v385_v52 = vsel %vm380_vm2, %v3334_v45, %v3324_v35  ;;  %v386_v53 = vsel %vm380_vm2, %v3335_v44, %v3325_v34  ;;  %426 = vmatprep.subr.bf16.mxu0 %v415_v46  ;;  %2989 = vmatpush3.bf16.msra.mxu1 %v416_v47 }
  0xf8   : > { %v381_v54 = vsel %vm380_vm2, %v3329_v49, %v3334_v45  ;;  %v382_v55 = vsel %vm380_vm2, %v3330_v48, %v3335_v44  ;;  %427 = vmatpush1.bf16.msra.mxu0 %v414_v50  ;;  %v383_v56 = vsel %vm380_vm2, %v3324_v35, %v3329_v49  ;;  %v3343_v57 = vpop.permute.xlu1 %3342  ;;  %v389_v58 = vpack.c.bf16 %v386_v53, %v385_v52  ;;  %v3551_v44 = vld [vmem:[#allocation5 + $0x18] sm:$0xff]  }
  0xf9   : > { %v391_v59 = vpack.c.bf16 %v382_v55, %v381_v54  ;;  %v384_v60 = vsel %vm380_vm2, %v3325_v34, %v3330_v48  ;;  %v3338_v61 = vpop.permute.xlu0 %3337  ;;  %2994 = vmatprep.subr.bf16.mxu1 %v3738_v9  ;;  %v3345_v62 = vunpack.i.h.bf16 %v3343_v57  ;;  %v3344_v2 = vunpack.i.l.bf16 %v3343_v57 }
  0xfa   : > { %2991 = vmatmul.mubr.msk.bf16.vlgmr.msra.gmra.mrb[0].mxu1 %vm422_vm3, %v3548_v51  ;;  %v390_v63 = vpack.c.bf16 %v384_v60, %v383_v56  ;;  %v3340_v0 = vunpack.i.h.bf16 %v3338_v61  ;;  %v3339_v1 = vunpack.i.l.bf16 %v3338_v61  ;;  %v3552_v56 = vld [vmem:[#allocation5 + $0x20] sm:$0xff]  }
  0xfb   : > { %2891 = vmatmul.mubr.msk.bf16.vlgmr.msra.gmra.mrb[0].mxu0 %vm422_vm3, %v3548_v51  ;;  %2995 = vmatpush3.bf16.msra.mxu1 %v391_v59 }
  0xfc   : > { %518 = vmatprep.subr.bf16.mxu0 %v390_v63  ;;  %2996 = vmatprep.mubr.msk.bf16.mxu1 %vm3741_vm0, %v3738_v9  ;;  %v3353_v3 = vpop.permute.xlu1 %3352  ;;  %v617_v4 = vsel %vm614_vm4, %v3339_v1, %v3344_v2  ;;  %v618_v5 = vsel %vm614_vm4, %v3340_v0, %v3345_v62 }
  0xfd   : > { %519 = vmatpush1.bf16.msra.mxu0 %v389_v58  ;;  %v3348_v6 = vpop.permute.xlu0 %3347  ;;  %550 = vmatprep.mubr.bf16.mxu0 %v3742_v16  ;;  %v625_v7 = vpack.c.bf16 %v618_v5, %v617_v4  ;;  %v3355_v12 = vunpack.i.h.bf16 %v3353_v3  ;;  %v3354_v20 = vunpack.i.l.bf16 %v3353_v3  ;;  %v3553_v5 = vld [vmem:[#allocation5 + $0x28] sm:$0xff]  }
  0xfe   : > { %v3350_v8 = vunpack.i.h.bf16 %v3348_v6  ;;  %v3349_v10 = vunpack.i.l.bf16 %v3348_v6  ;;  %3000 = vmatprep.subr.bf16.mxu1 %v3738_v9 }
  0xff   : > { %635 = vmatprep.subr.bf16.mxu0 %v625_v7 }
 0x100   : > { %v616_v13 = vsel %vm614_vm4, %v3345_v62, %v3350_v8  ;;  %v615_v14 = vsel %vm614_vm4, %v3344_v2, %v3349_v10  ;;  %v619_v15 = vsel %vm614_vm4, %v3349_v10, %v3339_v1  ;;  %v3363_v21 = vpop.permute.xlu1 %3362  ;;  %v620_v23 = vsel %vm614_vm4, %v3350_v8, %v3340_v0 }
 0x101   : > { %v626_v25 = vpack.c.bf16 %v616_v13, %v615_v14  ;;  %v3365_v26 = vunpack.i.h.bf16 %v3363_v21  ;;  %v3364_v27 = vunpack.i.l.bf16 %v3363_v21  ;;  %v3358_v28 = vpop.permute.xlu0 %3357  ;;  %v624_v31 = vpack.c.bf16 %v620_v23, %v619_v15 }
 0x102   : > { %2997 = vmatmul.mubr.msk.bf16.vlgmr.msra.gmra.mrb[4].mxu1 %vm422_vm3, %v3549_v11  ;;  %v3360_v29 = vunpack.i.h.bf16 %v3358_v28  ;;  %v3359_v30 = vunpack.i.l.bf16 %v3358_v28 }
 0x103   : > { %3001 = vmatpush3.bf16.msra.mxu1 %v626_v25  ;;  %3002 = vmatprep.mubr.msk.bf16.mxu1 %vm3741_vm0, %v3738_v9  ;;  %v742_v41 = vsel %vm737_vm5, %v3364_v27, %v3354_v20  ;;  %v743_v42 = vsel %vm737_vm5, %v3365_v26, %v3355_v12 }
 0x104   : > { %v739_v32 = vsel %vm737_vm5, %v3360_v29, %v3365_v26  ;;  %v738_v33 = vsel %vm737_vm5, %v3359_v30, %v3364_v27  ;;  %3006 = vmatprep.subr.bf16.mxu1 %v3738_v9  ;;  %v740_v34 = vsel %vm737_vm5, %v3354_v20, %v3359_v30  ;;  %v741_v35 = vsel %vm737_vm5, %v3355_v12, %v3360_v29  ;;  %v3373_v40 = vpop.permute.xlu1 %3372  ;;  %v3554_v26 = vld [vmem:[#allocation5 + $0x30] sm:$0xff]  }
 0x105   : > { %v748_v37 = vpack.c.bf16 %v741_v35, %v740_v34  ;;  %v749_v38 = vpack.c.bf16 %v739_v32, %v738_v33  ;;  %v4096_v39 = vpop.permute.xlu0 %3367  ;;  %v747_v45 = vpack.c.bf16 %v743_v42, %v742_v41  ;;  %v3375_v47 = vunpack.i.h.bf16 %v3373_v40 }
 0x106   : > { %v3374_v48 = vunpack.i.l.bf16 %v3373_v40  ;;  %v3370_v55 = vunpack.i.h.bf16 %v4096_v39  ;;  %v3555_v40 = vld [vmem:[#allocation5 + $0x38] sm:$0xff]  }
 0x107   : > { %2894 = vmatmul.mubr.msk.bf16.vlgmr.msra.gmra.mrb[0].mxu0 %vm422_vm3, %v3549_v11 }
 0x108   : > { %636 = vmatpush1.bf16.msra.mxu0 %v624_v31  ;;  %667 = vmatprep.mubr.bf16.mxu0 %v3742_v16  ;;  %v4107_v46 = vpop.permute.xlu1 %3382  ;;  %v966_v0 = vsel %vm964_vm6, %v3370_v55, %v3375_v47 }
 0x109   : > { %758 = vmatprep.subr.bf16.mxu0 %v748_v37  ;;  %v3378_v43 = vpop.permute.xlu0 %3377  ;;  %v3385_v13 = vunpack.i.h.bf16 %v4107_v46  ;;  %v3384_v14 = vunpack.i.l.bf16 %v4107_v46 }
 0x10a   : > { %3003 = vmatmul.mubr.msk.bf16.vlgmr.msra.gmra.mrb[8].mxu1 %vm422_vm3, %v3550_v36  ;;  %v3380_v49 = vunpack.i.h.bf16 %v3378_v43  ;;  %v3379_v50 = vunpack.i.l.bf16 %v3378_v43 }
 0x10b   : > { %3007 = vmatpush3.bf16.msra.mxu1 %v749_v38  ;;  %3008 = vmatprep.mubr.msk.bf16.mxu1 %vm3741_vm0, %v3738_v9 }
 0x10c   : > { %3012 = vmatprep.subr.bf16.mxu1 %v3738_v9  ;;  %v970_v52 = vsel %vm964_vm6, %v3375_v47, %v3380_v49  ;;  %v969_v53 = vsel %vm964_vm6, %v3374_v48, %v3379_v50  ;;  %v4123_v54 = vpop.permute.xlu1 %3392  ;;  %v968_v15 = vsel %vm964_vm6, %v3380_v49, %v3370_v55 }
 0x10d   : > { %v4110_v51 = vpop.permute.xlu0 %3387  ;;  %v976_v57 = vpack.c.bf16 %v970_v52, %v969_v53  ;;  %v3395_v59 = vunpack.i.h.bf16 %v4123_v54  ;;  %v3394_v60 = vunpack.i.l.bf16 %v4123_v54 }
 0x10e   : > { %v3390_v61 = vunpack.i.h.bf16 %v4110_v51  ;;  %v3389_v62 = vunpack.i.l.bf16 %v4110_v51 }
 0x10f   : > { %v1090_v42 = vsel %vm1087_vm7, %v3394_v60, %v3384_v14  ;;  %v1091_v43 = vsel %vm1087_vm7, %v3395_v59, %v3385_v13 }
 0x110   : > { %v4135_v63 = vpop.permute.xlu1 %3402  ;;  %v1093_v1 = vsel %vm1087_vm7, %v3390_v61, %v3395_v59  ;;  %v1092_v2 = vsel %vm1087_vm7, %v3389_v62, %v3394_v60  ;;  %v1088_v29 = vsel %vm1087_vm7, %v3384_v14, %v3389_v62  ;;  %v1089_v30 = vsel %vm1087_vm7, %v3385_v13, %v3390_v61 }
 0x111   : > { %v4128_v58 = vpop.permute.xlu0 %3397  ;;  %v1099_v6 = vpack.c.bf16 %v1093_v1, %v1092_v2  ;;  %v3405_v8 = vunpack.i.h.bf16 %v4135_v63  ;;  %v3404_v10 = vunpack.i.l.bf16 %v4135_v63  ;;  %v1098_v35 = vpack.c.bf16 %v1089_v30, %v1088_v29 }
 0x112   : > { %3009 = vmatmul.mubr.msk.bf16.vlgmr.msra.gmra.mrb[12].mxu1 %vm422_vm3, %v3551_v44  ;;  %v3400_v38 = vunpack.i.h.bf16 %v4128_v58  ;;  %v1097_v46 = vpack.c.bf16 %v1091_v43, %v1090_v42 }
 0x113   : > { %2897 = vmatmul.mubr.msk.bf16.vlgmr.msra.gmra.mrb[0].mxu0 %vm422_vm3, %v3550_v36  ;;  %3013 = vmatpush3.bf16.msra.mxu1 %v4011_v17  ;;  %v3369_v17 = vunpack.i.l.bf16 %v4096_v39  ;;  %v3399_v39 = vunpack.i.l.bf16 %v4128_v58 }
 0x114   : > { %759 = vmatpush1.bf16.msra.mxu0 %v747_v45  ;;  %3014 = vmatprep.mubr.msk.bf16.mxu1 %vm3741_vm0, %v3738_v9  ;;  %v4156_v7 = vpop.permute.xlu1 %3412  ;;  %v1212_v45 = vsel %vm1210_vm8, %v3400_v38, %v3405_v8 }
 0x115   : > { %790 = vmatprep.mubr.bf16.mxu0 %v3742_v16  ;;  %3018 = vmatprep.subr.bf16.mxu1 %v3738_v9  ;;  %v4153_v3 = vpop.permute.xlu0 %3407  ;;  %v3415_v49 = vunpack.i.h.bf16 %v4156_v7 }
 0x116   : > { %862 = vmatprep.subr.bf16.mxu0 %v4020_v18  ;;  %v965_v18 = vsel %vm964_vm6, %v3369_v17, %v3374_v48  ;;  %v3410_v11 = vunpack.i.h.bf16 %v4153_v3  ;;  %v3409_v12 = vunpack.i.l.bf16 %v4153_v3  ;;  %v3556_v48 = vld [vmem:[#allocation5 + $0x40] sm:$0xff]  }
 0x117   : > { %v975_v4 = vpack.c.bf16 %v966_v0, %v965_v18 }
 0x118   : > { %v1216_v20 = vsel %vm1210_vm8, %v3405_v8, %v3410_v11  ;;  %v1215_v21 = vsel %vm1210_vm8, %v3404_v10, %v3409_v12  ;;  %v3423_v23 = vpop.permute.xlu1 %3422  ;;  %v1213_v51 = vsel %vm1210_vm8, %v3409_v12, %v3399_v39  ;;  %v1214_v52 = vsel %vm1210_vm8, %v3410_v11, %v3400_v38 }
 0x119   : > { %v3418_v25 = vpop.permute.xlu0 %3417  ;;  %v1222_v28 = vpack.c.bf16 %v1216_v20, %v1215_v21  ;;  %v3425_v31 = vunpack.i.h.bf16 %v3423_v23  ;;  %v3424_v32 = vunpack.i.l.bf16 %v3423_v23  ;;  %v1220_v55 = vpack.c.bf16 %v1214_v52, %v1213_v51  ;;  %v1468_v52 = vld [vmem:[%s4588_s7] sm:$0x7] }
 0x11a   : > { %3015 = vmatmul.mubr.msk.bf16.vlgmr.msra.gmra.mrb[16].mxu1 %vm422_vm3, %v3552_v56  ;;  %v3420_v33 = vunpack.i.h.bf16 %v3418_v25  ;;  %v3419_v34 = vunpack.i.l.bf16 %v3418_v25 }
 0x11b   : > { %3019 = vmatpush3.bf16.msra.mxu1 %v976_v57  ;;  %3020 = vmatprep.mubr.msk.bf16.mxu1 %vm3741_vm0, %v3738_v9  ;;  %v1337_v57 = vsel %vm1333_vm9, %v3425_v31, %v3415_v49 }
 0x11c   : > { %3024 = vmatprep.subr.bf16.mxu1 %v3738_v9  ;;  %v1339_v36 = vsel %vm1333_vm9, %v3420_v33, %v3425_v31  ;;  %v1338_v37 = vsel %vm1333_vm9, %v3419_v34, %v3424_v32  ;;  %v1335_v54 = vsel %vm1333_vm9, %v3415_v49, %v3420_v33 }
 0x11d   : > { %v1345_v41 = vpack.c.bf16 %v1339_v36, %v1338_v37 }
 0x11f   : > { %2900 = vmatmul.mubr.msk.bf16.vlgmr.msra.gmra.mrb[0].mxu0 %vm422_vm3, %v3551_v44  ;;  %v1211_v44 = vsel %vm1210_vm8, %v3399_v39, %v3404_v10 }
 0x120   : > { %863 = vmatpush1.bf16.msra.mxu0 %v4022_v19  ;;  %894 = vmatprep.mubr.bf16.mxu0 %v3742_v16  ;;  %v967_v19 = vsel %vm964_vm6, %v3379_v50, %v3369_v17  ;;  %v1221_v47 = vpack.c.bf16 %v1212_v45, %v1211_v44  ;;  %v3414_v50 = vunpack.i.l.bf16 %v4156_v7 }
 0x121   : > { %985 = vmatprep.subr.bf16.mxu0 %v975_v4  ;;  %v974_v27 = vpack.c.bf16 %v968_v15, %v967_v19 }
 0x122   : > { %3021 = vmatmul.mubr.msk.bf16.vlgmr.msra.gmra.mrb[20].mxu1 %vm422_vm3, %v3553_v5  ;;  %v1334_v53 = vsel %vm1333_vm9, %v3414_v50, %v3419_v34 }
 0x123   : > { %3025 = vmatpush3.bf16.msra.mxu1 %v1099_v6  ;;  %3026 = vmatprep.mubr.msk.bf16.mxu1 %vm3741_vm0, %v3738_v9  ;;  %v1344_v17 = vpack.c.bf16 %v1335_v54, %v1334_v53 }
 0x124   : > { %3030 = vmatprep.subr.bf16.mxu1 %v3738_v9 }
 0x129   : > { %v1454_v54 = vpop.permute.xlu1 %1453 }
 0x12a   : > { %3027 = vmatmul.mubr.msk.bf16.vlgmr.msra.gmra.mrb[24].mxu1 %vm422_vm3, %v3554_v26 }
 0x12b   : > { %2903 = vmatmul.mubr.msk.bf16.vlgmr.msra.gmra.mrb[0].mxu0 %vm422_vm3, %v3552_v56  ;;  %3031 = vmatpush3.bf16.msra.mxu1 %v1222_v28  ;;  %v1336_v56 = vsel %vm1333_vm9, %v3424_v32, %v3414_v50 }
 0x12c   : > { %986 = vmatpush1.bf16.msra.mxu0 %v974_v27  ;;  %3032 = vmatprep.mubr.msk.bf16.mxu1 %vm3741_vm0, %v3738_v9  ;;  %v1343_v58 = vpack.c.bf16 %v1337_v57, %v1336_v56 }
 0x12d   : > { %1017 = vmatprep.mubr.bf16.mxu0 %v3742_v16  ;;  %3036 = vmatprep.subr.bf16.mxu1 %v3738_v9 }
 0x12e   : > { %1108 = vmatprep.subr.bf16.mxu0 %v1098_v35 }
 0x132   : > { %3033 = vmatmul.mubr.msk.bf16.vlgmr.msra.gmra.mrb[28].mxu1 %vm422_vm3, %v3555_v40 }
 0x133   : > { %3037 = vmatpush3.bf16.msra.mxu1 %v1345_v41  ;;  %3038 = vmatprep.mubr.msk.bf16.mxu1 %vm3741_vm0, %v3738_v9 }
 0x134   : > { %3042 = vmatprep.subr.bf16.mxu1 %v3738_v9 }
 0x137   : > { %2906 = vmatmul.mubr.msk.bf16.vlgmr.msra.gmra.mrb[0].mxu0 %vm422_vm3, %v3553_v5 }
 0x138   : > { %1109 = vmatpush1.bf16.msra.mxu0 %v1097_v46  ;;  %1140 = vmatprep.mubr.bf16.mxu0 %v3742_v16  ;;  %v1471_v46 = vshrl.u32 %v378_v22, 7 }
 0x139   : > { %1231 = vmatprep.subr.bf16.mxu0 %v1221_v47 }
 0x13a   : > { %3039 = vmatmul.mubr.msk.bf16.vlgmr.msra.gmra.mrb[32].mxu1 %vm422_vm3, %v3556_v48  ;;  %v1480_v51 = vsub.s32 2, %v1471_v46 }
 0x13b   : > { %3044 = vmatprep.mubr.msk.bf16.mxu1 %vm3741_vm0, %v3738_v9 }
 0x13c   : > { %v1481_v57 = vrot.slane %v1468_v52, %v1480_v51 }
 0x143   : > { %2909 = vmatmul.mubr.msk.bf16.vlgmr.msra.gmra.mrb[0].mxu0 %vm422_vm3, %v3554_v26 }
 0x144   : > { %1232 = vmatpush1.bf16.msra.mxu0 %v1220_v55  ;;  %1263 = vmatprep.mubr.bf16.mxu0 %v3742_v16 }
 0x145   : > { %1354 = vmatprep.subr.bf16.mxu0 %v1344_v17 }
 0x14f   : > { %2912 = vmatmul.mubr.msk.bf16.vlgmr.msra.gmra.mrb[0].mxu0 %vm422_vm3, %v3555_v40 }
 0x150   : > { %1355 = vmatpush1.bf16.msra.mxu0 %v1343_v58  ;;  %1386 = vmatprep.mubr.bf16.mxu0 %v3742_v16 }
 0x15b   : > { %2915 = vmatmul.mubr.msk.bf16.vlgmr.msra.gmra.mrb[0].mxu0 %vm422_vm3, %v3556_v48  ;;  %v1449_v48 = vpop.permute.xlu0 %1448 }
 0x15c   : > { %1578 = vmatprep.mubr.bf16.mxu0 %v3742_v16 }
 0x1cd   : > { %v503_v59 = vpop.f32.mrb[0].mxu1 }
 0x1ce   : > { %v2992_v60 = vpop.f32.mrb[1].mxu1 }
 0x1cf   : > { %v506_v61 = vpop.f32.mrb[2].mxu1 }
 0x1d0   : > { %v2993_v62 = vpop.f32.mrb[3].mxu1 }
 0x1d5   : > { %v595_v63 = vpop.f32.mrb[4].mxu1 }
 0x1d6   : > { %v596_v18 = vadd.f32 %v595_v63, %v503_v59  ;;  %v2998_v0 = vpop.f32.mrb[5].mxu1 }
 0x1d7   : > { %v598_v1 = vpop.f32.mrb[6].mxu1 }
 0x1d8   : > { %v599_v2 = vadd.f32 %v598_v1, %v506_v61  ;;  %v2999_v3 = vpop.f32.mrb[7].mxu1  ;;  %v1476_v1 = vsub.s32 1, %v1471_v46 }
 0x1dd   : > { %v712_v4 = vpop.f32.mrb[8].mxu1 }
 0x1de   : > { %v721_v5 = vadd.f32 %v712_v4, %v596_v18  ;;  %v3004_v6 = vpop.f32.mrb[9].mxu1  ;;  %v1472_v18 = vsub.s32 0, %v1471_v46 }
 0x1df   : > { %v715_v7 = vpop.f32.mrb[10].mxu1 }
 0x1e0   : > { %v724_v8 = vadd.f32 %v715_v7, %v599_v2  ;;  %v3005_v10 = vpop.f32.mrb[11].mxu1  ;;  %v1473_v7 = vrot.slane %v1468_v52, %v1472_v18 }
 0x1e5   : > { %v835_v11 = vpop.f32.mrb[12].mxu1 }
 0x1e6   : > { %v844_v12 = vadd.f32 %v835_v11, %v721_v5  ;;  %v3010_v13 = vpop.f32.mrb[13].mxu1 }
 0x1e7   : > { %v838_v14 = vpop.f32.mrb[14].mxu1 }
 0x1e8   : > { %v847_v19 = vadd.f32 %v838_v14, %v724_v8  ;;  %v3011_v15 = vpop.f32.mrb[15].mxu1 }
 0x1ed   : > { %v939_v20 = vpop.f32.mrb[16].mxu1 }
 0x1ee   : > { %v948_v21 = vadd.f32 %v939_v20, %v844_v12  ;;  %v3016_v23 = vpop.f32.mrb[17].mxu1  ;;  %v1477_v12 = vrot.slane %v1468_v52, %v1476_v1 }
 0x1ef   : > { %v942_v25 = vpop.f32.mrb[18].mxu1 }
 0x1f0   : > { %v951_v26 = vadd.f32 %v942_v25, %v847_v19  ;;  %v3017_v27 = vpop.f32.mrb[19].mxu1 }
 0x1f5   : > { %v1062_v28 = vpop.f32.mrb[20].mxu1 }
 0x1f6   : > { %v1071_v29 = vadd.f32 %v1062_v28, %v948_v21  ;;  %v3022_v30 = vpop.f32.mrb[21].mxu1 }
 0x1f7   : > { %v1065_v31 = vpop.f32.mrb[22].mxu1  ;;  %v2559_v30 = vld [vmem:[%s4585_s4 + $0x8] sm:$0xff] }
 0x1f8   : > { %v1074_v32 = vadd.f32 %v1065_v31, %v951_v26  ;;  %v3023_v33 = vpop.f32.mrb[23].mxu1  ;;  %v2581_v31 = vld [vmem:[%s4587_s6] sm:$0xff] }
 0x1fd   : > { %v1185_v34 = vpop.f32.mrb[24].mxu1 }
 0x1fe   : > { %v1194_v35 = vadd.f32 %v1185_v34, %v1071_v29  ;;  %v3028_v36 = vpop.f32.mrb[25].mxu1  ;;  %v2558_v29 = vld [vmem:[%s4585_s4] sm:$0xff] }
 0x1ff   : > { %v1188_v37 = vpop.f32.mrb[26].mxu1 }
 0x200   : > { %v1197_v38 = vadd.f32 %v1188_v37, %v1074_v32  ;;  %v3029_v39 = vpop.f32.mrb[27].mxu1  ;;  %v2582_v32 = vld [vmem:[%s4587_s6 + $0x8] sm:$0xff] }
 0x205   : > { %v1308_v40 = vpop.f32.mrb[28].mxu1 }
 0x206   : > { %v1317_v41 = vadd.f32 %v1308_v40, %v1194_v35  ;;  %v3034_v42 = vpop.f32.mrb[29].mxu1 }
 0x207   : > { %v1311_v43 = vpop.f32.mrb[30].mxu1 }
 0x208   : > { %v1320_v44 = vadd.f32 %v1311_v43, %v1197_v38  ;;  %v3035_v45 = vpop.f32.mrb[31].mxu1 }
 0x20d   : > { %v1431_v47 = vpop.f32.mrb[32].mxu1 }
 0x20e   : > { %v1440_v49 = vadd.f32 %v1431_v47, %v1317_v41  ;;  %v3040_v50 = vpop.f32.mrb[33].mxu1 }
 0x20f   : > { %v1434_v53 = vpop.f32.mrb[34].mxu1 }
 0x210   : > { %v1458_v55 = vadd.f32 %v1449_v48, %v1440_v49  ;;  %v1443_v17 = vadd.f32 %v1434_v53, %v1320_v44  ;;  %v3041_v56 = vpop.f32.mrb[35].mxu1 }
 0x212   : > { %v1464_v58 = vmax.f32 %v1458_v55, 0.0  ;;  %v1461_v59 = vadd.f32 %v1454_v54, %v1443_v17 }
 0x214   : > { %v1467_v60 = vmax.f32 %v1461_v59, 0.0  ;;  %v4245_v61 = vmul.f32 %v1481_v57, %v1464_v58 }
 0x216   : > { %v4247_v22 = vmul.f32 %v1481_v57, %v1467_v60  ;;  %v3557_v57 = vld [vmem:[#allocation7 + $0x8] sm:$0xff]  }
 0x218   : > { %v3438_v62 = vpack.i.bf16 %v4247_v22, %v4245_v61  ;;  %v1971_v63 = vpack.c.bf16 %v4247_v22, %v4245_v61 }
 0x22e   : > { %v1388_v0 = vpop.f32.mrb[0].mxu0 }
 0x22f   : > { %v1456_v2 = vadd.f32 %v1449_v48, %v1388_v0  ;;  %v1390_v3 = vpop.f32.mrb[1].mxu0 }
 0x230   : > { %v1457_v4 = vadd.f32 %v1449_v48, %v1390_v3  ;;  %v1392_v5 = vpop.f32.mrb[2].mxu0 }
 0x231   : > { %v1462_v6 = vmax.f32 %v1456_v2, 0.0  ;;  %v1459_v8 = vadd.f32 %v1454_v54, %v1392_v5  ;;  %v1394_v10 = vpop.f32.mrb[3].mxu0 }
 0x232   : > { %v1463_v11 = vmax.f32 %v1457_v4, 0.0  ;;  %v1460_v13 = vadd.f32 %v1454_v54, %v1394_v10 }
 0x233   : > { %v1465_v14 = vmax.f32 %v1459_v8, 0.0  ;;  %v4253_v15 = vmul.f32 %v1473_v7, %v1462_v6 }
 0x234   : > { %v1466_v19 = vmax.f32 %v1460_v13, 0.0  ;;  %v4257_v21 = vmul.f32 %v1477_v12, %v1463_v11 }
 0x235   : > { %v4255_v20 = vmul.f32 %v1473_v7, %v1465_v14 }
 0x236   : > { %v4259_v23 = vmul.f32 %v1477_v12, %v1466_v19 }
 0x237   : > { %v3428_v25 = vpack.i.bf16 %v4255_v20, %v4253_v15  ;;  %v1969_v28 = vpack.c.bf16 %v4255_v20, %v4253_v15 }
 0x238   : > { %v3433_v26 = vpack.i.bf16 %v4259_v23, %v4257_v21  ;;  %v1970_v27 = vpack.c.bf16 %v4259_v23, %v4257_v21 }
 0x239   : > { %3429 = vrot.lane.b32.xlu1 %v3428_v25, %s3739_s11 }
 0x23a   : > { %3434 = vrot.lane.b32.xlu0 %v3433_v26, %s3739_s11 }
 0x23d   : > { %3439 = vrot.lane.b32.xlu1 %v3438_v62, %s3739_s11 }
 0x23e   : > { %3444 = vrot.lane.b32.xlu0 %v3428_v25, %s3740_s13 }
 0x241   : > { %3449 = vrot.lane.b32.xlu1 %v3433_v26, %s3740_s13 }
 0x242   : > { %3454 = vrot.lane.b32.xlu0 %v3438_v62, %s3740_s13  ;;  %s2776_s13 = scalar_lea.sflag [#allocation4], %s3969_s18 }
 0x245   : > { %3459 = vrot.lane.b32.xlu1 %v3428_v25, %s3743_s10 }
 0x246   : > { %3464 = vrot.lane.b32.xlu0 %v3433_v26, %s3743_s10 }
 0x249   : > { %3469 = vrot.lane.b32.xlu1 %v3438_v62, %s3743_s10 }
 0x24a   : > { %3474 = vrot.lane.b32.xlu0 %v3428_v25, %s3744_s15 }
 0x24d   : > { %3479 = vrot.lane.b32.xlu1 %v3433_v26, %s3744_s15 }
 0x24e   : > { %3484 = vrot.lane.b32.xlu0 %v3438_v62, %s3744_s15  ;;  %s3749_s15 = smov [#allocation8]  }
 0x251   : > { %3494 = vrot.lane.b32.xlu1 %v3433_v26, %s3745_s19 }
 0x252   : > { %3489 = vrot.lane.b32.xlu0 %v3438_v62, %s3745_s19 }
 0x255   : > { %3499 = vrot.lane.b32.xlu1 %v3428_v25, %s3745_s19 }
 0x256   : > { %3509 = vrot.lane.b32.xlu0 %v3433_v26, %s3746_s16 }
 0x259   : > { %3504 = vrot.lane.b32.xlu1 %v3438_v62, %s3746_s16 }
 0x25a   : > { %3514 = vrot.lane.b32.xlu0 %v3428_v25, %s3746_s16  ;;  %s3663_s16 = sshll.u32 %s3749_s15, 4  ;;  %s3664_s16 = int_to_ptr.vmem [resolvable:$false] %s3663_s16 }
 0x25b   : > { %s3665_s21 = scalar_lea.vmem %s3664_s16, 1536 }
 0x25d   : > { %3524 = vrot.lane.b32.xlu1 %v3433_v26, %s3747_s25 }
 0x25e   : > { %3519 = vrot.lane.b32.xlu0 %v3438_v62, %s3747_s25 }
 0x261   : > { %3529 = vrot.lane.b32.xlu1 %v3428_v25, %s3747_s25 }
 0x262   : > { %3539 = vrot.lane.b32.xlu0 %v3433_v26, %s3748_s17 }
 0x265   : > { %3534 = vrot.lane.b32.xlu1 %v3438_v62, %s3748_s17 }
 0x266   : > { %3544 = vrot.lane.b32.xlu0 %v3428_v25, %s3748_s17 }
 0x269   : > { %2562 = vperm.xlu1 %3427, %v2558_v29  }
 0x26a   : > { %2567 = vperm.xlu0 %3426, %v2559_v30  }
 0x26d   : > { %2585 = vperm.xlu1 %3427, %v2581_v31  }
 0x26e   : > { %2590 = vperm.xlu0 %3426, %v2582_v32  }
 0x2ab   : > { %v3430_v33 = vpop.permute.xlu1 %3429 }
 0x2ac   : > { %v3432_v34 = vunpack.i.h.bf16 %v3430_v33  ;;  %v3431_v35 = vunpack.i.l.bf16 %v3430_v33  ;;  %v3435_v36 = vpop.permute.xlu0 %3434 }
 0x2ad   : > { %v3437_v37 = vunpack.i.h.bf16 %v3435_v36  ;;  %v3436_v38 = vunpack.i.l.bf16 %v3435_v36 }
 0x2af   : > { %v3440_v39 = vpop.permute.xlu1 %3439  ;;  %v1528_v40 = vsel %vm404_vm1, %v3431_v35, %v3436_v38  ;;  %v1529_v41 = vsel %vm404_vm1, %v3432_v34, %v3437_v37 }
 0x2b0   : > { %v3442_v42 = vunpack.i.h.bf16 %v3440_v39  ;;  %v3441_v43 = vunpack.i.l.bf16 %v3440_v39  ;;  %v3445_v44 = vpop.permute.xlu0 %3444  ;;  %v1536_v45 = vpack.c.bf16 %v1529_v41, %v1528_v40  ;;  %v3558_v40 = vld [vmem:[#allocation7] sm:$0xff]  }
 0x2b1   : > { %v3447_v53 = vunpack.i.h.bf16 %v3445_v44  ;;  %v3446_v54 = vunpack.i.l.bf16 %v3445_v44 }
 0x2b2   : > { %v1526_v46 = vsel %vm404_vm1, %v3436_v38, %v3441_v43  ;;  %v1527_v47 = vsel %vm404_vm1, %v3437_v37, %v3442_v42  ;;  %v1530_v48 = vsel %vm404_vm1, %v3441_v43, %v3431_v35  ;;  %v1531_v49 = vsel %vm404_vm1, %v3442_v42, %v3432_v34  ;;  %1546 = vmatprep.subr.bf16.mxu0 %v1536_v45 }
 0x2b3   : > { %v1535_v50 = vpack.c.bf16 %v1531_v49, %v1530_v48  ;;  %v1537_v51 = vpack.c.bf16 %v1527_v47, %v1526_v46  ;;  %v3450_v52 = vpop.permute.xlu1 %3449 }
 0x2b4   : > { %v3452_v55 = vunpack.i.h.bf16 %v3450_v52  ;;  %v3451_v17 = vunpack.i.l.bf16 %v3450_v52  ;;  %v3455_v56 = vpop.permute.xlu0 %3454 }
 0x2b5   : > { %v3457_v58 = vunpack.i.h.bf16 %v3455_v56  ;;  %v3456_v59 = vunpack.i.l.bf16 %v3455_v56  ;;  %1547 = vmatpush1.bf16.msra.mxu0 %v1535_v50  ;;  %3043 = vmatpush3.bf16.msra.mxu1 %v1537_v51 }
 0x2b6   : > { %v1505_v60 = vsel %vm380_vm2, %v3446_v54, %v3451_v17  ;;  %v1506_v62 = vsel %vm380_vm2, %v3447_v53, %v3452_v55  ;;  %3048 = vmatprep.subr.bf16.mxu1 %v3738_v9 }
 0x2b7   : > { %v1504_v18 = vsel %vm380_vm2, %v3452_v55, %v3457_v58  ;;  %v1503_v0 = vsel %vm380_vm2, %v3451_v17, %v3456_v59  ;;  %v1507_v1 = vsel %vm380_vm2, %v3456_v59, %v3446_v54  ;;  %v1508_v2 = vsel %vm380_vm2, %v3457_v58, %v3447_v53  ;;  %v3460_v3 = vpop.permute.xlu1 %3459  ;;  %v3559_v53 = vld [vmem:[#allocation7 + $0x10] sm:$0xff]  }
 0x2b8   : > { %v1511_v4 = vpack.c.bf16 %v1508_v2, %v1507_v1  ;;  %v1513_v5 = vpack.c.bf16 %v1504_v18, %v1503_v0  ;;  %v3462_v6 = vunpack.i.h.bf16 %v3460_v3  ;;  %v3461_v7 = vunpack.i.l.bf16 %v3460_v3  ;;  %v3465_v8 = vpop.permute.xlu0 %3464  ;;  %2918 = vmatmul.mubr.msk.bf16.vlgmr.msra.gmra.mrb[4].mxu0 %vm422_vm3, %v3557_v57  ;;  %3045 = vmatmul.mubr.msk.bf16.vlgmr.msra.gmra.mrb[36].mxu1 %vm422_vm3, %v3557_v57  ;;  %v3560_v18 = vld [vmem:[#allocation7 + $0x18] sm:$0xff]  }
 0x2b9   : > { %v3467_v10 = vunpack.i.h.bf16 %v3465_v8  ;;  %v3466_v11 = vunpack.i.l.bf16 %v3465_v8  ;;  %v1512_v12 = vpack.c.bf16 %v1506_v62, %v1505_v60  ;;  %1670 = vmatprep.mubr.bf16.mxu0 %v3742_v16  ;;  %3050 = vmatprep.mubr.msk.bf16.mxu1 %vm3741_vm0, %v3738_v9 }
 0x2ba   : > { %3049 = vmatpush3.bf16.msra.mxu1 %v1513_v5 }
 0x2bb   : > { %1638 = vmatprep.subr.bf16.mxu0 %v1512_v12  ;;  %v3470_v13 = vpop.permute.xlu1 %3469  ;;  %v1736_v14 = vsel %vm614_vm4, %v3461_v7, %v3466_v11  ;;  %v1737_v19 = vsel %vm614_vm4, %v3462_v6, %v3467_v10  ;;  %3054 = vmatprep.subr.bf16.mxu1 %v3738_v9 }
 0x2bc   : > { %1639 = vmatpush1.bf16.msra.mxu0 %v1511_v4  ;;  %v3472_v25 = vunpack.i.h.bf16 %v3470_v13  ;;  %v3471_v26 = vunpack.i.l.bf16 %v3470_v13  ;;  %v3475_v29 = vpop.permute.xlu0 %3474  ;;  %v1744_v30 = vpack.c.bf16 %v1737_v19, %v1736_v14 }
 0x2bd   : > { %v3477_v33 = vunpack.i.h.bf16 %v3475_v29  ;;  %v3476_v34 = vunpack.i.l.bf16 %v3475_v29 }
 0x2be   : > { %1754 = vmatprep.subr.bf16.mxu0 %v1744_v30  ;;  %v1734_v31 = vsel %vm614_vm4, %v3466_v11, %v3471_v26  ;;  %v1735_v32 = vsel %vm614_vm4, %v3467_v10, %v3472_v25  ;;  %v1738_v36 = vsel %vm614_vm4, %v3471_v26, %v3461_v7  ;;  %v1739_v37 = vsel %vm614_vm4, %v3472_v25, %v3462_v6  ;;  %v3561_v7 = vld [vmem:[#allocation7 + $0x20] sm:$0xff]  }
 0x2bf   : > { %v3480_v35 = vpop.permute.xlu1 %3479  ;;  %v1743_v43 = vpack.c.bf16 %v1739_v37, %v1738_v36  ;;  %v1745_v44 = vpack.c.bf16 %v1735_v32, %v1734_v31 }
 0x2c0   : > { %v3482_v38 = vunpack.i.h.bf16 %v3480_v35  ;;  %v3481_v39 = vunpack.i.l.bf16 %v3480_v35  ;;  %v3485_v45 = vpop.permute.xlu0 %3484 }
 0x2c1   : > { %v3487_v47 = vunpack.i.h.bf16 %v3485_v45  ;;  %v3486_v48 = vunpack.i.l.bf16 %v3485_v45 }
 0x2c2   : > { %v1858_v41 = vsel %vm737_vm5, %v3476_v34, %v3481_v39  ;;  %v1859_v42 = vsel %vm737_vm5, %v3477_v33, %v3482_v38 }
 0x2c3   : > { %v1866_v46 = vpack.c.bf16 %v1859_v42, %v1858_v41  ;;  %v1857_v49 = vsel %vm737_vm5, %v3482_v38, %v3487_v47  ;;  %v1856_v50 = vsel %vm737_vm5, %v3481_v39, %v3486_v48  ;;  %v1860_v51 = vsel %vm737_vm5, %v3486_v48, %v3476_v34  ;;  %v3495_v17 = vpop.permute.xlu1 %3494  ;;  %v3562_v38 = vld [vmem:[#allocation7 + $0x28] sm:$0xff]  }
 0x2c4   : > { %2921 = vmatmul.mubr.msk.bf16.vlgmr.msra.gmra.mrb[4].mxu0 %vm422_vm3, %v3558_v40  ;;  %3051 = vmatmul.mubr.msk.bf16.vlgmr.msra.gmra.mrb[36].mxu1 %vm422_vm3, %v3558_v40  ;;  %v1861_v52 = vsel %vm737_vm5, %v3487_v47, %v3477_v33  ;;  %v1867_v55 = vpack.c.bf16 %v1857_v49, %v1856_v50  ;;  %v3490_v56 = vpop.permute.xlu0 %3489  ;;  %v3497_v57 = vunpack.i.h.bf16 %v3495_v17  ;;  %v3496_v58 = vunpack.i.l.bf16 %v3495_v17  ;;  %v3563_v17 = vld [vmem:[#allocation7 + $0x30] sm:$0xff]  }
 0x2c5   : > { %1755 = vmatpush1.bf16.msra.mxu0 %v1743_v43  ;;  %3055 = vmatpush3.bf16.msra.mxu1 %v1745_v44  ;;  %v1865_v54 = vpack.c.bf16 %v1861_v52, %v1860_v51  ;;  %v3492_v59 = vunpack.i.h.bf16 %v3490_v56  ;;  %v3491_v60 = vunpack.i.l.bf16 %v3490_v56 }
 0x2c6   : > { %1786 = vmatprep.mubr.bf16.mxu0 %v3742_v16  ;;  %3056 = vmatprep.mubr.msk.bf16.mxu1 %vm3741_vm0, %v3738_v9 }
 0x2c7   : > { %1876 = vmatprep.subr.bf16.mxu0 %v1866_v46  ;;  %3060 = vmatprep.subr.bf16.mxu1 %v3738_v9  ;;  %v3500_v62 = vpop.permute.xlu1 %3499  ;;  %v2082_v0 = vsel %vm964_vm6, %v3496_v58, %v3491_v60  ;;  %v2083_v21 = vsel %vm964_vm6, %v3497_v57, %v3492_v59 }
 0x2c8   : > { %v2092_v23 = vpack.c.bf16 %v2083_v21, %v2082_v0  ;;  %v3502_v2 = vunpack.i.h.bf16 %v3500_v62  ;;  %v3501_v3 = vunpack.i.l.bf16 %v3500_v62 }
 0x2ca   : > { %v2084_v61 = vsel %vm964_vm6, %v3501_v3, %v3496_v58  ;;  %v2085_v22 = vsel %vm964_vm6, %v3502_v2, %v3497_v57 }
 0x2cb   : > { %v3505_v1 = vpop.permute.xlu1 %3504  ;;  %v2091_v11 = vpack.c.bf16 %v2085_v22, %v2084_v61  ;;  %v3565_v61 = vld [vmem:[#allocation7 + $0x40] sm:$0xff]   ;;  %v3569_v22 = vld [vmem:[%s3975_s24 + $0x10] sm:$0xff] }
 0x2cc   : > { %v3507_v4 = vunpack.i.h.bf16 %v3505_v1  ;;  %v3506_v5 = vunpack.i.l.bf16 %v3505_v1 }
 0x2cf   : > { %v3525_v14 = vpop.permute.xlu1 %3524 }
 0x2d0   : > { %2924 = vmatmul.mubr.msk.bf16.vlgmr.msra.gmra.mrb[4].mxu0 %vm422_vm3, %v3559_v53  ;;  %3057 = vmatmul.mubr.msk.bf16.vlgmr.msra.gmra.mrb[36].mxu1 %vm422_vm3, %v3559_v53  ;;  %v3527_v29 = vunpack.i.h.bf16 %v3525_v14  ;;  %v3526_v30 = vunpack.i.l.bf16 %v3525_v14 }
 0x2d1   : > { %1877 = vmatpush1.bf16.msra.mxu0 %v1865_v54  ;;  %3061 = vmatpush3.bf16.msra.mxu1 %v1867_v55 }
 0x2d2   : > { %1980 = vmatprep.subr.bf16.mxu0 %v1970_v27  ;;  %1908 = vmatprep.mubr.bf16.mxu0 %v3742_v16  ;;  %v3510_v27 = vpop.permute.xlu0 %3509 }
 0x2d3   : > { %3062 = vmatprep.mubr.msk.bf16.mxu1 %vm3741_vm0, %v3738_v9  ;;  %3066 = vmatprep.subr.bf16.mxu1 %v3738_v9  ;;  %v3512_v15 = vunpack.i.h.bf16 %v3510_v27  ;;  %v3511_v20 = vunpack.i.l.bf16 %v3510_v27  ;;  %v3530_v37 = vpop.permute.xlu1 %3529 }
 0x2d4   : > { %v3532_v45 = vunpack.i.h.bf16 %v3530_v37  ;;  %v3531_v46 = vunpack.i.l.bf16 %v3530_v37 }
 0x2d5   : > { %v2204_v8 = vsel %vm1087_vm7, %v3511_v20, %v3506_v5  ;;  %v2205_v10 = vsel %vm1087_vm7, %v3512_v15, %v3507_v4 }
 0x2d6   : > { %v3515_v6 = vpop.permute.xlu0 %3514  ;;  %v2214_v13 = vpack.c.bf16 %v2205_v10, %v2204_v8  ;;  %v2328_v52 = vsel %vm1210_vm8, %v3531_v46, %v3526_v30  ;;  %v2329_v53 = vsel %vm1210_vm8, %v3532_v45, %v3527_v29  ;;  %v3566_v10 = vld [vmem:[%s4586_s5] sm:$0xff]  }
 0x2d7   : > { %v3517_v25 = vunpack.i.h.bf16 %v3515_v6  ;;  %v3516_v26 = vunpack.i.l.bf16 %v3515_v6  ;;  %v3535_v44 = vpop.permute.xlu1 %3534  ;;  %v2335_v58 = vpack.c.bf16 %v2329_v53, %v2328_v52  ;;  %v3571_v6 = vld [vmem:[%s3975_s24] sm:$0xff] }
 0x2d8   : > { %v3537_v48 = vunpack.i.h.bf16 %v3535_v44  ;;  %v3536_v49 = vunpack.i.l.bf16 %v3535_v44 }
 0x2d9   : > { %v2209_v33 = vsel %vm1087_vm7, %v3507_v4, %v3517_v25  ;;  %v2206_v34 = vsel %vm1087_vm7, %v3516_v26, %v3511_v20  ;;  %v2207_v35 = vsel %vm1087_vm7, %v3517_v25, %v3512_v15  ;;  %v2208_v36 = vsel %vm1087_vm7, %v3506_v5, %v3516_v26  ;;  %v3567_v5 = vld [vmem:[%s3975_s24 + $0x8] sm:$0xff]  ;;  %v3568_v15 = vld [vmem:[%s3975_s24 + $0x20] sm:$0xff] }
 0x2da   : > { %v3520_v19 = vpop.permute.xlu0 %3519  ;;  %v2213_v41 = vpack.c.bf16 %v2207_v35, %v2206_v34  ;;  %v2215_v42 = vpack.c.bf16 %v2209_v33, %v2208_v36  ;;  %v2579_v20 = vpack.c.bf16 %v3568_v15, %v3567_v5 }
 0x2db   : > { %v3522_v31 = vunpack.i.h.bf16 %v3520_v19  ;;  %v3521_v32 = vunpack.i.l.bf16 %v3520_v19 }
 0x2dc   : > { %2927 = vmatmul.mubr.msk.bf16.vlgmr.msra.gmra.mrb[4].mxu0 %vm422_vm3, %v3560_v18  ;;  %3063 = vmatmul.mubr.msk.bf16.vlgmr.msra.gmra.mrb[36].mxu1 %vm422_vm3, %v3560_v18 }
 0x2dd   : > { %1981 = vmatpush1.bf16.msra.mxu0 %v1969_v28  ;;  %3067 = vmatpush3.bf16.msra.mxu1 %v1971_v63  ;;  %v2086_v63 = vsel %vm964_vm6, %v3491_v60, %v3501_v3  ;;  %v2087_v28 = vsel %vm964_vm6, %v3492_v59, %v3502_v2  ;;  %v2326_v39 = vsel %vm1210_vm8, %v3526_v30, %v3521_v32  ;;  %v3564_v2 = vld [vmem:[#allocation7 + $0x38] sm:$0xff]  }
 0x2de   : > { %2102 = vmatprep.subr.bf16.mxu0 %v2092_v23  ;;  %2012 = vmatprep.mubr.bf16.mxu0 %v3742_v16  ;;  %v2093_v12 = vpack.c.bf16 %v2087_v28, %v2086_v63  ;;  %v2327_v40 = vsel %vm1210_vm8, %v3527_v29, %v3522_v31  ;;  %v3540_v47 = vpop.permute.xlu0 %3539  ;;  %v2330_v54 = vsel %vm1210_vm8, %v3521_v32, %v3531_v46  ;;  %v3570_v63 = vld [vmem:[%s3975_s24 + $0x28] sm:$0xff] }
 0x2df   : > { %3068 = vmatprep.mubr.msk.bf16.mxu1 %vm3741_vm0, %v3738_v9  ;;  %3072 = vmatprep.subr.bf16.mxu1 %v3738_v9  ;;  %v2336_v43 = vpack.c.bf16 %v2327_v40, %v2326_v39  ;;  %v3542_v50 = vunpack.i.h.bf16 %v3540_v47  ;;  %v3541_v51 = vunpack.i.l.bf16 %v3540_v47  ;;  %v2331_v55 = vsel %vm1210_vm8, %v3522_v31, %v3532_v45 }
 0x2e0   : > { %v2337_v59 = vpack.c.bf16 %v2331_v55, %v2330_v54  ;;  %v2580_v28 = vpack.c.bf16 %v3570_v63, %v3569_v22 }
 0x2e1   : > { %v2448_v56 = vsel %vm1333_vm9, %v3541_v51, %v3536_v49  ;;  %v2449_v57 = vsel %vm1333_vm9, %v3542_v50, %v3537_v48 }
 0x2e2   : > { %v2458_v60 = vpack.c.bf16 %v2449_v57, %v2448_v56  ;;  %v3545_v62 = vpop.permute.xlu0 %3544 }
 0x2e3   : > { %v3547_v18 = vunpack.i.h.bf16 %v3545_v62  ;;  %v3546_v0 = vunpack.i.l.bf16 %v3545_v62 }
 0x2e5   : > { %v2453_v21 = vsel %vm1333_vm9, %v3537_v48, %v3547_v18  ;;  %v2450_v23 = vsel %vm1333_vm9, %v3546_v0, %v3541_v51  ;;  %v2451_v27 = vsel %vm1333_vm9, %v3547_v18, %v3542_v50  ;;  %v2452_v1 = vsel %vm1333_vm9, %v3536_v49, %v3546_v0 }
 0x2e6   : > { %v2457_v3 = vpack.c.bf16 %v2451_v27, %v2450_v23  ;;  %v2459_v4 = vpack.c.bf16 %v2453_v21, %v2452_v1 }
 0x2e8   : > { %2930 = vmatmul.mubr.msk.bf16.vlgmr.msra.gmra.mrb[4].mxu0 %vm422_vm3, %v3561_v7  ;;  %3069 = vmatmul.mubr.msk.bf16.vlgmr.msra.gmra.mrb[36].mxu1 %vm422_vm3, %v3561_v7  ;;  %v3572_v7 = vld [vmem:[%s3975_s24 + $0x18] sm:$0xff]  ;;  %s352_s24 = scalar_lea.vmem [#allocation8], %s3220_s14 }
 0x2e9   : > { %2103 = vmatpush1.bf16.msra.mxu0 %v2091_v11  ;;  %3073 = vmatpush3.bf16.msra.mxu1 %v2093_v12  ;;  %v2578_v8 = vpack.c.bf16 %v3572_v7, %v3571_v6  ;;  %v2563_v11 = vpop.permute.xlu1 %2562  ;;  %v2568_v12 = vpop.permute.xlu0 %2567 }
 0x2ea   : > { %2224 = vmatprep.subr.bf16.mxu0 %v2214_v13  ;;  %2134 = vmatprep.mubr.bf16.mxu0 %v3742_v16 }
 0x2eb   : > { %3074 = vmatprep.mubr.msk.bf16.mxu1 %vm3741_vm0, %v3738_v9  ;;  %3078 = vmatprep.subr.bf16.mxu1 %v3738_v9 }
 0x2ed   : > { %v2586_v13 = vpop.permute.xlu1 %2585  ;;  %v2591_v14 = vpop.permute.xlu0 %2590 }
 0x2ee   : > { %v3102_v19 = vadd.f32 %v2586_v13, %v2563_v11  ;;  %v3106_v29 = vadd.f32 %v2591_v14, %v2568_v12 }
 0x2f4   : > { %2933 = vmatmul.mubr.msk.bf16.vlgmr.msra.gmra.mrb[4].mxu0 %vm422_vm3, %v3562_v38  ;;  %3075 = vmatmul.mubr.msk.bf16.vlgmr.msra.gmra.mrb[36].mxu1 %vm422_vm3, %v3562_v38 }
 0x2f5   : > { %2225 = vmatpush1.bf16.msra.mxu0 %v2213_v41  ;;  %3079 = vmatpush3.bf16.msra.mxu1 %v2215_v42 }
 0x2f6   : > { %2346 = vmatprep.subr.bf16.mxu0 %v2336_v43  ;;  %2256 = vmatprep.mubr.bf16.mxu0 %v3742_v16 }
 0x2f7   : > { %3080 = vmatprep.mubr.msk.bf16.mxu1 %vm3741_vm0, %v3738_v9  ;;  %3084 = vmatprep.subr.bf16.mxu1 %v3738_v9 }
 0x300   : > { %2936 = vmatmul.mubr.msk.bf16.vlgmr.msra.gmra.mrb[4].mxu0 %vm422_vm3, %v3563_v17  ;;  %3081 = vmatmul.mubr.msk.bf16.vlgmr.msra.gmra.mrb[36].mxu1 %vm422_vm3, %v3563_v17 }
 0x301   : > { %2347 = vmatpush1.bf16.msra.mxu0 %v2335_v58  ;;  %3085 = vmatpush3.bf16.msra.mxu1 %v2337_v59 }
 0x302   : > { %2468 = vmatprep.subr.bf16.mxu0 %v2458_v60  ;;  %2378 = vmatprep.mubr.bf16.mxu0 %v3742_v16 }
 0x303   : > { %3086 = vmatprep.mubr.msk.bf16.mxu1 %vm3741_vm0, %v3738_v9  ;;  %3090 = vmatprep.subr.bf16.mxu1 %v3738_v9 }
 0x30c   : > { %2939 = vmatmul.mubr.msk.bf16.vlgmr.msra.gmra.mrb[4].mxu0 %vm422_vm3, %v3564_v2  ;;  %3087 = vmatmul.mubr.msk.bf16.vlgmr.msra.gmra.mrb[36].mxu1 %vm422_vm3, %v3564_v2 }
 0x30d   : > { %2469 = vmatpush1.bf16.msra.mxu0 %v2457_v3  ;;  %3091 = vmatpush3.bf16.msra.mxu1 %v2459_v4 }
 0x30e   : > { %2500 = vmatprep.mubr.bf16.mxu0 %v3742_v16  ;;  %3092 = vmatprep.mubr.msk.bf16.mxu1 %vm3741_vm0, %v3738_v9 }
 0x30f   : > { %3096 = vmatprep.subr.bf16.mxu1 %v3738_v9  ;;  %2601 = vmatprep.subr.bf16.mxu0 %v2579_v20 }
 0x318   : > { %2942 = vmatmul.mubr.msk.bf16.vlgmr.msra.gmra.mrb[4].mxu0 %vm422_vm3, %v3565_v61  ;;  %3093 = vmatmul.mubr.msk.bf16.vlgmr.msra.gmra.mrb[36].mxu1 %vm422_vm3, %v3565_v61 }
 0x319   : > { %3097 = vmatpush3.bf16.msra.mxu1 %v2580_v28  ;;  %2602 = vmatpush1.bf16.msra.mxu0 %v2578_v8 }
 0x31a   : > { %2633 = vmatprep.mubr.bf16.mxu0 %v3742_v16  ;;  %3098 = vmatprep.mubr.msk.bf16.mxu1 %vm3741_vm0, %v3738_v9 }
 0x324   : > { %2945 = vmatmul.mubr.msk.bf16.vlgmr.msra.gmra.mrb[4].mxu0 %vm422_vm3, %v3566_v10  ;;  %3099 = vmatmul.mubr.msk.bf16.vlgmr.msra.gmra.mrb[36].mxu1 %vm422_vm3, %v3566_v10 }
 0x3f7   : > { %v2635_v25 = vpop.f32.mrb[4].mxu0  ;;  %v2678_v26 = vpop.f32.mrb[36].mxu1 }
 0x3f8   : > { %v3111_v16 = vadd.f32 %v3102_v19, %v2678_v26  ;;  %v2637_v30 = vpop.f32.mrb[5].mxu0  ;;  %v3100_v31 = vpop.f32.mrb[37].mxu1  ;;  %v3103_v36 = vadd.f32 %v3102_v19, %v2635_v25 }
 0x3f9   : > { %v2639_v9 = vpop.f32.mrb[6].mxu0  ;;  %v2681_v32 = vpop.f32.mrb[38].mxu1  ;;  %v3105_v38 = vadd.f32 %v3102_v19, %v2637_v30 }
 0x3fa   : > { %v3113_v33 = vadd.f32 %v3106_v29, %v2681_v32  ;;  %2699 = vrot.lane.b32.xlu1 %v3111_v16, %s3745_s19  ;;  %v2641_v34 = vpop.f32.mrb[7].mxu0  ;;  %v3101_v35 = vpop.f32.mrb[39].mxu1  ;;  %v3107_v37 = vadd.f32 %v3106_v29, %v2639_v9 }
 0x3fb   : > { %v3109_v39 = vadd.f32 %v3106_v29, %v2641_v34 }
 0x3fc   : > { %2701 = vrot.lane.b32.xlu0 %v3113_v33, %s3745_s19 }
 0x3fe   : > { %2717 = vrot.lane.b32.xlu1 %v3111_v16, %s3747_s25 }
 0x400   : > { %2719 = vrot.lane.b32.xlu0 %v3113_v33, %s3747_s25 }
 0x402   : > { %2691 = vrot.lane.b32.xlu1 %v3103_v36, %s3745_s19 }
 0x404   : > { %2693 = vrot.lane.b32.xlu0 %v3107_v37, %s3745_s19 }
 0x406   : > { %2709 = vrot.lane.b32.xlu1 %v3103_v36, %s3747_s25 }
 0x408   : > { %2711 = vrot.lane.b32.xlu0 %v3107_v37, %s3747_s25 }
 0x40a   : > { %2727 = vrot.lane.b32.xlu1 %v3103_v36, %s3748_s17 }
 0x40c   : > { %2729 = vrot.lane.b32.xlu0 %v3107_v37, %s3748_s17 }
 0x40e   : > { %2695 = vrot.lane.b32.xlu1 %v3105_v38, %s3745_s19 }
 0x410   : > { %2697 = vrot.lane.b32.xlu0 %v3109_v39, %s3745_s19  ;;  %s2789_s19 = sshll.u32 %s352_s24, 4  ;;  %s4532_s19 = int_to_ptr.vmem [resolvable:$true] %s2789_s19 }
 0x411   : > { %s3659_s10 = scalar_lea.vmem %s4532_s19, 768  ;;  %p3666_p7 = scmp.lt.s32.totalorder %s4532_s19, %s3664_s16 }
 0x412   : > { %2713 = vrot.lane.b32.xlu1 %v3105_v38, %s3747_s25  ;;  %p3660_p11 = scmp.ne.s32.totalorder %s4532_s19, %s3659_s10  ;;  %p3667_p9 = scmp.lt.s32.totalorder %s3665_s21, %s3659_s10 }
 0x414   : > { %2715 = vrot.lane.b32.xlu0 %v3109_v39, %s3747_s25  ;;  %s3221_s25 = smul.u32 768, %s3818_s9  ;;  %p3661_p1 = pnand %p3660_p11, %p4607_p0 }
 0x415   : > { %p3668_p12 = por %p3667_p9, %p3666_p7 }
 0x416   : > { %2731 = vrot.lane.b32.xlu1 %v3105_v38, %s3748_s17  ;;  %p3662_p3 = pneg %p3661_p1 }
 0x418   : > { %2733 = vrot.lane.b32.xlu0 %v3109_v39, %s3748_s17  ;;  %p3669_p2 = pnand %p3668_p12, %p3662_p3 }
 0x41a   : > { %2735 = vrot.lane.b32.xlu1 %v3111_v16, %s3748_s17 }
 0x41c   : > { %2737 = vrot.lane.b32.xlu0 %v3113_v33, %s3748_s17  ;;  %s4537_s17 = scalar_lea.hbm %s4589_s8, %s3221_s25 }
 0x46c   : > { %v2700_v40 = vpop.permute.xlu1 %2699 }
 0x46e   : > { %v2702_v41 = vpop.permute.xlu0 %2701 }
 0x470   : > { %v2718_v42 = vpop.permute.xlu1 %2717 }
 0x472   : > { %v2720_v43 = vpop.permute.xlu0 %2719 }
 0x474   : > { %v2692_v44 = vpop.permute.xlu1 %2691 }
 0x475   : > { %v2707_v17 = vsel %vm964_vm6, %v2700_v40, %v2692_v44 }
 0x476   : > { %v2694_v45 = vpop.permute.xlu0 %2693  ;;  %v2747_v23 = vadd.f32 %v3111_v16, %v2707_v17 }
 0x477   : > { %v2708_v60 = vsel %vm964_vm6, %v2702_v41, %v2694_v45 }
 0x478   : > { %v2710_v46 = vpop.permute.xlu1 %2709  ;;  %v2750_v61 = vadd.f32 %v3113_v33, %v2708_v60 }
 0x479   : > { %v2725_v62 = vsel %vm1210_vm8, %v2718_v42, %v2710_v46 }
 0x47a   : > { %v2712_v47 = vpop.permute.xlu0 %2711  ;;  %v2753_v22 = vadd.f32 %v2747_v23, %v2725_v62 }
 0x47b   : > { %v2726_v3 = vsel %vm1210_vm8, %v2720_v43, %v2712_v47 }
 0x47c   : > { %v2728_v48 = vpop.permute.xlu1 %2727  ;;  %v2756_v12 = vadd.f32 %v2750_v61, %v2726_v3 }
 0x47e   : > { %v2730_v49 = vpop.permute.xlu0 %2729 }
 0x480   : > { %v2696_v50 = vpop.permute.xlu1 %2695 }
 0x481   : > { %v2705_v52 = vsel %vm964_vm6, %v2692_v44, %v2696_v50  ;;  %v2703_v58 = vsel %vm964_vm6, %v2696_v50, %v2700_v40 }
 0x482   : > { %v2698_v51 = vpop.permute.xlu0 %2697  ;;  %v2745_v56 = vadd.f32 %v3103_v36, %v2705_v52  ;;  %v2746_v4 = vadd.f32 %v3105_v38, %v2703_v58 }
 0x483   : > { %v2706_v54 = vsel %vm964_vm6, %v2694_v45, %v2698_v51  ;;  %v2704_v27 = vsel %vm964_vm6, %v2698_v51, %v2702_v41 }
 0x484   : > { %v2714_v53 = vpop.permute.xlu1 %2713  ;;  %v2748_v18 = vadd.f32 %v3107_v37, %v2706_v54  ;;  %v2749_v6 = vadd.f32 %v3109_v39, %v2704_v27 }
 0x485   : > { %v2723_v55 = vsel %vm1210_vm8, %v2710_v46, %v2714_v53  ;;  %v2721_v1 = vsel %vm1210_vm8, %v2714_v53, %v2718_v42 }
 0x486   : > { %v2716_v57 = vpop.permute.xlu0 %2715  ;;  %v2751_v0 = vadd.f32 %v2745_v56, %v2723_v55  ;;  %v2752_v7 = vadd.f32 %v2746_v4, %v2721_v1 }
 0x487   : > { %v2724_v59 = vsel %vm1210_vm8, %v2712_v47, %v2716_v57  ;;  %v2722_v63 = vsel %vm1210_vm8, %v2716_v57, %v2720_v43 }
 0x488   : > { %v2732_v21 = vpop.permute.xlu1 %2731  ;;  %v2754_v5 = vadd.f32 %v2748_v18, %v2724_v59  ;;  %v2755_v19 = vadd.f32 %v2749_v6, %v2722_v63 }
 0x489   : > { %v2741_v2 = vsel %vm1333_vm9, %v2728_v48, %v2732_v21 }
 0x48a   : > { %v2757_v15 = vadd.f32 %v2751_v0, %v2741_v2  ;;  %v2734_v20 = vpop.permute.xlu0 %2733 }
 0x48b   : > { %v2742_v28 = vsel %vm1333_vm9, %v2730_v49, %v2734_v20 }
 0x48c   : > { %v2763_v8 = vmul.f32 0.25, %v2757_v15  ;;  %v2760_v10 = vadd.f32 %v2754_v5, %v2742_v28  ;;  %v2736_v11 = vpop.permute.xlu1 %2735 }
 0x48d   : > { %v2739_v13 = vsel %vm1333_vm9, %v2732_v21, %v2736_v11  ;;  %v2743_v14 = vsel %vm1333_vm9, %v2736_v11, %v2728_v48 }
 0x48e   : > { %2769 = vst [vmem:[%s352_s24] sm:$0xff] %v2763_v8  ;;  %v2766_v25 = vmul.f32 0.25, %v2760_v10  ;;  %v2758_v26 = vadd.f32 %v2752_v7, %v2739_v13  ;;  %v2759_v29 = vadd.f32 %v2753_v22, %v2743_v14  ;;  %v2738_v16 = vpop.permute.xlu0 %2737 }
 0x48f   : > { %v2740_v30 = vsel %vm1333_vm9, %v2734_v20, %v2738_v16  ;;  %v2744_v31 = vsel %vm1333_vm9, %v2738_v16, %v2730_v49 }
 0x490   : > { %2772 = vst [vmem:[%s352_s24 + $0x18] sm:$0xff] %v2766_v25  ;;  %v2764_v9 = vmul.f32 0.25, %v2758_v26  ;;  %v2765_v32 = vmul.f32 0.25, %v2759_v29  ;;  %v2761_v33 = vadd.f32 %v2755_v19, %v2740_v30  ;;  %v2762_v34 = vadd.f32 %v2756_v12, %v2744_v31 }
 0x492   : > { %2770 = vst [vmem:[%s352_s24 + $0x8] sm:$0xff] %v2764_v9  ;;  %2771 = vst [vmem:[%s352_s24 + $0x10] sm:$0xff] %v2765_v32  ;;  %v2767_v35 = vmul.f32 0.25, %v2761_v33  ;;  %v2768_v36 = vmul.f32 0.25, %v2762_v34 }
 0x494   : > { %2773 = vst [vmem:[%s352_s24 + $0x20] sm:$0xff] %v2767_v35  ;;  %2774 = vst [vmem:[%s352_s24 + $0x28] sm:$0xff] %v2768_v36 }
 0x495   : > { %3672 = shalt.err (!%p3669_p2)
}
 0x496   : > { %s3673_s26 = scalar_lea.hbm %s4537_s17, 768  ;;  %s3677_s11 = scalar_lea.hbm %s4589_s8, 1536 }
 0x497   : > { %p3674_p13 = scmp.ne.s32.totalorder %s4537_s17, %s3673_s26  ;;  %p3678_p4 = scmp.lt.u32.totalorder %s4537_s17, %s4589_s8 }
 0x498   : > { %p3679_p5 = scmp.lt.u32.totalorder %s3677_s11, %s3673_s26  ;;  %p3681_p11 = scmp.lt.u32.totalorder %s3673_s26, %s4537_s17 }
 0x499   : > { %p3675_p6 = pnand %p3674_p13, %p4607_p0 }
 0x49a   : > { %p3680_p8 = por %p3679_p5, %p3678_p4 }
 0x49b   : > { %p3676_p10 = pneg %p3675_p6 }
 0x49c   : > { %p3682_p1 = por %p3681_p11, %p3680_p8 }
 0x49e   : > { %p3683_p3 = pnand %p3682_p1, %p3676_p10 }
 0x4a0   : > { %3686 = shalt.err (!%p3683_p3)
}
 0x4a1   : > { %s3750_s9 = smov 384   ;;  %s3751_s14 = smov 24  }
 0x4a2   : > { %3232 = dma.vmem_to_hbm [thread:$0]  (%p4607_p0), %s4532_s19, 768, %s4537_s17, %s2776_s13, %s3750_s9, %s3750_s9, %s3751_s14  }
 0x4a3 PF: > { %s2804_s10 = sand.u32 1, %s3717_s27   ;;  %p4608_p7 = scmp.ne.s32.totalorder %s4596_s12, 0 }
 0x4a4   : > { %p4609_p9 = scmp.ge.s32.totalorder %s3729_s30, 2  ;;  %s2805_s15 = scalar_lea.sflag [#allocation4], %s2804_s10 }
 0x4a6   : > { %p3246_p12 = pnand %p4609_p9, %p4608_p7 }
 0x4a8   : > { %3712 = dma.done.wait (!%p3246_p12), %s2805_s15, 768  }
 0x4a9   : > { %3714 = vsyncadd (!%p3246_p12), %s2805_s15, 4294966528  ;;  %p22_p2 = scmp.ge.s32.totalorder %s3907_s20, 4   ;;  %s4610_s27 = smov %s3721_s28 }
 0x4aa   : > { %s4611_s28 = smov %s3725_s29  ;;  %s4612_s29 = smov %s3923_s23 }
 0x4ab   : > { %s4613_s30 = smov %s3907_s20  ;;  %24 = sbr.rel (!%p22_p2) target bundleno = 9 (0x9), region = 121 }
 0x4b2   :  { %2810 = vsyncpa [#allocation3], 1 }
 0x4b3   :  { %2812 = vsyncpa [#allocation3 + $0x1], 1 }
 0x4b4   :  { %2813 = vsyncpa [#allocation6], 1 }
 0x4b5   :  { %2814 = vsyncpa [#allocation4], 1 }
 0x4b6   :  { %2816 = vsyncpa [#allocation4 + $0x1], 1 }

</bundles_post_ra>
